<compile_context>
chip_gen: v6e
topology: v6e:2x2x1
jax: 0.10.0
libtpu: 0.0.40
codegen_flags: <defaults>
</compile_context>

<pallas_src>
import jax
import jax.numpy as jnp
from jax.experimental import pallas as pl
from jax.experimental.pallas import tpu as pltpu

EPS = 1e-5
NEG_SLOPE = 0.2
KSIZE = 4
VMEM_LIMIT = 32 * 1024 * 1024  # explicit scoped-VMEM budget (safe on v5e/v6e/v7x)


# ---------------------------------------------------------------------------
# Pallas kernels
# ---------------------------------------------------------------------------
def _convt_bn_lrelu_kernel(w_ref, p_ref, g_ref, b_ref, o_ref, acc_ref):
    # Grid axis 0 iterates over K (contraction) tiles.
    # w: (C, tk) bf16, p: (tk, R) bf16, g/b: (C, 1) f32,
    # o: (C, R) bf16 (lane-dense), acc: (C, R) f32 resident accumulator.
    kk = pl.program_id(0)

    @pl.when(kk == 0)
    def _init():
        acc_ref[...] = jnp.zeros_like(acc_ref)

    acc_ref[...] += jnp.dot(w_ref[...], p_ref[...],
                            preferred_element_type=jnp.float32)

    @pl.when(kk == pl.num_programs(0) - 1)
    def _finalize():
        y = acc_ref[...]                                  # (C, R) f32
        inv_r = 1.0 / y.shape[-1]
        mean = jnp.sum(y, axis=-1, keepdims=True) * inv_r           # E[y]
        msq = jnp.sum(y * y, axis=-1, keepdims=True) * inv_r        # E[y^2]
        var = msq - mean * mean                                     # biased var
        scale = g_ref[...] * jax.lax.rsqrt(var + EPS)               # EUP rsqrt
        shift = b_ref[...] - mean * scale
        yn = y * scale + shift                                      # fused BN
        yn = jnp.where(yn >= 0, yn, NEG_SLOPE * yn)                 # LeakyReLU(0.2)
        o_ref[...] = yn.astype(o_ref.dtype)


def _convt_tanh_kernel(w_ref, p_ref, o_ref):
    # Grid axis 0 iterates over R (row) tiles; independent -> "parallel".
    # w: (8, K) bf16 (C_out padded 3->8), p: (K, tr) bf16, o: (8, tr) f32.
    y = jnp.dot(w_ref[...], p_ref[...], preferred_element_type=jnp.float32)
    o_ref[...] = jnp.tanh(y)


# ---------------------------------------------------------------------------
# pallas_call wrappers
# ---------------------------------------------------------------------------
def _convt_bn_lrelu(w_mat, patches, gamma, beta, tk=256):
    C, K = w_mat.shape
    _, R = patches.shape
    tk = tk if K % tk == 0 else K
    grid = (K // tk,)
    return pl.pallas_call(
        _convt_bn_lrelu_kernel,
        out_shape=jax.ShapeDtypeStruct((C, R), jnp.bfloat16),
        grid_spec=pltpu.PrefetchScalarGridSpec(
            num_scalar_prefetch=0,
            grid=grid,
            in_specs=[
                pl.BlockSpec((C, tk), lambda kk: (0, kk)),   # weight K-tile
                pl.BlockSpec((tk, R), lambda kk: (kk, 0)),   # patches K-tile (pipelined)
                pl.BlockSpec((C, 1), lambda kk: (0, 0)),     # gamma
                pl.BlockSpec((C, 1), lambda kk: (0, 0)),     # beta
            ],
            out_specs=pl.BlockSpec((C, R), lambda kk: (0, 0)),   # resident output
            scratch_shapes=[pltpu.VMEM((C, R), jnp.float32)],    # f32 accumulator
        ),
        compiler_params=pltpu.CompilerParams(
            dimension_semantics=("arbitrary",),              # reduction axis
            vmem_limit_bytes=VMEM_LIMIT,
        ),
    )(w_mat, patches, gamma, beta)


def _convt_tanh(w_mat, patches, tr):
    C, K = w_mat.shape          # C = 8 (padded)
    _, Rp = patches.shape       # Rp is a multiple of tr (padded by caller)
    grid = (Rp // tr,)
    return pl.pallas_call(
        _convt_tanh_kernel,
        out_shape=jax.ShapeDtypeStruct((C, Rp), jnp.float32),
        grid_spec=pltpu.PrefetchScalarGridSpec(
            num_scalar_prefetch=0,
            grid=grid,
            in_specs=[
                pl.BlockSpec((C, K), lambda r: (0, 0)),      # weights (resident)
                pl.BlockSpec((K, tr), lambda r: (0, r)),     # patches R-tile
            ],
            out_specs=pl.BlockSpec((C, tr), lambda r: (0, r)),
        ),
        compiler_params=pltpu.CompilerParams(
            dimension_semantics=("parallel",),               # megacore on v7x
            vmem_limit_bytes=VMEM_LIMIT,
        ),
    )(w_mat, patches)


# ---------------------------------------------------------------------------
# Glue: ConvTranspose2d -> im2col matmul (CBHW internal layout, no gathers)
# ---------------------------------------------------------------------------
def _dilate_and_pad(x, stride, pad, k):
    # x: (C, B, H, W). Zero-dilate by `stride` and pad by (k-1-pad) per side,
    # in one lax.pad (interior padding) — no scatter.
    pd = k - 1 - pad
    cfg = [(0, 0, 0), (0, 0, 0), (pd, pd, stride - 1), (pd, pd, stride - 1)]
    return jax.lax.pad(x, jnp.zeros((), x.dtype), cfg)


def _im2col_kR(xp, k):
    # xp: (C, B, Hp, Wp) -> patches (K = k*k*C, R = B*Ho*Wo), bf16.
    # K ordered (kh, kw, C); R ordered (B, Ho, Wo). Built from k*k static slices.
    C, B, Hp, Wp = xp.shape
    Ho, Wo = Hp - k + 1, Wp - k + 1
    slabs = [xp[:, :, kh:kh + Ho, kw:kw + Wo]
             for kh in range(k) for kw in range(k)]        # each (C, B, Ho, Wo)
    p = jnp.stack(slabs, axis=0)                           # (k*k, C, B, Ho, Wo)
    p = p.reshape(k * k * C, B * Ho * Wo)
    return p.astype(jnp.bfloat16), Ho, Wo


def _bn_layer(h, p, *, stride, pad, k=KSIZE):
    # h: (C_in, B, H, W) -> (C_out, B, Ho, Wo) bf16
    B = h.shape[1]
    xp = _dilate_and_pad(h, stride, pad, k)
    patches, Ho, Wo = _im2col_kR(xp, k)
    y = _convt_bn_lrelu(p["w"], patches, p["gamma"], p["beta"])   # (C_out, R)
    C_out = p["w"].shape[0]
    return y.reshape(C_out, B, Ho, Wo)


def _tanh_layer(h, p, *, stride, pad, c_out, k=KSIZE, tr=512):
    # h: (C_in, B, H, W) -> (c_out, B, Ho, Wo) f32
    B = h.shape[1]
    xp = _dilate_and_pad(h, stride, pad, k)
    patches, Ho, Wo = _im2col_kR(xp, k)
    R = B * Ho * Wo
    r_pad = ((R + tr - 1) // tr) * tr
    if r_pad != R:
        patches = jnp.pad(patches, ((0, 0), (0, r_pad - R)))       # tanh(0)=0, sliced off
    y = _convt_tanh(p["w"], patches, tr)                           # (8, r_pad)
    y = y[:c_out, :R]
    return y.reshape(c_out, B, Ho, Wo)


# ---------------------------------------------------------------------------
# Params
# ---------------------------------------------------------------------------
def init_params(key):
    # Raw PyTorch-layout parameters: ConvTranspose2d weight (C_in, C_out, k, k),
    # BatchNorm gamma=1 / beta=0 (default init).
    cfg = [(128, 64), (64, 32), (32, 16), (16, 3)]
    params = []
    for li, (ci, co) in enumerate(cfg):
        key, sub = jax.random.split(key)
        w = jax.random.normal(sub, (ci, co, KSIZE, KSIZE), jnp.float32) * 0.05
        p = {"w": w}
        if li < 3:
            p["gamma"] = jnp.ones((co,), jnp.float32)
            p["beta"] = jnp.zeros((co,), jnp.float32)
        params.append(p)
    return params


def prepare_params(params):
    # Hoisted out of the jitted forward: flip/transpose/flatten ConvT weights to
    # matmul layout (C_out, K) with K ordered (kh, kw, C_in), pad the final layer's
    # C_out 3 -> 8 sublanes, cast to bf16; reshape gamma/beta to (C, 1) f32.
    kp = []
    for li, p in enumerate(params):
        w_t = p["w"]                                        # (C_in, C_out, k, k)
        C_in, C_out, k, _ = w_t.shape
        w_conv = jnp.flip(w_t, axis=(2, 3)).transpose(1, 0, 2, 3)       # (C_out, C_in, k, k)
        w_mat = w_conv.transpose(0, 2, 3, 1).reshape(C_out, k * k * C_in)
        q = {}
        if li == 3:
            w_mat = jnp.pad(w_mat, ((0, 8 - C_out), (0, 0)))            # pad to 8 sublanes
        q["w"] = w_mat.astype(jnp.bfloat16)
        if "gamma" in p:
            q["gamma"] = p["gamma"].reshape(C_out, 1).astype(jnp.float32)
            q["beta"] = p["beta"].reshape(C_out, 1).astype(jnp.float32)
        kp.append(q)
    return kp


# ---------------------------------------------------------------------------
# Generator forward
# ---------------------------------------------------------------------------
@jax.jit
def generator_forward(x, kp):
    # x: (B, 128) latent -> (B, 3, 40, 40) f32 NCHW
    B = x.shape[0]
    h = x.T.reshape(128, B, 1, 1)                       # internal CBHW layout
    # ConvT(128->64, k4, s1, p0) + BN + LeakyReLU : 1x1 -> 4x4
    h = _bn_layer(h, kp[0], stride=1, pad=0)
    # ConvT(64->32, k4, s2, p0) + BN + LeakyReLU : 4x4 -> 10x10
    h = _bn_layer(h, kp[1], stride=2, pad=0)
    # ConvT(32->16, k4, s2, p1) + BN + LeakyReLU : 10x10 -> 20x20
    h = _bn_layer(h, kp[2], stride=2, pad=1)
    # ConvT(16->3, k4, s2, p1) + Tanh : 20x20 -> 40x40
    h = _tanh_layer(h, kp[3], stride=2, pad=1, c_out=3)
    return h.transpose(1, 0, 2, 3)                      # NCHW at module boundary


if __name__ == "__main__":
    key = jax.random.PRNGKey(0)
    key, xk = jax.random.split(key)
    B = 2
    x = jax.random.normal(xk, (B, 128), jnp.float32)
    params = init_params(key)
    kparams = prepare_params(params)        # weight layout transform, runs once

    out = generator_forward(x, kparams)
    out = jax.block_until_ready(out)

    assert out.shape == (B, 3, 40, 40), out.shape
    assert out.dtype == jnp.float32
    assert bool(jnp.all(jnp.isfinite(out)))
    assert bool(jnp.all(jnp.abs(out) <= 1.0))   # tanh output range
    print("KERNEL_OK")
</pallas_src>

<mosaic_0001>
module attributes {stable_mosaic.version = 11 : i64} {
  func.func @_convt_bn_lrelu_kernel(%arg0: i32, %arg1: memref<64x256xbf16, #tpu.memory_space<vmem>>, %arg2: memref<256x32xbf16, #tpu.memory_space<vmem>>, %arg3: memref<64x1xf32, #tpu.memory_space<vmem>>, %arg4: memref<64x1xf32, #tpu.memory_space<vmem>>, %arg5: memref<64x32xbf16, #tpu.memory_space<vmem>>, %arg6: memref<64x32xf32, #tpu.memory_space<vmem>>) attributes {dimension_semantics = [#tpu.dimension_semantics<arbitrary>], iteration_bounds = array<i64: 8>, scalar_prefetch = 0 : i64, scratch_operands = 1 : i64, tpu.core_type = #tpu.core_type<tc>, window_params = [{transform_indices = @transform_0, window_bounds = array<i64: 64, 256>}, {transform_indices = @transform_1, window_bounds = array<i64: 256, 32>}, {pipeline_mode = #tpu.pipeline_mode<synchronous>, transform_indices = @transform_2, window_bounds = array<i64: 64, 1>}, {pipeline_mode = #tpu.pipeline_mode<synchronous>, transform_indices = @transform_3, window_bounds = array<i64: 64, 1>}, {pipeline_mode = #tpu.pipeline_mode<synchronous>, transform_indices = @transform_4, window_bounds = array<i64: 64, 32>}]} {
    %c0_i32 = arith.constant 0 : i32
    %0 = arith.cmpi eq, %arg0, %c0_i32 : i32
    %1 = arith.extui %0 : i1 to i32
    %c0_i32_0 = arith.constant 0 : i32
    %2 = arith.cmpi ne, %1, %c0_i32_0 : i32
    scf.if %2 {
      %cst_9 = arith.constant 0.000000e+00 : f32
      %12 = vector.broadcast %cst_9 : f32 to vector<64x32xf32>
      %c0_10 = arith.constant 0 : index
      %c0_11 = arith.constant 0 : index
      %13 = vector.load %arg6[%c0_10, %c0_11] : memref<64x32xf32, #tpu.memory_space<vmem>>, vector<64x32xf32>
      tpu.vector_store %arg6[%c0_10, %c0_11], %12 {strides = array<i32>} : memref<64x32xf32, #tpu.memory_space<vmem>>, vector<64x32xf32>,
    } else {
    }
    %c0 = arith.constant 0 : index
    %c0_1 = arith.constant 0 : index
    %3 = vector.load %arg6[%c0, %c0_1] : memref<64x32xf32, #tpu.memory_space<vmem>>, vector<64x32xf32>
    %c0_2 = arith.constant 0 : index
    %c0_3 = arith.constant 0 : index
    %4 = vector.load %arg1[%c0_2, %c0_3] : memref<64x256xbf16, #tpu.memory_space<vmem>>, vector<64x256xbf16>
    %c0_4 = arith.constant 0 : index
    %c0_5 = arith.constant 0 : index
    %5 = vector.load %arg2[%c0_4, %c0_5] : memref<256x32xbf16, #tpu.memory_space<vmem>>, vector<256x32xbf16>
    %cst = arith.constant dense<0.000000e+00> : vector<64x32xf32>
    %6 = tpu.matmul %4, %5, %cst {dimension_numbers = #tpu.dot_dimension_numbers<[1], [0], [0], [1], [0, 0, 1, 1], [], []>} : vector<64x256xbf16>, vector<256x32xbf16>, vector<64x32xf32> -> vector<64x32xf32>
    %7 = arith.addf %3, %6 : vector<64x32xf32>
    %c0_6 = arith.constant 0 : index
    %c0_7 = arith.constant 0 : index
    %8 = vector.load %arg6[%c0_6, %c0_7] : memref<64x32xf32, #tpu.memory_space<vmem>>, vector<64x32xf32>
    tpu.vector_store %arg6[%c0_6, %c0_7], %7 {strides = array<i32>} : memref<64x32xf32, #tpu.memory_space<vmem>>, vector<64x32xf32>,
    %c7_i32 = arith.constant 7 : i32
    %9 = arith.cmpi eq, %arg0, %c7_i32 : i32
    %10 = arith.extui %9 : i1 to i32
    %c0_i32_8 = arith.constant 0 : i32
    %11 = arith.cmpi ne, %10, %c0_i32_8 : i32
    scf.if %11 {
      %c0_9 = arith.constant 0 : index
      %c0_10 = arith.constant 0 : index
      %12 = vector.load %arg6[%c0_9, %c0_10] : memref<64x32xf32, #tpu.memory_space<vmem>>, vector<64x32xf32>
      %cst_11 = arith.constant dense<0.000000e+00> : vector<64xf32>
      %13 = vector.multi_reduction <add>, %12, %cst_11 [1] : vector<64x32xf32> to vector<64xf32>
      %14 = vector.shape_cast %13 : vector<64xf32> to vector<64x1xf32>
      %cst_12 = arith.constant 3.125000e-02 : f32
      %15 = vector.broadcast %cst_12 : f32 to vector<64x1xf32>
      %16 = arith.mulf %14, %15 : vector<64x1xf32>
      %17 = arith.mulf %12, %12 : vector<64x32xf32>
      %cst_13 = arith.constant dense<0.000000e+00> : vector<64xf32>
      %18 = vector.multi_reduction <add>, %17, %cst_13 [1] : vector<64x32xf32> to vector<64xf32>
      %19 = vector.shape_cast %18 : vector<64xf32> to vector<64x1xf32>
      %cst_14 = arith.constant 3.125000e-02 : f32
      %20 = vector.broadcast %cst_14 : f32 to vector<64x1xf32>
      %21 = arith.mulf %19, %20 : vector<64x1xf32>
      %22 = arith.mulf %16, %16 : vector<64x1xf32>
      %23 = arith.subf %21, %22 : vector<64x1xf32>
      %c0_15 = arith.constant 0 : index
      %c0_16 = arith.constant 0 : index
      %24 = vector.load %arg3[%c0_15, %c0_16] : memref<64x1xf32, #tpu.memory_space<vmem>>, vector<64x1xf32>
      %cst_17 = arith.constant 9.99999974E-6 : f32
      %25 = vector.broadcast %cst_17 : f32 to vector<64x1xf32>
      %26 = arith.addf %23, %25 : vector<64x1xf32>
      %27 = math.rsqrt %26 : vector<64x1xf32>
      %28 = arith.mulf %24, %27 : vector<64x1xf32>
      %c0_18 = arith.constant 0 : index
      %c0_19 = arith.constant 0 : index
      %29 = vector.load %arg4[%c0_18, %c0_19] : memref<64x1xf32, #tpu.memory_space<vmem>>, vector<64x1xf32>
      %30 = arith.mulf %16, %28 : vector<64x1xf32>
      %31 = arith.subf %29, %30 : vector<64x1xf32>
      %32 = vector.broadcast %28 : vector<64x1xf32> to vector<64x32xf32>
      %33 = arith.mulf %12, %32 : vector<64x32xf32>
      %34 = vector.broadcast %31 : vector<64x1xf32> to vector<64x32xf32>
      %35 = arith.addf %33, %34 : vector<64x32xf32>
      %cst_20 = arith.constant 0.000000e+00 : f32
      %36 = vector.broadcast %cst_20 : f32 to vector<64x32xf32>
      %37 = arith.cmpf oge, %35, %36 : vector<64x32xf32>
      %cst_21 = arith.constant 2.000000e-01 : f32
      %38 = vector.broadcast %cst_21 : f32 to vector<64x32xf32>
      %39 = arith.mulf %38, %35 : vector<64x32xf32>
      %40 = arith.select %37, %35, %39 : vector<64x32xi1>, vector<64x32xf32>
      %41 = arith.truncf %40 : vector<64x32xf32> to vector<64x32xbf16>
      %c0_22 = arith.constant 0 : index
      %c0_23 = arith.constant 0 : index
      %42 = vector.load %arg5[%c0_22, %c0_23] : memref<64x32xbf16, #tpu.memory_space<vmem>>, vector<64x32xbf16>
      tpu.vector_store %arg5[%c0_22, %c0_23], %41 {strides = array<i32>} : memref<64x32xbf16, #tpu.memory_space<vmem>>, vector<64x32xbf16>,
    } else {
    }
    return
  }
  func.func @transform_0(%arg0: i32) -> (i32, i32) {
    %c0_i32 = arith.constant 0 : i32
    %c0_i32_0 = arith.constant 0 : i32
    return %c0_i32, %arg0 : i32, i32
  }
  func.func @transform_1(%arg0: i32) -> (i32, i32) {
    %c0_i32 = arith.constant 0 : i32
    %c0_i32_0 = arith.constant 0 : i32
    return %arg0, %c0_i32 : i32, i32
  }
  func.func @transform_2(%arg0: i32) -> (i32, i32) {
    %c0_i32 = arith.constant 0 : i32
    %c0_i32_0 = arith.constant 0 : i32
    %c0_i32_1 = arith.constant 0 : i32
    return %c0_i32, %c0_i32_0 : i32, i32
  }
  func.func @transform_3(%arg0: i32) -> (i32, i32) {
    %c0_i32 = arith.constant 0 : i32
    %c0_i32_0 = arith.constant 0 : i32
    %c0_i32_1 = arith.constant 0 : i32
    return %c0_i32, %c0_i32_0 : i32, i32
  }
  func.func @transform_4(%arg0: i32) -> (i32, i32) {
    %c0_i32 = arith.constant 0 : i32
    %c0_i32_0 = arith.constant 0 : i32
    %c0_i32_1 = arith.constant 0 : i32
    return %c0_i32, %c0_i32_0 : i32, i32
  }
}

module attributes {stable_mosaic.version = 11 : i64} {
  func.func @_convt_bn_lrelu_kernel(%arg0: i32, %arg1: memref<32x256xbf16, #tpu.memory_space<vmem>>, %arg2: memref<256x200xbf16, #tpu.memory_space<vmem>>, %arg3: memref<32x1xf32, #tpu.memory_space<vmem>>, %arg4: memref<32x1xf32, #tpu.memory_space<vmem>>, %arg5: memref<32x200xbf16, #tpu.memory_space<vmem>>, %arg6: memref<32x200xf32, #tpu.memory_space<vmem>>) attributes {dimension_semantics = [#tpu.dimension_semantics<arbitrary>], iteration_bounds = array<i64: 4>, scalar_prefetch = 0 : i64, scratch_operands = 1 : i64, tpu.core_type = #tpu.core_type<tc>, window_params = [{transform_indices = @transform_0, window_bounds = array<i64: 32, 256>}, {transform_indices = @transform_1, window_bounds = array<i64: 256, 200>}, {pipeline_mode = #tpu.pipeline_mode<synchronous>, transform_indices = @transform_2, window_bounds = array<i64: 32, 1>}, {pipeline_mode = #tpu.pipeline_mode<synchronous>, transform_indices = @transform_3, window_bounds = array<i64: 32, 1>}, {pipeline_mode = #tpu.pipeline_mode<synchronous>, transform_indices = @transform_4, window_bounds = array<i64: 32, 200>}]} {
    %c0_i32 = arith.constant 0 : i32
    %0 = arith.cmpi eq, %arg0, %c0_i32 : i32
    %1 = arith.extui %0 : i1 to i32
    %c0_i32_0 = arith.constant 0 : i32
    %2 = arith.cmpi ne, %1, %c0_i32_0 : i32
    scf.if %2 {
      %cst_9 = arith.constant 0.000000e+00 : f32
      %12 = vector.broadcast %cst_9 : f32 to vector<32x200xf32>
      %c0_10 = arith.constant 0 : index
      %c0_11 = arith.constant 0 : index
      %13 = vector.load %arg6[%c0_10, %c0_11] : memref<32x200xf32, #tpu.memory_space<vmem>>, vector<32x200xf32>
      tpu.vector_store %arg6[%c0_10, %c0_11], %12 {strides = array<i32>} : memref<32x200xf32, #tpu.memory_space<vmem>>, vector<32x200xf32>,
    } else {
    }
    %c0 = arith.constant 0 : index
    %c0_1 = arith.constant 0 : index
    %3 = vector.load %arg6[%c0, %c0_1] : memref<32x200xf32, #tpu.memory_space<vmem>>, vector<32x200xf32>
    %c0_2 = arith.constant 0 : index
    %c0_3 = arith.constant 0 : index
    %4 = vector.load %arg1[%c0_2, %c0_3] : memref<32x256xbf16, #tpu.memory_space<vmem>>, vector<32x256xbf16>
    %c0_4 = arith.constant 0 : index
    %c0_5 = arith.constant 0 : index
    %5 = vector.load %arg2[%c0_4, %c0_5] : memref<256x200xbf16, #tpu.memory_space<vmem>>, vector<256x200xbf16>
    %cst = arith.constant dense<0.000000e+00> : vector<32x200xf32>
    %6 = tpu.matmul %4, %5, %cst {dimension_numbers = #tpu.dot_dimension_numbers<[1], [0], [0], [1], [0, 0, 1, 1], [], []>} : vector<32x256xbf16>, vector<256x200xbf16>, vector<32x200xf32> -> vector<32x200xf32>
    %7 = arith.addf %3, %6 : vector<32x200xf32>
    %c0_6 = arith.constant 0 : index
    %c0_7 = arith.constant 0 : index
    %8 = vector.load %arg6[%c0_6, %c0_7] : memref<32x200xf32, #tpu.memory_space<vmem>>, vector<32x200xf32>
    tpu.vector_store %arg6[%c0_6, %c0_7], %7 {strides = array<i32>} : memref<32x200xf32, #tpu.memory_space<vmem>>, vector<32x200xf32>,
    %c3_i32 = arith.constant 3 : i32
    %9 = arith.cmpi eq, %arg0, %c3_i32 : i32
    %10 = arith.extui %9 : i1 to i32
    %c0_i32_8 = arith.constant 0 : i32
    %11 = arith.cmpi ne, %10, %c0_i32_8 : i32
    scf.if %11 {
      %c0_9 = arith.constant 0 : index
      %c0_10 = arith.constant 0 : index
      %12 = vector.load %arg6[%c0_9, %c0_10] : memref<32x200xf32, #tpu.memory_space<vmem>>, vector<32x200xf32>
      %cst_11 = arith.constant dense<0.000000e+00> : vector<32xf32>
      %13 = vector.multi_reduction <add>, %12, %cst_11 [1] : vector<32x200xf32> to vector<32xf32>
      %14 = vector.shape_cast %13 : vector<32xf32> to vector<32x1xf32>
      %cst_12 = arith.constant 5.000000e-03 : f32
      %15 = vector.broadcast %cst_12 : f32 to vector<32x1xf32>
      %16 = arith.mulf %14, %15 : vector<32x1xf32>
      %17 = arith.mulf %12, %12 : vector<32x200xf32>
      %cst_13 = arith.constant dense<0.000000e+00> : vector<32xf32>
      %18 = vector.multi_reduction <add>, %17, %cst_13 [1] : vector<32x200xf32> to vector<32xf32>
      %19 = vector.shape_cast %18 : vector<32xf32> to vector<32x1xf32>
      %cst_14 = arith.constant 5.000000e-03 : f32
      %20 = vector.broadcast %cst_14 : f32 to vector<32x1xf32>
      %21 = arith.mulf %19, %20 : vector<32x1xf32>
      %22 = arith.mulf %16, %16 : vector<32x1xf32>
      %23 = arith.subf %21, %22 : vector<32x1xf32>
      %c0_15 = arith.constant 0 : index
      %c0_16 = arith.constant 0 : index
      %24 = vector.load %arg3[%c0_15, %c0_16] : memref<32x1xf32, #tpu.memory_space<vmem>>, vector<32x1xf32>
      %cst_17 = arith.constant 9.99999974E-6 : f32
      %25 = vector.broadcast %cst_17 : f32 to vector<32x1xf32>
      %26 = arith.addf %23, %25 : vector<32x1xf32>
      %27 = math.rsqrt %26 : vector<32x1xf32>
      %28 = arith.mulf %24, %27 : vector<32x1xf32>
      %c0_18 = arith.constant 0 : index
      %c0_19 = arith.constant 0 : index
      %29 = vector.load %arg4[%c0_18, %c0_19] : memref<32x1xf32, #tpu.memory_space<vmem>>, vector<32x1xf32>
      %30 = arith.mulf %16, %28 : vector<32x1xf32>
      %31 = arith.subf %29, %30 : vector<32x1xf32>
      %32 = vector.broadcast %28 : vector<32x1xf32> to vector<32x200xf32>
      %33 = arith.mulf %12, %32 : vector<32x200xf32>
      %34 = vector.broadcast %31 : vector<32x1xf32> to vector<32x200xf32>
      %35 = arith.addf %33, %34 : vector<32x200xf32>
      %cst_20 = arith.constant 0.000000e+00 : f32
      %36 = vector.broadcast %cst_20 : f32 to vector<32x200xf32>
      %37 = arith.cmpf oge, %35, %36 : vector<32x200xf32>
      %cst_21 = arith.constant 2.000000e-01 : f32
      %38 = vector.broadcast %cst_21 : f32 to vector<32x200xf32>
      %39 = arith.mulf %38, %35 : vector<32x200xf32>
      %40 = arith.select %37, %35, %39 : vector<32x200xi1>, vector<32x200xf32>
      %41 = arith.truncf %40 : vector<32x200xf32> to vector<32x200xbf16>
      %c0_22 = arith.constant 0 : index
      %c0_23 = arith.constant 0 : index
      %42 = vector.load %arg5[%c0_22, %c0_23] : memref<32x200xbf16, #tpu.memory_space<vmem>>, vector<32x200xbf16>
      tpu.vector_store %arg5[%c0_22, %c0_23], %41 {strides = array<i32>} : memref<32x200xbf16, #tpu.memory_space<vmem>>, vector<32x200xbf16>,
    } else {
    }
    return
  }
  func.func @transform_0(%arg0: i32) -> (i32, i32) {
    %c0_i32 = arith.constant 0 : i32
    %c0_i32_0 = arith.constant 0 : i32
    return %c0_i32, %arg0 : i32, i32
  }
  func.func @transform_1(%arg0: i32) -> (i32, i32) {
    %c0_i32 = arith.constant 0 : i32
    %c0_i32_0 = arith.constant 0 : i32
    return %arg0, %c0_i32 : i32, i32
  }
  func.func @transform_2(%arg0: i32) -> (i32, i32) {
    %c0_i32 = arith.constant 0 : i32
    %c0_i32_0 = arith.constant 0 : i32
    %c0_i32_1 = arith.constant 0 : i32
    return %c0_i32, %c0_i32_0 : i32, i32
  }
  func.func @transform_3(%arg0: i32) -> (i32, i32) {
    %c0_i32 = arith.constant 0 : i32
    %c0_i32_0 = arith.constant 0 : i32
    %c0_i32_1 = arith.constant 0 : i32
    return %c0_i32, %c0_i32_0 : i32, i32
  }
  func.func @transform_4(%arg0: i32) -> (i32, i32) {
    %c0_i32 = arith.constant 0 : i32
    %c0_i32_0 = arith.constant 0 : i32
    %c0_i32_1 = arith.constant 0 : i32
    return %c0_i32, %c0_i32_0 : i32, i32
  }
}

module attributes {stable_mosaic.version = 11 : i64} {
  func.func @_convt_bn_lrelu_kernel(%arg0: i32, %arg1: memref<16x256xbf16, #tpu.memory_space<vmem>>, %arg2: memref<256x800xbf16, #tpu.memory_space<vmem>>, %arg3: memref<16x1xf32, #tpu.memory_space<vmem>>, %arg4: memref<16x1xf32, #tpu.memory_space<vmem>>, %arg5: memref<16x800xbf16, #tpu.memory_space<vmem>>, %arg6: memref<16x800xf32, #tpu.memory_space<vmem>>) attributes {dimension_semantics = [#tpu.dimension_semantics<arbitrary>], iteration_bounds = array<i64: 2>, scalar_prefetch = 0 : i64, scratch_operands = 1 : i64, tpu.core_type = #tpu.core_type<tc>, window_params = [{transform_indices = @transform_0, window_bounds = array<i64: 16, 256>}, {transform_indices = @transform_1, window_bounds = array<i64: 256, 800>}, {pipeline_mode = #tpu.pipeline_mode<synchronous>, transform_indices = @transform_2, window_bounds = array<i64: 16, 1>}, {pipeline_mode = #tpu.pipeline_mode<synchronous>, transform_indices = @transform_3, window_bounds = array<i64: 16, 1>}, {pipeline_mode = #tpu.pipeline_mode<synchronous>, transform_indices = @transform_4, window_bounds = array<i64: 16, 800>}]} {
    %c0_i32 = arith.constant 0 : i32
    %0 = arith.cmpi eq, %arg0, %c0_i32 : i32
    %1 = arith.extui %0 : i1 to i32
    %c0_i32_0 = arith.constant 0 : i32
    %2 = arith.cmpi ne, %1, %c0_i32_0 : i32
    scf.if %2 {
      %cst_9 = arith.constant 0.000000e+00 : f32
      %12 = vector.broadcast %cst_9 : f32 to vector<16x800xf32>
      %c0_10 = arith.constant 0 : index
      %c0_11 = arith.constant 0 : index
      %13 = vector.load %arg6[%c0_10, %c0_11] : memref<16x800xf32, #tpu.memory_space<vmem>>, vector<16x800xf32>
      tpu.vector_store %arg6[%c0_10, %c0_11], %12 {strides = array<i32>} : memref<16x800xf32, #tpu.memory_space<vmem>>, vector<16x800xf32>,
    } else {
    }
    %c0 = arith.constant 0 : index
    %c0_1 = arith.constant 0 : index
    %3 = vector.load %arg6[%c0, %c0_1] : memref<16x800xf32, #tpu.memory_space<vmem>>, vector<16x800xf32>
    %c0_2 = arith.constant 0 : index
    %c0_3 = arith.constant 0 : index
    %4 = vector.load %arg1[%c0_2, %c0_3] : memref<16x256xbf16, #tpu.memory_space<vmem>>, vector<16x256xbf16>
    %c0_4 = arith.constant 0 : index
    %c0_5 = arith.constant 0 : index
    %5 = vector.load %arg2[%c0_4, %c0_5] : memref<256x800xbf16, #tpu.memory_space<vmem>>, vector<256x800xbf16>
    %cst = arith.constant dense<0.000000e+00> : vector<16x800xf32>
    %6 = tpu.matmul %4, %5, %cst {dimension_numbers = #tpu.dot_dimension_numbers<[1], [0], [0], [1], [0, 0, 1, 1], [], []>} : vector<16x256xbf16>, vector<256x800xbf16>, vector<16x800xf32> -> vector<16x800xf32>
    %7 = arith.addf %3, %6 : vector<16x800xf32>
    %c0_6 = arith.constant 0 : index
    %c0_7 = arith.constant 0 : index
    %8 = vector.load %arg6[%c0_6, %c0_7] : memref<16x800xf32, #tpu.memory_space<vmem>>, vector<16x800xf32>
    tpu.vector_store %arg6[%c0_6, %c0_7], %7 {strides = array<i32>} : memref<16x800xf32, #tpu.memory_space<vmem>>, vector<16x800xf32>,
    %c1_i32 = arith.constant 1 : i32
    %9 = arith.cmpi eq, %arg0, %c1_i32 : i32
    %10 = arith.extui %9 : i1 to i32
    %c0_i32_8 = arith.constant 0 : i32
    %11 = arith.cmpi ne, %10, %c0_i32_8 : i32
    scf.if %11 {
      %c0_9 = arith.constant 0 : index
      %c0_10 = arith.constant 0 : index
      %12 = vector.load %arg6[%c0_9, %c0_10] : memref<16x800xf32, #tpu.memory_space<vmem>>, vector<16x800xf32>
      %cst_11 = arith.constant dense<0.000000e+00> : vector<16xf32>
      %13 = vector.multi_reduction <add>, %12, %cst_11 [1] : vector<16x800xf32> to vector<16xf32>
      %14 = vector.shape_cast %13 : vector<16xf32> to vector<16x1xf32>
      %cst_12 = arith.constant 1.250000e-03 : f32
      %15 = vector.broadcast %cst_12 : f32 to vector<16x1xf32>
      %16 = arith.mulf %14, %15 : vector<16x1xf32>
      %17 = arith.mulf %12, %12 : vector<16x800xf32>
      %cst_13 = arith.constant dense<0.000000e+00> : vector<16xf32>
      %18 = vector.multi_reduction <add>, %17, %cst_13 [1] : vector<16x800xf32> to vector<16xf32>
      %19 = vector.shape_cast %18 : vector<16xf32> to vector<16x1xf32>
      %cst_14 = arith.constant 1.250000e-03 : f32
      %20 = vector.broadcast %cst_14 : f32 to vector<16x1xf32>
      %21 = arith.mulf %19, %20 : vector<16x1xf32>
      %22 = arith.mulf %16, %16 : vector<16x1xf32>
      %23 = arith.subf %21, %22 : vector<16x1xf32>
      %c0_15 = arith.constant 0 : index
      %c0_16 = arith.constant 0 : index
      %24 = vector.load %arg3[%c0_15, %c0_16] : memref<16x1xf32, #tpu.memory_space<vmem>>, vector<16x1xf32>
      %cst_17 = arith.constant 9.99999974E-6 : f32
      %25 = vector.broadcast %cst_17 : f32 to vector<16x1xf32>
      %26 = arith.addf %23, %25 : vector<16x1xf32>
      %27 = math.rsqrt %26 : vector<16x1xf32>
      %28 = arith.mulf %24, %27 : vector<16x1xf32>
      %c0_18 = arith.constant 0 : index
      %c0_19 = arith.constant 0 : index
      %29 = vector.load %arg4[%c0_18, %c0_19] : memref<16x1xf32, #tpu.memory_space<vmem>>, vector<16x1xf32>
      %30 = arith.mulf %16, %28 : vector<16x1xf32>
      %31 = arith.subf %29, %30 : vector<16x1xf32>
      %32 = vector.broadcast %28 : vector<16x1xf32> to vector<16x800xf32>
      %33 = arith.mulf %12, %32 : vector<16x800xf32>
      %34 = vector.broadcast %31 : vector<16x1xf32> to vector<16x800xf32>
      %35 = arith.addf %33, %34 : vector<16x800xf32>
      %cst_20 = arith.constant 0.000000e+00 : f32
      %36 = vector.broadcast %cst_20 : f32 to vector<16x800xf32>
      %37 = arith.cmpf oge, %35, %36 : vector<16x800xf32>
      %cst_21 = arith.constant 2.000000e-01 : f32
      %38 = vector.broadcast %cst_21 : f32 to vector<16x800xf32>
      %39 = arith.mulf %38, %35 : vector<16x800xf32>
      %40 = arith.select %37, %35, %39 : vector<16x800xi1>, vector<16x800xf32>
      %41 = arith.truncf %40 : vector<16x800xf32> to vector<16x800xbf16>
      %c0_22 = arith.constant 0 : index
      %c0_23 = arith.constant 0 : index
      %42 = vector.load %arg5[%c0_22, %c0_23] : memref<16x800xbf16, #tpu.memory_space<vmem>>, vector<16x800xbf16>
      tpu.vector_store %arg5[%c0_22, %c0_23], %41 {strides = array<i32>} : memref<16x800xbf16, #tpu.memory_space<vmem>>, vector<16x800xbf16>,
    } else {
    }
    return
  }
  func.func @transform_0(%arg0: i32) -> (i32, i32) {
    %c0_i32 = arith.constant 0 : i32
    %c0_i32_0 = arith.constant 0 : i32
    return %c0_i32, %arg0 : i32, i32
  }
  func.func @transform_1(%arg0: i32) -> (i32, i32) {
    %c0_i32 = arith.constant 0 : i32
    %c0_i32_0 = arith.constant 0 : i32
    return %arg0, %c0_i32 : i32, i32
  }
  func.func @transform_2(%arg0: i32) -> (i32, i32) {
    %c0_i32 = arith.constant 0 : i32
    %c0_i32_0 = arith.constant 0 : i32
    %c0_i32_1 = arith.constant 0 : i32
    return %c0_i32, %c0_i32_0 : i32, i32
  }
  func.func @transform_3(%arg0: i32) -> (i32, i32) {
    %c0_i32 = arith.constant 0 : i32
    %c0_i32_0 = arith.constant 0 : i32
    %c0_i32_1 = arith.constant 0 : i32
    return %c0_i32, %c0_i32_0 : i32, i32
  }
  func.func @transform_4(%arg0: i32) -> (i32, i32) {
    %c0_i32 = arith.constant 0 : i32
    %c0_i32_0 = arith.constant 0 : i32
    %c0_i32_1 = arith.constant 0 : i32
    return %c0_i32, %c0_i32_0 : i32, i32
  }
}

module attributes {stable_mosaic.version = 11 : i64} {
  func.func @_convt_tanh_kernel(%arg0: i32, %arg1: memref<8x256xbf16, #tpu.memory_space<vmem>>, %arg2: memref<256x512xbf16, #tpu.memory_space<vmem>>, %arg3: memref<8x512xf32, #tpu.memory_space<vmem>>) attributes {dimension_semantics = [#tpu.dimension_semantics<parallel>], iteration_bounds = array<i64: 7>, scalar_prefetch = 0 : i64, scratch_operands = 0 : i64, tpu.core_type = #tpu.core_type<tc>, window_params = [{pipeline_mode = #tpu.pipeline_mode<synchronous>, transform_indices = @transform_0, window_bounds = array<i64: 8, 256>}, {transform_indices = @transform_1, window_bounds = array<i64: 256, 512>}, {transform_indices = @transform_2, window_bounds = array<i64: 8, 512>}]} {
    %c0 = arith.constant 0 : index
    %c0_0 = arith.constant 0 : index
    %0 = vector.load %arg1[%c0, %c0_0] : memref<8x256xbf16, #tpu.memory_space<vmem>>, vector<8x256xbf16>
    %c0_1 = arith.constant 0 : index
    %c0_2 = arith.constant 0 : index
    %1 = vector.load %arg2[%c0_1, %c0_2] : memref<256x512xbf16, #tpu.memory_space<vmem>>, vector<256x512xbf16>
    %cst = arith.constant dense<0.000000e+00> : vector<8x512xf32>
    %2 = tpu.matmul %0, %1, %cst {dimension_numbers = #tpu.dot_dimension_numbers<[1], [0], [0], [1], [0, 0, 1, 1], [], []>} : vector<8x256xbf16>, vector<256x512xbf16>, vector<8x512xf32> -> vector<8x512xf32>
    %3 = math.tanh %2 : vector<8x512xf32>
    %c0_3 = arith.constant 0 : index
    %c0_4 = arith.constant 0 : index
    %4 = vector.load %arg3[%c0_3, %c0_4] : memref<8x512xf32, #tpu.memory_space<vmem>>, vector<8x512xf32>
    tpu.vector_store %arg3[%c0_3, %c0_4], %3 {strides = array<i32>} : memref<8x512xf32, #tpu.memory_space<vmem>>, vector<8x512xf32>,
    return
  }
  func.func @transform_0(%arg0: i32) -> (i32, i32) {
    %c0_i32 = arith.constant 0 : i32
    %c0_i32_0 = arith.constant 0 : i32
    %c0_i32_1 = arith.constant 0 : i32
    return %c0_i32, %c0_i32_0 : i32, i32
  }
  func.func @transform_1(%arg0: i32) -> (i32, i32) {
    %c0_i32 = arith.constant 0 : i32
    %c0_i32_0 = arith.constant 0 : i32
    return %c0_i32, %arg0 : i32, i32
  }
  func.func @transform_2(%arg0: i32) -> (i32, i32) {
    %c0_i32 = arith.constant 0 : i32
    %c0_i32_0 = arith.constant 0 : i32
    return %c0_i32, %arg0 : i32, i32
  }
}

</mosaic_0001>

<bundles_post_ra>
// kernel: generator_forward.4
= control target key start
LH: loop header
LB: loop body
LE: loop exit
PB: predicated region body
PF: predicated region fallthrough
CT: control target
= control target key end

     0   :  { %9 = vsyncpa [#allocation4], 0  ;;  %s1490_s0 = inlined_call_operand.hbm [shape: bf16[64,2048], index: 0, kind: input, shape index: {}]   ;;  %s1491_s1 = inlined_call_operand.vmem [shape: bf16[2048,32], index: 1, kind: input, shape index: {}]   ;;  %s1492_s2 = inlined_call_operand.vmem [shape: f32[64,1], index: 2, kind: input, shape index: {}]   ;;  %s1493_s3 = inlined_call_operand.vmem [shape: f32[64,1], index: 3, kind: input, shape index: {}]   ;;  %s1494_s4 = inlined_call_operand.vmem [shape: bf16[64,32], index: 4, kind: output, shape index: {}]  }
   0x1   :  { %11 = vsyncpa [#allocation4 + $0x1], 0  ;;  %s1170_s15 = smov 0   ;;  %s1172_s16 = smov 0  }
   0x2   :  { %s1174_s17 = smov 0   ;;  %s1176_s18 = smov 0  }
   0x3 LB: > { %s1189_s19 = sadd.s32 4294967295, %s1137_s18   ;;  %s1192_s20 = sadd.s32 1, %s1137_s18   ;;  %s1137_s18 = sphi %s1176_s18, %s1502_s18   ;;  %s1133_s17 = sphi %s1174_s17, %s1501_s17   ;;  %s1129_s16 = sphi %s1172_s16, %s1500_s16   ;;  %s1125_s15 = sphi %s1170_s15, %s1499_s15  }
   0x4   : > { %s21_s21 = ssub.s32 %s1137_s18, %s1192_s20  ;;  %s24_s22 = sadd.s32 1, %s1133_s17 }
   0x5   : > { %p22_p0 = scmp.eq.s32.totalorder %s21_s21, 0  ;;  %p31_p1 = scmp.ne.s32.totalorder %s1133_s17, %s1129_s16 }
   0x6   : > { %p32_p2 = scmp.eq.s32.totalorder %s1137_s18, 0  ;;  %p37_p3 = scmp.ne.s32.totalorder %s1129_s16, %s1125_s15 }
   0x7   : > { %s1202_s23 = scalar_select %p22_p0, %s1133_s17, %s24_s22  }
   0x8   : > { %p33_p4 = por %p32_p2, %p31_p1  ;;  %p38_p5 = scmp.eq.s32.totalorder %s1189_s19, 0 }
   0x9   : > { %p991_p6 = scmp.lt.s32.totalorder %s1137_s18, 8  ;;  %s156_s25 = sand.u32 1, %s1133_s17  }
   0xa   : > { %p1206_p7 = por %p38_p5, %p37_p3  ;;  %s877_s26 = sshll.u32 %s156_s25, 6 }
   0xb   : > { %s920_s27 = sshll.u32 %s1137_s18, 7  ;;  %s160_s5 = scalar_lea.vmem [#allocation3], %s877_s26 }
   0xc   : > { %s1496_s24 = scalar_select %p1206_p7, 1, 0 }
   0xd   : > { %s1215_s30 = scalar_lea.hbm %s1490_s0, %s920_s27  ;;  %s167_s6 = sshll.u32 %s160_s5, 4  ;;  %s1217_s6 = int_to_ptr.vmem [resolvable:$true] %s167_s6 }
   0xe   : > { %p1219_p8 = pnand %p991_p6, %p33_p4  ;;  %s1223_s8 = scalar_lea.sflag [#allocation4], %s156_s25 }
   0xf   : > { %s1075_s9 = scalar_lea.hbm %s1215_s30, 1024  ;;  %s1080_s12 = scalar_lea.hbm %s1490_s0, 8192 }
  0x10   : > { %p1076_p9 = scmp.ne.s32.totalorder %s1215_s30, %s1075_s9  ;;  %p1077_p10 = pneg %p1219_p8 }
  0x11   : > { %p1081_p13 = scmp.lt.s32.totalorder %s1215_s30, %s1490_s0  ;;  %p1082_p0 = scmp.lt.s32.totalorder %s1080_s12, %s1075_s9 }
  0x12   : > { %p1078_p11 = pnand %p1077_p10, %p1076_p9 }
  0x13   : > { %p1083_p1 = por %p1082_p0, %p1081_p13 }
  0x14   : > { %p1079_p12 = pneg %p1078_p11 }
  0x16   : > { %p1084_p2 = pnand %p1083_p1, %p1079_p12 }
  0x18   : > { %1087 = shalt.err (!%p1084_p2)
}
  0x19   : > { %s1088_s15 = scalar_lea.vmem %s1217_s6, 1024  ;;  %s1139_s21 = smov [#allocation3]  }
  0x1a   : > { %p1089_p3 = scmp.ne.s32.totalorder %s1217_s6, %s1088_s15  ;;  %s1093_s22 = sshll.u32 %s1139_s21, 4  ;;  %s1094_s22 = int_to_ptr.vmem [resolvable:$false] %s1093_s22 }
  0x1b   : > { %s1095_s25 = scalar_lea.vmem %s1094_s22, 2048  ;;  %p1096_p6 = scmp.lt.s32.totalorder %s1217_s6, %s1094_s22 }
  0x1c   : > { %p1091_p4 = pnand %p1089_p3, %p1077_p10  ;;  %p1097_p9 = scmp.lt.s32.totalorder %s1095_s25, %s1088_s15 }
  0x1e   : > { %p1092_p5 = pneg %p1091_p4  ;;  %p1098_p11 = por %p1097_p9, %p1096_p6 }
  0x20   : > { %p1099_p7 = pnand %p1098_p11, %p1092_p5 }
  0x22   : > { %1102 = shalt.err (!%p1099_p7)
}
  0x23   : > { %s1140_s26 = smov 1024   ;;  %s1141_s27 = smov 128  }
  0x24   : > { %s1142_s28 = smov 8   ;;  %p880_p10 = scmp.ge.s32.totalorder %s1137_s18, 1 }
  0x25   : > { %990 = dma.hbm_to_vmem [thread:$0]  (!%p1219_p8), %s1215_s30, 1024, %s1217_s6, %s1223_s8, %s1140_s26, %s1141_s27, %s1142_s28  }
  0x26   : > { %p184_p12 = scmp.lt.s32.totalorder %s1137_s18, 9 }
  0x28   : > { %p185_p13 = pnand %p880_p10, %p184_p12 }
  0x29   : > { %s190_s29 = sand.u32 (!%p185_p13), 1, %s1129_s16   ;;  %p1498_p7 = scmp.ne.s32.totalorder (!%p185_p13), %s1496_s24, 0 }
  0x2a   : > { %188 = sbr.rel (%p185_p13) target bundleno = 658 (0x292), region = 36  ;;  %s881_s5 = sshll.u32 (!%p185_p13), %s190_s29, 6 }
  0x2b   : > { %s191_s9 = scalar_lea.sflag (!%p185_p13), [#allocation4], %s190_s29  ;;  %s1247_s10 = scalar_lea.vmem (!%p185_p13), [#allocation3], %s881_s5 }
  0x2f   : > { %1120 = dma.done.wait (%p1498_p7), %s191_s9, 1024  }
  0x30   : > { %1122 = vsyncadd (%p1498_p7), %s191_s9, 4294966272  ;;  %s882_s11 = sshll.u32 %s1189_s19, 5  ;;  %p884_p8 = scmp.ne.s32.totalorder %s1189_s19, 0 }
  0x31   : > { %p221_p0 = scmp.lt.s32.totalorder %s882_s11, 255 }
  0x32   : > { %230 = sbr.rel (%p884_p8) target bundleno = 60 (0x3c), region = 44 }
  0x33   : > { %s1504_s11 = smov (!%p221_p0, %s882_s11), 255 }
  0x34   : > { %s883_s30 = sshll.u32 %s1504_s11, 2 }
  0x35   : > { %s1257_s7 = scalar_lea.vmem %s1491_s1, %s883_s30 }
  0x37   : > { %vm231_vm0 = vcmask 261120   ;;  %v1143_v0 = vmov 0.0  }
  0x38   : > { %232 = vst.msk [vmem:[#allocation2] sm:$0xff] %vm231_vm0, %v1143_v0  ;;  %233 = vst.msk [vmem:[#allocation2 + $0x8] sm:$0xff] %vm231_vm0, %v1143_v0 }
  0x39   : > { %234 = vst.msk [vmem:[#allocation2 + $0x10] sm:$0xff] %vm231_vm0, %v1143_v0  ;;  %235 = vst.msk [vmem:[#allocation2 + $0x18] sm:$0xff] %vm231_vm0, %v1143_v0 }
  0x3a   : > { %236 = vst.msk [vmem:[#allocation2 + $0x20] sm:$0xff] %vm231_vm0, %v1143_v0  ;;  %237 = vst.msk [vmem:[#allocation2 + $0x28] sm:$0xff] %vm231_vm0, %v1143_v0 }
  0x3b   : > { %238 = vst.msk [vmem:[#allocation2 + $0x30] sm:$0xff] %vm231_vm0, %v1143_v0  ;;  %239 = vst.msk [vmem:[#allocation2 + $0x38] sm:$0xff] %vm231_vm0, %v1143_v0 }
  0x3c PF: > { %v1029_v1 = vld [vmem:[%s1257_s7 + $0x78] sm:$0xff]   ;;  %v1031_v3 = vld [vmem:[%s1257_s7 + $0x70] sm:$0xff]   ;;  %v1033_v5 = vld [vmem:[%s1257_s7 + $0x68] sm:$0xff]   ;;  %vm497_vm1 = vcmask 261120   ;;  %p909_p1 = scmp.ne.s32.totalorder %s1189_s19, 7 }
  0x3d   : > { %v1030_v2 = vld [vmem:[%s1257_s7 + $0x38] sm:$0xff]   ;;  %929 = vmatprep.subr.bf16.mxu0 %v1029_v1  ;;  %969 = vmatprep.subr.bf16.mxu1 %v1029_v1  ;;  %v1032_v4 = vld [vmem:[%s1257_s7 + $0x30] sm:$0xff]   ;;  %v1034_v6 = vld [vmem:[%s1257_s7 + $0x28] sm:$0xff]  }
  0x3e   : > { %930 = vmatpush3.bf16.msra.mxu0 %v1030_v2  ;;  %977 = vmatpush3.bf16.msra.mxu1 %v1030_v2  ;;  %v1035_v7 = vld [vmem:[%s1257_s7 + $0x60] sm:$0xff]   ;;  %v1037_v9 = vld [vmem:[%s1257_s7 + $0x58] sm:$0xff]   ;;  %v1039_v11 = vld [vmem:[%s1257_s7 + $0x50] sm:$0xff]  }
  0x3f   : > { %931 = vmatprep.subr.bf16.mxu0 %v1031_v3  ;;  %970 = vmatprep.subr.bf16.mxu1 %v1031_v3  ;;  %v1036_v8 = vld [vmem:[%s1257_s7 + $0x20] sm:$0xff]   ;;  %v1038_v10 = vld [vmem:[%s1257_s7 + $0x18] sm:$0xff]   ;;  %v1040_v14 = vld [vmem:[%s1257_s7 + $0x10] sm:$0xff]  }
  0x40   : > { %v1047_v12 = vld [vmem:[%s1247_s10 + $0x4] ss:$8 sps:$4 sm:$0xff]   ;;  %v1045_v19 = vld [vmem:[%s1247_s10] ss:$8 sps:$4 sm:$0xff]   ;;  %v1051_v21 = vld [vmem:[%s1247_s10 + $0x14] ss:$8 sps:$4 sm:$0xff]  }
  0x41   : > { %v1050_v13 = vld [vmem:[%s1247_s10 + $0x24] ss:$8 sps:$4 sm:$0xff]   ;;  %456 = vmatprep.mubr.bf16.mxu0 %v1047_v12  ;;  %v1048_v20 = vld [vmem:[%s1247_s10 + $0x20] ss:$8 sps:$4 sm:$0xff]   ;;  %v1053_v22 = vld [vmem:[%s1247_s10 + $0x34] ss:$8 sps:$4 sm:$0xff]  }
  0x42   : > { %932 = vmatpush3.bf16.msra.mxu0 %v1032_v4  ;;  %978 = vmatpush3.bf16.msra.mxu1 %v1032_v4  ;;  %v1041_v15 = vld [vmem:[%s1257_s7 + $0x48] sm:$0xff]   ;;  %v1043_v17 = vld [vmem:[%s1257_s7 + $0x40] sm:$0xff]   ;;  %v1055_v23 = vld [vmem:[%s1247_s10 + $0x10] ss:$8 sps:$4 sm:$0xff]  }
  0x43   : > { %933 = vmatprep.subr.bf16.mxu0 %v1033_v5  ;;  %971 = vmatprep.subr.bf16.mxu1 %v1033_v5  ;;  %v1042_v16 = vld [vmem:[%s1257_s7 + $0x8] sm:$0xff]   ;;  %v1044_v18 = vld [vmem:[%s1257_s7] sm:$0xff]   ;;  %v1056_v24 = vld [vmem:[%s1247_s10 + $0x30] ss:$8 sps:$4 sm:$0xff]  }
  0x44   : > { %472 = vmatprep.mubr.bf16.mxu1 %v1050_v13  ;;  %v240_v27 = vld [vmem:[#allocation2] sm:$0xff]  ;;  %v241_v37 = vld [vmem:[#allocation2 + $0x8] sm:$0xff]  ;;  %v242_v47 = vld [vmem:[#allocation2 + $0x10] sm:$0xff] }
  0x45   : > { %v244_v29 = vld [vmem:[#allocation2 + $0x20] sm:$0xff]  ;;  %v245_v39 = vld [vmem:[#allocation2 + $0x28] sm:$0xff]  ;;  %v246_v49 = vld [vmem:[#allocation2 + $0x30] sm:$0xff] }
  0x46   : > { %934 = vmatpush3.bf16.msra.mxu0 %v1034_v6  ;;  %979 = vmatpush3.bf16.msra.mxu1 %v1034_v6  ;;  %v243_v57 = vld [vmem:[#allocation2 + $0x18] sm:$0xff] }
  0x47   : > { %935 = vmatprep.subr.bf16.mxu0 %v1035_v7  ;;  %972 = vmatprep.subr.bf16.mxu1 %v1035_v7  ;;  %v247_v59 = vld [vmem:[#allocation2 + $0x38] sm:$0xff] }
  0x4a   : > { %936 = vmatpush3.bf16.msra.mxu0 %v1036_v8  ;;  %980 = vmatpush3.bf16.msra.mxu1 %v1036_v8 }
  0x4b   : > { %937 = vmatprep.subr.bf16.mxu0 %v1037_v9  ;;  %973 = vmatprep.subr.bf16.mxu1 %v1037_v9 }
  0x4e   : > { %938 = vmatpush3.bf16.msra.mxu0 %v1038_v10  ;;  %981 = vmatpush3.bf16.msra.mxu1 %v1038_v10 }
  0x4f   : > { %939 = vmatprep.subr.bf16.mxu0 %v1039_v11  ;;  %974 = vmatprep.subr.bf16.mxu1 %v1039_v11 }
  0x52   : > { %940 = vmatpush3.bf16.msra.mxu0 %v1040_v14  ;;  %982 = vmatpush3.bf16.msra.mxu1 %v1040_v14 }
  0x53   : > { %941 = vmatprep.subr.bf16.mxu0 %v1041_v15  ;;  %975 = vmatprep.subr.bf16.mxu1 %v1041_v15 }
  0x56   : > { %942 = vmatpush3.bf16.msra.mxu0 %v1042_v16  ;;  %983 = vmatpush3.bf16.msra.mxu1 %v1042_v16 }
  0x57   : > { %943 = vmatprep.subr.bf16.mxu0 %v1043_v17  ;;  %976 = vmatprep.subr.bf16.mxu1 %v1043_v17 }
  0x5a   : > { %944 = vmatpush3.bf16.msra.mxu0 %v1044_v18  ;;  %984 = vmatpush3.bf16.msra.mxu1 %v1044_v18 }
  0x5d   : > { %457 = vmatmul.mubr.bf16.vlgmr.msra.gmra.mxu0 %v1045_v19  ;;  %473 = vmatmul.mubr.bf16.vlgmr.msra.gmra.mxu1 %v1048_v20 }
  0x5e   : > { %464 = vmatprep.mubr.bf16.mxu0 %v1051_v21  ;;  %480 = vmatprep.mubr.bf16.mxu1 %v1053_v22 }
  0x65   : > { %465 = vmatmul.mubr.bf16.gmra.mxu0 %v1055_v23  ;;  %481 = vmatmul.mubr.bf16.gmra.mxu1 %v1056_v24 }
 0x11d   : > { %v945_v25 = vpop.f32.mrf.mxu0  ;;  %v957_v26 = vpop.f32.mrf.mxu1 }
 0x11f   : > { %v946_v28 = vpop.f32.mrf.mxu0  ;;  %v958_v30 = vpop.f32.mrf.mxu1 }
 0x120   : > { %v947_v31 = vadd.f32 %v946_v28, %v945_v25  ;;  %v959_v32 = vadd.f32 %v958_v30, %v957_v26 }
 0x121   : > { %v948_v33 = vpop.f32.mrf.mxu0  ;;  %v960_v34 = vpop.f32.mrf.mxu1 }
 0x122   : > { %v489_v35 = vadd.f32 %v947_v31, %v240_v27  ;;  %v493_v36 = vadd.f32 %v959_v32, %v244_v29 }
 0x123   : > { %v949_v38 = vpop.f32.mrf.mxu0  ;;  %v961_v40 = vpop.f32.mrf.mxu1 }
 0x124   : > { %498 = vst.msk [vmem:[#allocation2] sm:$0xff] %vm497_vm1, %v489_v35  ;;  %502 = vst.msk [vmem:[#allocation2 + $0x20] sm:$0xff] %vm497_vm1, %v493_v36  ;;  %v950_v41 = vadd.f32 %v949_v38, %v948_v33  ;;  %v962_v42 = vadd.f32 %v961_v40, %v960_v34 }
 0x125   : > { %v951_v43 = vpop.f32.mrf.mxu0  ;;  %v963_v44 = vpop.f32.mrf.mxu1 }
 0x126   : > { %v490_v45 = vadd.f32 %v950_v41, %v241_v37  ;;  %v494_v46 = vadd.f32 %v962_v42, %v245_v39 }
 0x127   : > { %v952_v48 = vpop.f32.mrf.mxu0  ;;  %v964_v50 = vpop.f32.mrf.mxu1 }
 0x128   : > { %499 = vst.msk [vmem:[#allocation2 + $0x8] sm:$0xff] %vm497_vm1, %v490_v45  ;;  %503 = vst.msk [vmem:[#allocation2 + $0x28] sm:$0xff] %vm497_vm1, %v494_v46  ;;  %v953_v51 = vadd.f32 %v952_v48, %v951_v43  ;;  %v965_v52 = vadd.f32 %v964_v50, %v963_v44 }
 0x129   : > { %v954_v53 = vpop.f32.mrf.mxu0  ;;  %v966_v54 = vpop.f32.mrf.mxu1 }
 0x12a   : > { %v491_v55 = vadd.f32 %v953_v51, %v242_v47  ;;  %v495_v56 = vadd.f32 %v965_v52, %v246_v49 }
 0x12b   : > { %v955_v58 = vpop.f32.mrf.mxu0  ;;  %v967_v60 = vpop.f32.mrf.mxu1 }
 0x12c   : > { %500 = vst.msk [vmem:[#allocation2 + $0x10] sm:$0xff] %vm497_vm1, %v491_v55  ;;  %504 = vst.msk [vmem:[#allocation2 + $0x30] sm:$0xff] %vm497_vm1, %v495_v56  ;;  %v956_v61 = vadd.f32 %v955_v58, %v954_v53  ;;  %v968_v62 = vadd.f32 %v967_v60, %v966_v54  ;;  %509 = sbr.rel (%p909_p1) target bundleno = 658 (0x292), region = 48 }
 0x12e   : > { %v492_v63 = vadd.f32 %v956_v61, %v243_v57  ;;  %v496_v0 = vadd.f32 %v968_v62, %v247_v59 }
 0x130   : > { %501 = vst.msk [vmem:[#allocation2 + $0x18] sm:$0xff] %vm497_vm1, %v492_v63  ;;  %505 = vst.msk [vmem:[#allocation2 + $0x38] sm:$0xff] %vm497_vm1, %v496_v0 }
 0x131   : > { %v1295_v2 = vld [vmem:[#allocation2] sm:$0xff]  ;;  %v1303_v6 = vld [vmem:[#allocation2 + $0x8] sm:$0xff]  ;;  %v1144_v33 = vmov 0   ;;  %vm814_vm3 = vcmask 257024  }
 0x132   : > { %v518_v5 = vsel %vm497_vm1, %v1295_v2, 0.0  ;;  %v521_v8 = vsel %vm497_vm1, %v1303_v6, 0.0  ;;  %v1309_v9 = vld [vmem:[#allocation2 + $0x28] sm:$0xff]  ;;  %v1311_v10 = vld [vmem:[#allocation2 + $0x20] sm:$0xff]  ;;  %v551_v17 = vmul.f32 %v1303_v6, %v1303_v6  ;;  %v550_v18 = vmul.f32 %v1295_v2, %v1295_v2  ;;  %1058 = vset.pattern.permute.xlu1 %v1144_v33  ;;  %1057 = vset.pattern.permute.xlu0 %v1144_v33 }
 0x133   : > { %v1293_v1 = vld [vmem:[#allocation2 + $0x10] sm:$0xff]  ;;  %519 = vadd.xlane.f32.xlu0 %v518_v5  ;;  %v533_v11 = vsel %vm497_vm1, %v1309_v9, 0.0  ;;  %v530_v12 = vsel %vm497_vm1, %v1311_v10, 0.0  ;;  %v555_v25 = vmul.f32 %v1309_v9, %v1309_v9  ;;  %v554_v26 = vmul.f32 %v1311_v10, %v1311_v10  ;;  %v607_v33 = vld [vmem:[%s1492_s2 + $0x8] sm:$0xff] }
 0x134   : > { %v524_v4 = vsel %vm497_vm1, %v1293_v1, 0.0  ;;  %v1319_v14 = vld [vmem:[#allocation2 + $0x30] sm:$0xff]  ;;  %v561_v19 = vsel %vm497_vm1, %v551_v17, 0.0  ;;  %v558_v20 = vsel %vm497_vm1, %v550_v18, 0.0  ;;  %v552_v22 = vmul.f32 %v1293_v1, %v1293_v1 }
 0x135   : > { %525 = vadd.xlane.f32.xlu1 %v524_v4  ;;  %v536_v16 = vsel %vm497_vm1, %v1319_v14, 0.0  ;;  %v573_v27 = vsel %vm497_vm1, %v555_v25, 0.0  ;;  %v570_v28 = vsel %vm497_vm1, %v554_v26, 0.0  ;;  %v556_v30 = vmul.f32 %v1319_v14, %v1319_v14 }
 0x136   : > { %v564_v24 = vsel %vm497_vm1, %v552_v22, 0.0 }
 0x137   : > { %v1297_v3 = vld [vmem:[#allocation2 + $0x18] sm:$0xff]  ;;  %522 = vadd.xlane.f32.xlu0 %v521_v8  ;;  %v576_v32 = vsel %vm497_vm1, %v556_v30, 0.0 }
 0x138   : > { %v527_v7 = vsel %vm497_vm1, %v1297_v3, 0.0  ;;  %v1317_v13 = vld [vmem:[#allocation2 + $0x38] sm:$0xff]  ;;  %v553_v21 = vmul.f32 %v1297_v3, %v1297_v3 }
 0x139   : > { %528 = vadd.xlane.f32.xlu1 %v527_v7  ;;  %v539_v15 = vsel %vm497_vm1, %v1317_v13, 0.0  ;;  %v557_v29 = vmul.f32 %v1317_v13, %v1317_v13 }
 0x13a   : > { %v567_v23 = vsel %vm497_vm1, %v553_v21, 0.0 }
 0x13b   : > { %531 = vadd.xlane.f32.xlu0 %v530_v12  ;;  %v579_v31 = vsel %vm497_vm1, %v557_v29, 0.0 }
 0x13d   : > { %534 = vadd.xlane.f32.xlu1 %v533_v11 }
 0x13f   : > { %537 = vadd.xlane.f32.xlu0 %v536_v16 }
 0x141   : > { %540 = vadd.xlane.f32.xlu1 %v539_v15 }
 0x143   : > { %559 = vadd.xlane.f32.xlu0 %v558_v20 }
 0x145   : > { %562 = vadd.xlane.f32.xlu1 %v561_v19 }
 0x147   : > { %565 = vadd.xlane.f32.xlu0 %v564_v24 }
 0x149   : > { %568 = vadd.xlane.f32.xlu1 %v567_v23 }
 0x14b   : > { %571 = vadd.xlane.f32.xlu0 %v570_v28 }
 0x14d   : > { %574 = vadd.xlane.f32.xlu1 %v573_v27 }
 0x14f   : > { %577 = vadd.xlane.f32.xlu0 %v576_v32 }
 0x151   : > { %580 = vadd.xlane.f32.xlu1 %v579_v31 }
 0x1bc   : > { %v520_v35 = vpop.xlane.xlu0 %519 }
 0x1bd   : > { %v1349_v42 = vmul.f32 0.03125, %v520_v35 }
 0x1be   : > { %v526_v34 = vpop.xlane.xlu1 %525 }
 0x1bf   : > { %v1353_v44 = vmul.f32 0.03125, %v526_v34  ;;  %v590_v48 = vmul.f32 %v1349_v42, %v1349_v42  ;;  %v606_v34 = vld [vmem:[%s1492_s2] sm:$0xff] }
 0x1c0   : > { %v523_v37 = vpop.xlane.xlu0 %522 }
 0x1c1   : > { %v1351_v43 = vmul.f32 0.03125, %v523_v37  ;;  %v592_v54 = vmul.f32 %v1353_v44, %v1353_v44 }
 0x1c2   : > { %v529_v36 = vpop.xlane.xlu1 %528 }
 0x1c3   : > { %v1355_v45 = vmul.f32 0.03125, %v529_v36  ;;  %v591_v49 = vmul.f32 %v1351_v43, %v1351_v43 }
 0x1c4   : > { %v532_v39 = vpop.xlane.xlu0 %531 }
 0x1c5   : > { %v593_v55 = vmul.f32 %v1355_v45, %v1355_v45  ;;  %v1367_v57 = vmul.f32 0.03125, %v532_v39 }
 0x1c6   : > { %v535_v38 = vpop.xlane.xlu1 %534 }
 0x1c7   : > { %v1365_v56 = vmul.f32 0.03125, %v535_v38  ;;  %v594_v7 = vmul.f32 %v1367_v57, %v1367_v57 }
 0x1c8   : > { %v538_v41 = vpop.xlane.xlu0 %537 }
 0x1c9   : > { %v595_v5 = vmul.f32 %v1365_v56, %v1365_v56  ;;  %v1375_v21 = vmul.f32 0.03125, %v538_v41  ;;  %v609_v41 = vld [vmem:[%s1492_s2 + $0x18] sm:$0xff] }
 0x1ca   : > { %v541_v40 = vpop.xlane.xlu1 %540 }
 0x1cb   : > { %v1373_v8 = vmul.f32 0.03125, %v541_v40  ;;  %v596_v30 = vmul.f32 %v1375_v21, %v1375_v21  ;;  %v639_v40 = vld [vmem:[%s1493_s3 + $0x8] sm:$0xff] }
 0x1cc   : > { %v560_v47 = vpop.xlane.xlu0 %559 }
 0x1cd   : > { %v582_v51 = vmul.f32 0.03125, %v560_v47  ;;  %v597_v24 = vmul.f32 %v1373_v8, %v1373_v8  ;;  %v608_v47 = vld [vmem:[%s1492_s2 + $0x10] sm:$0xff] }
 0x1ce   : > { %v563_v46 = vpop.xlane.xlu1 %562 }
 0x1cf   : > { %v583_v50 = vmul.f32 0.03125, %v563_v46  ;;  %v598_v53 = vsub.f32 %v582_v51, %v590_v48 }
 0x1d0   : > { %v566_v59 = vpop.xlane.xlu0 %565 }
 0x1d1   : > { %v599_v52 = vsub.f32 %v583_v50, %v591_v49  ;;  %v614_v61 = vadd.f32 1e-05, %v598_v53  ;;  %v584_v63 = vmul.f32 0.03125, %v566_v59  ;;  %v641_v53 = vld [vmem:[%s1493_s3 + $0x18] sm:$0xff] }
 0x1d2   : > { %v569_v58 = vpop.xlane.xlu1 %568 }
 0x1d3   : > { %v615_v60 = vadd.f32 1e-05, %v599_v52  ;;  %v585_v62 = vmul.f32 0.03125, %v569_v58  ;;  %v600_v4 = vsub.f32 %v584_v63, %v592_v54  ;;  %v611_v54 = vld [vmem:[%s1492_s2 + $0x28] sm:$0xff] }
 0x1d4   : > { %v572_v12 = vpop.xlane.xlu0 %571 }
 0x1d5   : > { %1059 = vrsqrt.f32 %v615_v60  ;;  %v601_v0 = vsub.f32 %v585_v62, %v593_v55  ;;  %v616_v16 = vadd.f32 1e-05, %v600_v4  ;;  %v586_v18 = vmul.f32 0.03125, %v572_v12  ;;  %v643_v60 = vld [vmem:[%s1493_s3 + $0x28] sm:$0xff] }
 0x1d6   : > { %1061 = vrsqrt.f32 %v614_v61  ;;  %v575_v11 = vpop.xlane.xlu1 %574  ;;  %v613_v61 = vld [vmem:[%s1492_s2 + $0x38] sm:$0xff] }
 0x1d7   : > { %v617_v15 = vadd.f32 1e-05, %v601_v0  ;;  %v587_v17 = vmul.f32 0.03125, %v575_v11  ;;  %v602_v20 = vsub.f32 %v586_v18, %v594_v7  ;;  %v645_v11 = vld [vmem:[%s1493_s3 + $0x38] sm:$0xff] }
 0x1d8   : > { %v578_v23 = vpop.xlane.xlu0 %577 }
 0x1d9   : > { %1063 = vrsqrt.f32 %v617_v15  ;;  %v603_v19 = vsub.f32 %v587_v17, %v595_v5  ;;  %v618_v27 = vadd.f32 1e-05, %v602_v20  ;;  %v588_v28 = vmul.f32 0.03125, %v578_v23 }
 0x1da   : > { %1065 = vrsqrt.f32 %v616_v16  ;;  %v581_v22 = vpop.xlane.xlu1 %580  ;;  %v612_v16 = vld [vmem:[%s1492_s2 + $0x30] sm:$0xff] }
 0x1db   : > { %v619_v25 = vadd.f32 1e-05, %v603_v19  ;;  %v589_v26 = vmul.f32 0.03125, %v581_v22  ;;  %v604_v32 = vsub.f32 %v588_v28, %v596_v30  ;;  %v638_v19 = vld [vmem:[%s1493_s3] sm:$0xff]  ;;  %v640_v22 = vld [vmem:[%s1493_s3 + $0x10] sm:$0xff] }
 0x1dd   : > { %1067 = vrsqrt.f32 %v619_v25  ;;  %v605_v29 = vsub.f32 %v589_v26, %v597_v24  ;;  %v620_v38 = vadd.f32 1e-05, %v604_v32 }
 0x1de   : > { %1069 = vrsqrt.f32 %v618_v27 }
 0x1df   : > { %v621_v31 = vadd.f32 1e-05, %v605_v29 }
 0x1e1   : > { %1071 = vrsqrt.f32 %v621_v31 }
 0x1e2   : > { %v1060_v35 = vpop.eup %1059  ;;  %1073 = vrsqrt.f32 %v620_v38 }
 0x1e3   : > { %v1062_v36 = vpop.eup %1061  ;;  %v631_v37 = vmul.f32 %v1060_v35, %v607_v33 }
 0x1e4   : > { %v630_v39 = vmul.f32 %v1062_v36, %v606_v34 }
 0x1e5   : > { %669 = vperm.xlu1 %1058, %v631_v37   ;;  %v647_v46 = vmul.f32 %v631_v37, %v1351_v43 }
 0x1e6   : > { %v1064_v48 = vpop.eup %1063  ;;  %664 = vperm.xlu0 %1057, %v630_v39   ;;  %v646_v18 = vmul.f32 %v630_v39, %v1349_v42  ;;  %v642_v42 = vld [vmem:[%s1493_s3 + $0x20] sm:$0xff] }
 0x1e7   : > { %v1066_v49 = vpop.eup %1065  ;;  %v655_v50 = vsub.f32 %v639_v40, %v647_v46  ;;  %v633_v51 = vmul.f32 %v1064_v48, %v609_v41 }
 0x1e8   : > { %v632_v52 = vmul.f32 %v1066_v49, %v608_v47 }
 0x1e9   : > { %v649_v43 = vmul.f32 %v633_v51, %v1355_v45  ;;  %v610_v45 = vld [vmem:[%s1492_s2 + $0x20] sm:$0xff] }
 0x1ea   : > { %v1068_v55 = vpop.eup %1067  ;;  %717 = vperm.xlu0 %1057, %v655_v50   ;;  %674 = vperm.xlu1 %1058, %v632_v52   ;;  %v648_v20 = vmul.f32 %v632_v52, %v1353_v44  ;;  %v644_v44 = vld [vmem:[%s1493_s3 + $0x30] sm:$0xff] }
 0x1eb   : > { %v657_v58 = vsub.f32 %v641_v53, %v649_v43  ;;  %v635_v59 = vmul.f32 %v1068_v55, %v611_v54  ;;  %v1070_v62 = vpop.eup %1069 }
 0x1ec   : > { %v634_v7 = vmul.f32 %v1070_v62, %v610_v45  ;;  %v656_v23 = vsub.f32 %v640_v22, %v648_v20 }
 0x1ed   : > { %v651_v63 = vmul.f32 %v635_v59, %v1365_v56 }
 0x1ee   : > { %v1072_v0 = vpop.eup %1071  ;;  %727 = vperm.xlu0 %1057, %v657_v58   ;;  %679 = vperm.xlu1 %1058, %v633_v51   ;;  %v650_v24 = vmul.f32 %v634_v7, %v1367_v57 }
 0x1ef   : > { %v659_v4 = vsub.f32 %v643_v60, %v651_v63  ;;  %v637_v5 = vmul.f32 %v1072_v0, %v613_v61  ;;  %v1074_v56 = vpop.eup %1073 }
 0x1f0   : > { %v636_v17 = vmul.f32 %v1074_v56, %v612_v16  ;;  %v658_v25 = vsub.f32 %v642_v42, %v650_v24 }
 0x1f1   : > { %v653_v12 = vmul.f32 %v637_v5, %v1373_v8  ;;  %v654_v8 = vsub.f32 %v638_v19, %v646_v18 }
 0x1f2   : > { %737 = vperm.xlu0 %1057, %v659_v4   ;;  %684 = vperm.xlu1 %1058, %v634_v7   ;;  %v652_v26 = vmul.f32 %v636_v17, %v1375_v21 }
 0x1f3   : > { %v661_v15 = vsub.f32 %v645_v11, %v653_v12 }
 0x1f4   : > { %v660_v27 = vsub.f32 %v644_v44, %v652_v26 }
 0x1f6   : > { %747 = vperm.xlu0 %1057, %v661_v15   ;;  %689 = vperm.xlu1 %1058, %v635_v59  }
 0x1fa   : > { %694 = vperm.xlu1 %1058, %v636_v17  }
 0x1fe   : > { %699 = vperm.xlu1 %1058, %v637_v5  }
 0x202   : > { %712 = vperm.xlu1 %1058, %v654_v8  }
 0x206   : > { %722 = vperm.xlu1 %1058, %v656_v23  }
 0x20a   : > { %732 = vperm.xlu1 %1058, %v658_v25  }
 0x20e   : > { %742 = vperm.xlu1 %1058, %v660_v27  }
 0x260   : > { %v670_v28 = vpop.permute.xlu1 %669 }
 0x261   : > { %v665_v29 = vpop.permute.xlu0 %664  ;;  %v703_v30 = vmul.f32 %v670_v28, %v1303_v6 }
 0x262   : > { %v702_v43 = vmul.f32 %v665_v29, %v1295_v2 }
 0x265   : > { %v675_v57 = vpop.permute.xlu1 %674  ;;  %v718_v31 = vpop.permute.xlu0 %717 }
 0x266   : > { %v751_v32 = vadd.f32 %v718_v31, %v703_v30  ;;  %v704_v61 = vmul.f32 %v675_v57, %v1293_v1 }
 0x268   : > { %vm759_vm2 = vcmp.ge.f32.partialorder %v751_v32, 0.0  ;;  %v767_v33 = vmul.f32 0.2, %v751_v32 }
 0x269   : > { %v680_v34 = vpop.permute.xlu1 %679  ;;  %v728_v37 = vpop.permute.xlu0 %727 }
 0x26a   : > { %v775_v35 = vsel %vm759_vm2, %v751_v32, %v767_v33  ;;  %v705_v21 = vmul.f32 %v680_v34, %v1297_v3 }
 0x26b   : > { %v922_v36 = vpack.c.bf16 %v775_v35, %v775_v35 }
 0x26c   : > { %v753_v38 = vadd.f32 %v728_v37, %v705_v21 }
 0x26d   : > { %816 = vst.msk [vmem:[%s1494_s4 + $0x4] sm:$0xf] %vm814_vm3, %v922_v36  ;;  %v685_v39 = vpop.permute.xlu1 %684  ;;  %v738_v3 = vpop.permute.xlu0 %737 }
 0x26e   : > { %vm761_vm4 = vcmp.ge.f32.partialorder %v753_v38, 0.0  ;;  %v769_v6 = vmul.f32 0.2, %v753_v38  ;;  %v706_v5 = vmul.f32 %v685_v39, %v1311_v10 }
 0x270   : > { %v777_v40 = vsel %vm761_vm4, %v753_v38, %v769_v6 }
 0x271   : > { %v924_v41 = vpack.c.bf16 %v777_v40, %v777_v40  ;;  %v690_v46 = vpop.permute.xlu1 %689 }
 0x272   : > { %v707_v47 = vmul.f32 %v690_v46, %v1309_v9  ;;  %v748_v9 = vpop.permute.xlu0 %747 }
 0x273   : > { %818 = vst.msk [vmem:[%s1494_s4 + $0xc] sm:$0xf] %vm814_vm3, %v924_v41 }
 0x274   : > { %v755_v48 = vadd.f32 %v738_v3, %v707_v47 }
 0x275   : > { %v695_v49 = vpop.permute.xlu1 %694 }
 0x276   : > { %vm763_vm5 = vcmp.ge.f32.partialorder %v755_v48, 0.0  ;;  %v771_v50 = vmul.f32 0.2, %v755_v48  ;;  %v708_v56 = vmul.f32 %v695_v49, %v1319_v14 }
 0x278   : > { %v779_v51 = vsel %vm763_vm5, %v755_v48, %v771_v50 }
 0x279   : > { %v926_v52 = vpack.c.bf16 %v779_v51, %v779_v51  ;;  %v700_v53 = vpop.permute.xlu1 %699 }
 0x27a   : > { %v709_v54 = vmul.f32 %v700_v53, %v1317_v13 }
 0x27b   : > { %820 = vst.msk [vmem:[%s1494_s4 + $0x14] sm:$0xf] %vm814_vm3, %v926_v52 }
 0x27c   : > { %v757_v55 = vadd.f32 %v748_v9, %v709_v54 }
 0x27d   : > { %v713_v58 = vpop.permute.xlu1 %712 }
 0x27e   : > { %vm765_vm6 = vcmp.ge.f32.partialorder %v757_v55, 0.0  ;;  %v773_v59 = vmul.f32 0.2, %v757_v55  ;;  %v750_v60 = vadd.f32 %v713_v58, %v702_v43 }
 0x280   : > { %v781_v62 = vsel %vm765_vm6, %v757_v55, %v773_v59  ;;  %vm758_vm7 = vcmp.ge.f32.partialorder %v750_v60, 0.0  ;;  %v766_v63 = vmul.f32 0.2, %v750_v60 }
 0x281   : > { %v928_v45 = vpack.c.bf16 %v781_v62, %v781_v62  ;;  %v723_v13 = vpop.permute.xlu1 %722 }
 0x282   : > { %v774_v0 = vsel %vm758_vm7, %v750_v60, %v766_v63  ;;  %v752_v4 = vadd.f32 %v723_v13, %v704_v61 }
 0x283   : > { %822 = vst.msk [vmem:[%s1494_s4 + $0x1c] sm:$0xf] %vm814_vm3, %v928_v45  ;;  %v921_v2 = vpack.c.bf16 %v774_v0, %v774_v0 }
 0x284   : > { %vm760_vm8 = vcmp.ge.f32.partialorder %v752_v4, 0.0  ;;  %v768_v7 = vmul.f32 0.2, %v752_v4 }
 0x285   : > { %815 = vst.msk [vmem:[%s1494_s4] sm:$0xf] %vm814_vm3, %v921_v2  ;;  %v733_v1 = vpop.permute.xlu1 %732 }
 0x286   : > { %v776_v11 = vsel %vm760_vm8, %v752_v4, %v768_v7  ;;  %v754_v12 = vadd.f32 %v733_v1, %v706_v5 }
 0x287   : > { %v923_v15 = vpack.c.bf16 %v776_v11, %v776_v11 }
 0x288   : > { %vm762_vm9 = vcmp.ge.f32.partialorder %v754_v12, 0.0  ;;  %v770_v16 = vmul.f32 0.2, %v754_v12 }
 0x289   : > { %817 = vst.msk [vmem:[%s1494_s4 + $0x8] sm:$0xf] %vm814_vm3, %v923_v15  ;;  %v743_v10 = vpop.permute.xlu1 %742 }
 0x28a   : > { %v778_v17 = vsel %vm762_vm9, %v754_v12, %v770_v16  ;;  %v756_v18 = vadd.f32 %v743_v10, %v708_v56 }
 0x28b   : > { %v925_v19 = vpack.c.bf16 %v778_v17, %v778_v17 }
 0x28c   : > { %vm764_vm10 = vcmp.ge.f32.partialorder %v756_v18, 0.0  ;;  %v772_v8 = vmul.f32 0.2, %v756_v18 }
 0x28d   : > { %819 = vst.msk [vmem:[%s1494_s4 + $0x10] sm:$0xf] %vm814_vm3, %v925_v19 }
 0x28e   : > { %v780_v20 = vsel %vm764_vm10, %v756_v18, %v772_v8 }
 0x28f   : > { %v927_v14 = vpack.c.bf16 %v780_v20, %v780_v20 }
 0x291   : > { %821 = vst.msk [vmem:[%s1494_s4 + $0x18] sm:$0xf] %vm814_vm3, %v927_v14 }
 0x292 PF: > { %p14_p2 = scmp.ge.s32.totalorder %s1192_s20, 10   ;;  %s1499_s15 = smov %s1129_s16 }
 0x293   : > { %s1500_s16 = smov %s1133_s17  ;;  %s1501_s17 = smov %s1202_s23 }
 0x294   : > { %s1502_s18 = smov %s1192_s20  ;;  %16 = sbr.rel (!%p14_p2) target bundleno = 3 (0x3), region = 83 }
 0x299   :  { %834 = vsyncpa [#allocation4], 1 }
 0x29a   :  { %836 = vsyncpa [#allocation4 + $0x1], 1 }

// kernel: generator_forward.5
= control target key start
LH: loop header
LB: loop body
LE: loop exit
PB: predicated region body
PF: predicated region fallthrough
CT: control target
= control target key end

     0   :  { %s1051_s15 = smov 0   ;;  %s1053_s16 = smov 0   ;;  %s1254_s0 = inlined_call_operand.vmem [shape: bf16[32,1024], index: 0, kind: input, shape index: {}]   ;;  %s1255_s1 = inlined_call_operand.vmem [shape: bf16[1024,200], index: 1, kind: input, shape index: {}]   ;;  %s1256_s2 = inlined_call_operand.vmem [shape: f32[32,1], index: 2, kind: input, shape index: {}]   ;;  %s1257_s3 = inlined_call_operand.vmem [shape: f32[32,1], index: 3, kind: input, shape index: {}]   ;;  %s1258_s4 = inlined_call_operand.vmem [shape: bf16[32,200], index: 4, kind: output, shape index: {}]  }
   0x1   :  { %s1055_s17 = smov 0  }
   0x2 LB: > { %s1067_s18 = sadd.s32 4294967295, %s1022_s17   ;;  %s1070_s19 = sadd.s32 1, %s1022_s17   ;;  %s1022_s17 = sphi %s1055_s17, %s1263_s17   ;;  %s1018_s16 = sphi %s1053_s16, %s1262_s16   ;;  %s1014_s15 = sphi %s1051_s15, %s1261_s15  }
   0x3   : > { %s18_s20 = ssub.s32 %s1022_s17, %s1070_s19  ;;  %s21_s21 = sadd.s32 1, %s1018_s16 }
   0x4   : > { %p19_p0 = scmp.eq.s32.totalorder %s18_s20, 0  ;;  %p28_p1 = scmp.ne.s32.totalorder %s1018_s16, %s1014_s15 }
   0x5   : > { %p29_p2 = scmp.eq.s32.totalorder %s1022_s17, 0  ;;  %p819_p4 = scmp.ge.s32.totalorder %s1022_s17, 4 }
   0x6   : > { %s1079_s22 = scalar_select %p19_p0, %s1018_s16, %s21_s21  }
   0x7   : > { %p30_p3 = por %p29_p2, %p28_p1  ;;  %149 = sbr.rel (%p819_p4) target bundleno = 20 (0x14), region = 24 }
   0xc   : > { %152 = sbr.rel (!%p30_p3) target bundleno = 20 (0x14), region = 28  ;;  %s154_s23 = sand.u32 (%p30_p3), 1, %s1018_s16  }
   0xd   : > { %s872_s24 = sshll.u32 (%p30_p3), %s1022_s17, 3  ;;  %s820_s25 = sshll.u32 (%p30_p3), %s154_s23, 5 }
   0xe   : > { %s159_s28 = scalar_lea.vmem (%p30_p3), %s1254_s0, %s872_s24  ;;  %s156_s29 = scalar_lea.vmem (%p30_p3), [#allocation3], %s820_s25 }
   0xf   : > { %v194_v0 = vld [vmem:[%s159_s28] sm:$0xff] (%p30_p3) }
  0x10   : > { %v196_v1 = vld [vmem:[%s159_s28 + $0x20] sm:$0xff] (%p30_p3)  ;;  %195 = vst [vmem:[%s156_s29] sm:$0xff] (%p30_p3), %v194_v0 }
  0x11   : > { %v198_v2 = vld [vmem:[%s159_s28 + $0x40] sm:$0xff]  ;;  %197 = vst [vmem:[%s156_s29 + $0x8] sm:$0xff] %v196_v1 }
  0x12   : > { %199 = vst [vmem:[%s156_s29 + $0x10] sm:$0xff] %v198_v2  ;;  %v200_v3 = vld [vmem:[%s159_s28 + $0x60] sm:$0xff] }
  0x13   : > { %201 = vst [vmem:[%s156_s29 + $0x18] sm:$0xff] %v200_v3 }
  0x14 PF: > { %p823_p5 = scmp.ge.s32.totalorder %s1022_s17, 1  ;;  %p216_p6 = scmp.lt.s32.totalorder %s1022_s17, 5 }
  0x16   : > { %p217_p7 = pnand %p823_p5, %p216_p6 }
  0x17   : > { %s223_s30 = sand.u32 (!%p217_p7), 1, %s1014_s15   ;;  %s825_s5 = sshll.u32 (!%p217_p7), %s1067_s18, 5 }
  0x18   : > { %220 = sbr.rel (%p217_p7) target bundleno = 637 (0x27d), region = 70  ;;  %s824_s6 = sshll.u32 (!%p217_p7), %s223_s30, 5 }
  0x19   : > { %p251_p8 = scmp.lt.s32.totalorder (!%p217_p7), %s825_s5, 127  ;;  %s1096_s11 = scalar_lea.vmem (!%p217_p7), [#allocation3], %s824_s6 }
  0x1a   : > { %p828_p9 = scmp.ne.s32.totalorder (!%p217_p7), %s1067_s18, 0 }
  0x1d   : > { %s1265_s5 = smov (!%p251_p8, %s825_s5), 127  ;;  %260 = sbr.rel (%p828_p9) target bundleno = 39 (0x27), region = 78 }
  0x1e   : > { %s873_s7 = sshll.u32 %s1265_s5, 3 }
  0x1f   : > { %s1094_s10 = scalar_lea.vmem %s1255_s1, %s873_s7 }
  0x22   : > { %vm262_vm0 = vcmask 588800   ;;  %v1024_v4 = vmov 0.0  }
  0x23   : > { %261 = vst [vmem:[#allocation2] sm:$0xff] %v1024_v4  ;;  %264 = vst [vmem:[#allocation2 + $0x10] sm:$0xff] %v1024_v4 }
  0x24   : > { %266 = vst [vmem:[#allocation2 + $0x20] sm:$0xff] %v1024_v4  ;;  %268 = vst [vmem:[#allocation2 + $0x30] sm:$0xff] %v1024_v4 }
  0x25   : > { %263 = vst.msk [vmem:[#allocation2 + $0x8] sm:$0xff] %vm262_vm0, %v1024_v4  ;;  %265 = vst.msk [vmem:[#allocation2 + $0x18] sm:$0xff] %vm262_vm0, %v1024_v4 }
  0x26   : > { %267 = vst.msk [vmem:[#allocation2 + $0x28] sm:$0xff] %vm262_vm0, %v1024_v4  ;;  %269 = vst.msk [vmem:[#allocation2 + $0x38] sm:$0xff] %vm262_vm0, %v1024_v4 }
  0x27 PF: > { %v936_v5 = vld [vmem:[%s1094_s10 + $0x74] ss:$8 sps:$4 sm:$0xff]   ;;  %v938_v6 = vld [vmem:[%s1094_s10 + $0x70] ss:$8 sps:$4 sm:$0xff]   ;;  %v939_v7 = vld [vmem:[%s1094_s10 + $0x64] ss:$8 sps:$4 sm:$0xff]  }
  0x28   : > { %494 = vmatprep.subr.bf16.mxu0 %v936_v5  ;;  %878 = vmatprep.subr.bf16.mxu1 %v936_v5  ;;  %v941_v8 = vld [vmem:[%s1094_s10 + $0x60] ss:$8 sps:$4 sm:$0xff]   ;;  %v942_v9 = vld [vmem:[%s1094_s10 + $0x54] ss:$8 sps:$4 sm:$0xff]   ;;  %v944_v10 = vld [vmem:[%s1094_s10 + $0x50] ss:$8 sps:$4 sm:$0xff]  }
  0x29   : > { %495 = vmatpush1.bf16.msra.mxu0 %v938_v6  ;;  %894 = vmatpush1.bf16.msra.mxu1 %v938_v6  ;;  %v945_v11 = vld [vmem:[%s1094_s10 + $0x44] ss:$8 sps:$4 sm:$0xff]   ;;  %v947_v12 = vld [vmem:[%s1094_s10 + $0x40] ss:$8 sps:$4 sm:$0xff]   ;;  %v948_v13 = vld [vmem:[%s1094_s10 + $0x34] ss:$8 sps:$4 sm:$0xff]  }
  0x2a   : > { %496 = vmatprep.subr.bf16.mxu0 %v939_v7  ;;  %879 = vmatprep.subr.bf16.mxu1 %v939_v7  ;;  %v950_v14 = vld [vmem:[%s1094_s10 + $0x30] ss:$8 sps:$4 sm:$0xff]   ;;  %v951_v15 = vld [vmem:[%s1094_s10 + $0x24] ss:$8 sps:$4 sm:$0xff]   ;;  %v953_v16 = vld [vmem:[%s1094_s10 + $0x20] ss:$8 sps:$4 sm:$0xff]  }
  0x2b   : > { %v954_v17 = vld [vmem:[%s1094_s10 + $0x14] ss:$8 sps:$4 sm:$0xff]   ;;  %v986_v18 = vld [vmem:[%s1096_s11 + $0x4] ss:$8 sps:$4 sm:$0xff]   ;;  %v956_v19 = vld [vmem:[%s1094_s10 + $0x10] ss:$8 sps:$4 sm:$0xff]  }
  0x2c   : > { %v989_v20 = vld [vmem:[%s1096_s11 + $0x14] ss:$8 sps:$4 sm:$0xff]   ;;  %v957_v21 = vld [vmem:[%s1094_s10 + $0x4] ss:$8 sps:$4 sm:$0xff]   ;;  %526 = vmatprep.mubr.bf16.mxu0 %v986_v18  ;;  %v959_v22 = vld [vmem:[%s1094_s10] ss:$8 sps:$4 sm:$0xff]  }
  0x2d   : > { %497 = vmatpush1.bf16.msra.mxu0 %v941_v8  ;;  %895 = vmatpush1.bf16.msra.mxu1 %v941_v8  ;;  %v960_v23 = vld [vmem:[%s1094_s10 + $0xf4] ss:$8 sps:$4 sm:$0xff]   ;;  %v962_v24 = vld [vmem:[%s1094_s10 + $0xf0] ss:$8 sps:$4 sm:$0xff]   ;;  %v963_v25 = vld [vmem:[%s1094_s10 + $0xe4] ss:$8 sps:$4 sm:$0xff]  }
  0x2e   : > { %498 = vmatprep.subr.bf16.mxu0 %v942_v9  ;;  %880 = vmatprep.subr.bf16.mxu1 %v942_v9  ;;  %v965_v26 = vld [vmem:[%s1094_s10 + $0xe0] ss:$8 sps:$4 sm:$0xff]   ;;  %v966_v27 = vld [vmem:[%s1094_s10 + $0xd4] ss:$8 sps:$4 sm:$0xff]   ;;  %v968_v28 = vld [vmem:[%s1094_s10 + $0xd0] ss:$8 sps:$4 sm:$0xff]  }
  0x2f   : > { %536 = vmatprep.mubr.bf16.mxu1 %v989_v20  ;;  %v969_v29 = vld [vmem:[%s1094_s10 + $0xc4] ss:$8 sps:$4 sm:$0xff]   ;;  %v971_v30 = vld [vmem:[%s1094_s10 + $0xc0] ss:$8 sps:$4 sm:$0xff]   ;;  %v972_v31 = vld [vmem:[%s1094_s10 + $0xb4] ss:$8 sps:$4 sm:$0xff]  }
  0x30   : > { %v974_v32 = vld [vmem:[%s1094_s10 + $0xb0] ss:$8 sps:$4 sm:$0xff]   ;;  %v975_v33 = vld [vmem:[%s1094_s10 + $0xa4] ss:$8 sps:$4 sm:$0xff]   ;;  %v977_v34 = vld [vmem:[%s1094_s10 + $0xa0] ss:$8 sps:$4 sm:$0xff]  }
  0x31   : > { %499 = vmatpush1.bf16.msra.mxu0 %v944_v10  ;;  %896 = vmatpush1.bf16.msra.mxu1 %v944_v10  ;;  %v978_v35 = vld [vmem:[%s1094_s10 + $0x94] ss:$8 sps:$4 sm:$0xff]   ;;  %v980_v36 = vld [vmem:[%s1094_s10 + $0x90] ss:$8 sps:$4 sm:$0xff]   ;;  %v981_v37 = vld [vmem:[%s1094_s10 + $0x84] ss:$8 sps:$4 sm:$0xff]  }
  0x32   : > { %500 = vmatprep.subr.bf16.mxu0 %v945_v11  ;;  %881 = vmatprep.subr.bf16.mxu1 %v945_v11  ;;  %v983_v38 = vld [vmem:[%s1094_s10 + $0x80] ss:$8 sps:$4 sm:$0xff]   ;;  %v987_v40 = vld [vmem:[%s1096_s11 + $0x10] ss:$8 sps:$4 sm:$0xff]   ;;  %vm556_vm1 = vcmask 588800   ;;  %p865_p10 = scmp.ne.s32.totalorder %s1067_s18, 3 }
  0x33   : > { %v984_v39 = vld [vmem:[%s1096_s11] ss:$8 sps:$4 sm:$0xff]   ;;  %v272_v51 = vld [vmem:[#allocation2 + $0x10] sm:$0xff]  ;;  %v273_v57 = vld [vmem:[#allocation2 + $0x18] sm:$0xff] }
  0x34   : > { %v270_v41 = vld [vmem:[#allocation2] sm:$0xff]  ;;  %v271_v45 = vld [vmem:[#allocation2 + $0x8] sm:$0xff]  ;;  %v276_v52 = vld [vmem:[#allocation2 + $0x30] sm:$0xff] }
  0x35   : > { %501 = vmatpush1.bf16.msra.mxu0 %v947_v12  ;;  %897 = vmatpush1.bf16.msra.mxu1 %v947_v12  ;;  %v274_v42 = vld [vmem:[#allocation2 + $0x20] sm:$0xff]  ;;  %v275_v46 = vld [vmem:[#allocation2 + $0x28] sm:$0xff]  ;;  %v277_v58 = vld [vmem:[#allocation2 + $0x38] sm:$0xff] }
  0x36   : > { %502 = vmatprep.subr.bf16.mxu0 %v948_v13  ;;  %882 = vmatprep.subr.bf16.mxu1 %v948_v13 }
  0x39   : > { %503 = vmatpush1.bf16.msra.mxu0 %v950_v14  ;;  %898 = vmatpush1.bf16.msra.mxu1 %v950_v14 }
  0x3a   : > { %504 = vmatprep.subr.bf16.mxu0 %v951_v15  ;;  %883 = vmatprep.subr.bf16.mxu1 %v951_v15 }
  0x3d   : > { %505 = vmatpush1.bf16.msra.mxu0 %v953_v16  ;;  %899 = vmatpush1.bf16.msra.mxu1 %v953_v16 }
  0x3e   : > { %506 = vmatprep.subr.bf16.mxu0 %v954_v17  ;;  %884 = vmatprep.subr.bf16.mxu1 %v954_v17 }
  0x41   : > { %507 = vmatpush1.bf16.msra.mxu0 %v956_v19  ;;  %900 = vmatpush1.bf16.msra.mxu1 %v956_v19 }
  0x42   : > { %508 = vmatprep.subr.bf16.mxu0 %v957_v21  ;;  %885 = vmatprep.subr.bf16.mxu1 %v957_v21 }
  0x45   : > { %509 = vmatpush1.bf16.msra.mxu0 %v959_v22  ;;  %901 = vmatpush1.bf16.msra.mxu1 %v959_v22 }
  0x46   : > { %510 = vmatprep.subr.bf16.mxu0 %v960_v23  ;;  %886 = vmatprep.subr.bf16.mxu1 %v960_v23 }
  0x49   : > { %511 = vmatpush2.bf16.msra.mxu0 %v962_v24  ;;  %902 = vmatpush2.bf16.msra.mxu1 %v962_v24 }
  0x4a   : > { %512 = vmatprep.subr.bf16.mxu0 %v963_v25  ;;  %887 = vmatprep.subr.bf16.mxu1 %v963_v25 }
  0x4d   : > { %513 = vmatpush2.bf16.msra.mxu0 %v965_v26  ;;  %903 = vmatpush2.bf16.msra.mxu1 %v965_v26 }
  0x4e   : > { %514 = vmatprep.subr.bf16.mxu0 %v966_v27  ;;  %888 = vmatprep.subr.bf16.mxu1 %v966_v27 }
  0x51   : > { %515 = vmatpush2.bf16.msra.mxu0 %v968_v28  ;;  %904 = vmatpush2.bf16.msra.mxu1 %v968_v28 }
  0x52   : > { %516 = vmatprep.subr.bf16.mxu0 %v969_v29  ;;  %889 = vmatprep.subr.bf16.mxu1 %v969_v29 }
  0x55   : > { %517 = vmatpush2.bf16.msra.mxu0 %v971_v30  ;;  %905 = vmatpush2.bf16.msra.mxu1 %v971_v30 }
  0x56   : > { %518 = vmatprep.subr.bf16.mxu0 %v972_v31  ;;  %890 = vmatprep.subr.bf16.mxu1 %v972_v31 }
  0x59   : > { %519 = vmatpush2.bf16.msra.mxu0 %v974_v32  ;;  %906 = vmatpush2.bf16.msra.mxu1 %v974_v32 }
  0x5a   : > { %520 = vmatprep.subr.bf16.mxu0 %v975_v33  ;;  %891 = vmatprep.subr.bf16.mxu1 %v975_v33 }
  0x5d   : > { %521 = vmatpush2.bf16.msra.mxu0 %v977_v34  ;;  %907 = vmatpush2.bf16.msra.mxu1 %v977_v34 }
  0x5e   : > { %522 = vmatprep.subr.bf16.mxu0 %v978_v35  ;;  %892 = vmatprep.subr.bf16.mxu1 %v978_v35 }
  0x61   : > { %523 = vmatpush2.bf16.msra.mxu0 %v980_v36  ;;  %908 = vmatpush2.bf16.msra.mxu1 %v980_v36 }
  0x62   : > { %524 = vmatprep.subr.bf16.mxu0 %v981_v37  ;;  %893 = vmatprep.subr.bf16.mxu1 %v981_v37 }
  0x65   : > { %525 = vmatpush2.bf16.msra.mxu0 %v983_v38  ;;  %909 = vmatpush2.bf16.msra.mxu1 %v983_v38 }
  0x68   : > { %527 = vmatmul.mubr.bf16.vlgmr.msra.gmra.mxu0 %v984_v39  ;;  %537 = vmatmul.mubr.bf16.vlgmr.msra.gmra.mxu1 %v987_v40 }
 0x128   : > { %v528_v43 = vpop.f32.mrf.mxu0  ;;  %v538_v44 = vpop.f32.mrf.mxu1 }
 0x129   : > { %v547_v47 = vadd.f32 %v528_v43, %v270_v41  ;;  %v551_v48 = vadd.f32 %v538_v44, %v274_v42 }
 0x12a   : > { %v530_v49 = vpop.f32.mrf.mxu0  ;;  %v540_v50 = vpop.f32.mrf.mxu1 }
 0x12b   : > { %555 = vst [vmem:[#allocation2] sm:$0xff] %v547_v47  ;;  %560 = vst [vmem:[#allocation2 + $0x20] sm:$0xff] %v551_v48  ;;  %v548_v53 = vadd.f32 %v530_v49, %v271_v45  ;;  %v552_v54 = vadd.f32 %v540_v50, %v275_v46 }
 0x12c   : > { %v532_v55 = vpop.f32.mrf.mxu0  ;;  %v542_v56 = vpop.f32.mrf.mxu1 }
 0x12d   : > { %557 = vst.msk [vmem:[#allocation2 + $0x8] sm:$0xff] %vm556_vm1, %v548_v53  ;;  %561 = vst.msk [vmem:[#allocation2 + $0x28] sm:$0xff] %vm556_vm1, %v552_v54  ;;  %v549_v59 = vadd.f32 %v532_v55, %v272_v51  ;;  %v553_v60 = vadd.f32 %v542_v56, %v276_v52  ;;  %567 = sbr.rel (%p865_p10) target bundleno = 637 (0x27d), region = 82 }
 0x12e   : > { %v534_v61 = vpop.f32.mrf.mxu0  ;;  %v544_v62 = vpop.f32.mrf.mxu1 }
 0x12f   : > { %558 = vst [vmem:[#allocation2 + $0x10] sm:$0xff] %v549_v59  ;;  %562 = vst [vmem:[#allocation2 + $0x30] sm:$0xff] %v553_v60  ;;  %v550_v63 = vadd.f32 %v534_v61, %v273_v57  ;;  %v554_v0 = vadd.f32 %v544_v62, %v277_v58 }
 0x131   : > { %559 = vst.msk [vmem:[#allocation2 + $0x18] sm:$0xff] %vm556_vm1, %v550_v63  ;;  %563 = vst.msk [vmem:[#allocation2 + $0x38] sm:$0xff] %vm556_vm1, %v554_v0 }
 0x132   : > { %v1140_v1 = vld [vmem:[#allocation2 + $0x20] sm:$0xff]  ;;  %v1025_v33 = vmov 0   ;;  %v633_v62 = vld [vmem:[%s1256_s2 + $0x8] sm:$0xff]  ;;  %vm764_vm2 = vcmask 1043456   ;;  %vm765_vm3 = vcmask 588804  }
 0x133   : > { %v1144_v3 = vld [vmem:[#allocation2] sm:$0xff]  ;;  %v600_v29 = vmul.f32 %v1140_v1, %v1140_v1  ;;  %991 = vset.pattern.permute.xlu1 %v1025_v33  ;;  %990 = vset.pattern.permute.xlu0 %v1025_v33  ;;  %vm1216_vm6 = vmor %vm765_vm3, %vm764_vm2 }
 0x134   : > { %v1142_v2 = vld [vmem:[#allocation2 + $0x28] sm:$0xff]  ;;  %v596_v20 = vmul.f32 %v1144_v3, %v1144_v3  ;;  %v632_v63 = vld [vmem:[%s1256_s2] sm:$0xff] }
 0x135   : > { %v584_v4 = vsel %vm556_vm1, %v1142_v2, 0.0  ;;  %v1148_v5 = vld [vmem:[#allocation2 + $0x8] sm:$0xff]  ;;  %v601_v24 = vmul.f32 %v1142_v2, %v1142_v2 }
 0x136   : > { %v1150_v6 = vld [vmem:[#allocation2 + $0x30] sm:$0xff]  ;;  %v585_v8 = vadd.f32 %v584_v4, %v1140_v1  ;;  %v576_v9 = vsel %vm556_vm1, %v1148_v5, 0.0  ;;  %v597_v13 = vmul.f32 %v1148_v5, %v1148_v5 }
 0x137   : > { %v1159_v11 = vld [vmem:[#allocation2 + $0x10] sm:$0xff]  ;;  %v577_v14 = vadd.f32 %v576_v9, %v1144_v3  ;;  %v602_v26 = vmul.f32 %v1150_v6, %v1150_v6  ;;  %v612_v30 = vsel %vm556_vm1, %v601_v24, 0.0 }
 0x138   : > { %v1152_v7 = vld [vmem:[#allocation2 + $0x38] sm:$0xff]  ;;  %586 = vadd.xlane.f32.xlu1 %v585_v8  ;;  %v598_v17 = vmul.f32 %v1159_v11, %v1159_v11  ;;  %v604_v23 = vsel %vm556_vm1, %v597_v13, 0.0  ;;  %v613_v32 = vadd.f32 %v612_v30, %v600_v29 }
 0x139   : > { %v588_v10 = vsel %vm556_vm1, %v1152_v7, 0.0  ;;  %v1161_v12 = vld [vmem:[#allocation2 + $0x18] sm:$0xff]  ;;  %578 = vadd.xlane.f32.xlu0 %v577_v14  ;;  %v603_v21 = vmul.f32 %v1152_v7, %v1152_v7  ;;  %v605_v27 = vadd.f32 %v604_v23, %v596_v20 }
 0x13a   : > { %v580_v15 = vsel %vm556_vm1, %v1161_v12, 0.0  ;;  %v589_v16 = vadd.f32 %v588_v10, %v1150_v6  ;;  %v599_v18 = vmul.f32 %v1161_v12, %v1161_v12  ;;  %v634_v10 = vld [vmem:[%s1256_s2 + $0x10] sm:$0xff] }
 0x13b   : > { %v581_v19 = vadd.f32 %v580_v15, %v1159_v11  ;;  %v616_v28 = vsel %vm556_vm1, %v603_v21, 0.0 }
 0x13c   : > { %v608_v22 = vsel %vm556_vm1, %v599_v18, 0.0  ;;  %590 = vadd.xlane.f32.xlu1 %v589_v16  ;;  %v617_v31 = vadd.f32 %v616_v28, %v602_v26  ;;  %v635_v16 = vld [vmem:[%s1256_s2 + $0x18] sm:$0xff] }
 0x13d   : > { %v609_v25 = vadd.f32 %v608_v22, %v598_v17  ;;  %582 = vadd.xlane.f32.xlu0 %v581_v19  ;;  %v648_v19 = vld [vmem:[%s1257_s3] sm:$0xff]  ;;  %v649_v22 = vld [vmem:[%s1257_s3 + $0x8] sm:$0xff]  ;;  %v651_v28 = vld [vmem:[%s1257_s3 + $0x18] sm:$0xff] }
 0x140   : > { %610 = vadd.xlane.f32.xlu1 %v609_v25  ;;  %v650_v25 = vld [vmem:[%s1257_s3 + $0x10] sm:$0xff] }
 0x141   : > { %606 = vadd.xlane.f32.xlu0 %v605_v27 }
 0x144   : > { %618 = vadd.xlane.f32.xlu1 %v617_v31 }
 0x145   : > { %614 = vadd.xlane.f32.xlu0 %v613_v32 }
 0x1c1   : > { %v587_v34 = vpop.xlane.xlu1 %586 }
 0x1c2   : > { %v579_v35 = vpop.xlane.xlu0 %578  ;;  %v594_v45 = vmul.f32 0.005, %v587_v34 }
 0x1c3   : > { %v592_v38 = vmul.f32 0.005, %v579_v35 }
 0x1c4   : > { %v626_v55 = vmul.f32 %v594_v45, %v594_v45 }
 0x1c5   : > { %v591_v36 = vpop.xlane.xlu1 %590  ;;  %v624_v46 = vmul.f32 %v592_v38, %v592_v38 }
 0x1c6   : > { %v583_v37 = vpop.xlane.xlu0 %582  ;;  %v595_v41 = vmul.f32 0.005, %v591_v36 }
 0x1c7   : > { %v593_v39 = vmul.f32 0.005, %v583_v37 }
 0x1c8   : > { %v627_v51 = vmul.f32 %v595_v41, %v595_v41 }
 0x1c9   : > { %v611_v40 = vpop.xlane.xlu1 %610  ;;  %v625_v42 = vmul.f32 %v593_v39, %v593_v39 }
 0x1ca   : > { %v621_v43 = vmul.f32 0.005, %v611_v40  ;;  %v607_v44 = vpop.xlane.xlu0 %606 }
 0x1cb   : > { %v620_v47 = vmul.f32 0.005, %v607_v44 }
 0x1cc   : > { %v629_v48 = vsub.f32 %v621_v43, %v625_v42 }
 0x1cd   : > { %v628_v49 = vsub.f32 %v620_v47, %v624_v46  ;;  %v619_v50 = vpop.xlane.xlu1 %618 }
 0x1ce   : > { %v637_v52 = vadd.f32 1e-05, %v629_v48  ;;  %v623_v53 = vmul.f32 0.005, %v619_v50  ;;  %v615_v54 = vpop.xlane.xlu0 %614 }
 0x1cf   : > { %v636_v56 = vadd.f32 1e-05, %v628_v49  ;;  %v622_v57 = vmul.f32 0.005, %v615_v54 }
 0x1d0   : > { %992 = vrsqrt.f32 %v637_v52  ;;  %v631_v58 = vsub.f32 %v623_v53, %v627_v51 }
 0x1d1   : > { %994 = vrsqrt.f32 %v636_v56  ;;  %v630_v59 = vsub.f32 %v622_v57, %v626_v55 }
 0x1d2   : > { %v639_v60 = vadd.f32 1e-05, %v631_v58 }
 0x1d3   : > { %v638_v61 = vadd.f32 1e-05, %v630_v59 }
 0x1d5   : > { %996 = vrsqrt.f32 %v638_v61 }
 0x1d6   : > { %998 = vrsqrt.f32 %v639_v60 }
 0x1dd   : > { %v993_v0 = vpop.eup %992 }
 0x1de   : > { %v995_v4 = vpop.eup %994  ;;  %v645_v8 = vmul.f32 %v993_v0, %v633_v62 }
 0x1df   : > { %v644_v9 = vmul.f32 %v995_v4, %v632_v63 }
 0x1e0   : > { %667 = vperm.xlu1 %991, %v645_v8   ;;  %v653_v21 = vmul.f32 %v645_v8, %v593_v39 }
 0x1e1   : > { %662 = vperm.xlu0 %990, %v644_v9   ;;  %v652_v18 = vmul.f32 %v644_v9, %v592_v38 }
 0x1e2   : > { %v997_v13 = vpop.eup %996  ;;  %v657_v23 = vsub.f32 %v649_v22, %v653_v21 }
 0x1e3   : > { %v646_v14 = vmul.f32 %v997_v13, %v634_v10  ;;  %v999_v15 = vpop.eup %998  ;;  %v656_v20 = vsub.f32 %v648_v19, %v652_v18 }
 0x1e4   : > { %v647_v17 = vmul.f32 %v999_v15, %v635_v16 }
 0x1e5   : > { %672 = vperm.xlu1 %991, %v646_v14   ;;  %v654_v24 = vmul.f32 %v646_v14, %v594_v45 }
 0x1e6   : > { %v655_v27 = vmul.f32 %v647_v17, %v595_v41 }
 0x1e7   : > { %v658_v26 = vsub.f32 %v650_v25, %v654_v24 }
 0x1e8   : > { %v659_v29 = vsub.f32 %v651_v28, %v655_v27 }
 0x1e9   : > { %677 = vperm.xlu1 %991, %v647_v17  }
 0x1ed   : > { %690 = vperm.xlu1 %991, %v656_v20  }
 0x1f1   : > { %695 = vperm.xlu1 %991, %v657_v23  }
 0x1f5   : > { %700 = vperm.xlu1 %991, %v658_v26  }
 0x1f9   : > { %705 = vperm.xlu1 %991, %v659_v29  }
 0x25b   : > { %v668_v30 = vpop.permute.xlu1 %667 }
 0x25c   : > { %v663_v32 = vpop.permute.xlu0 %662  ;;  %v682_v39 = vmul.f32 %v668_v30, %v1159_v11  ;;  %v683_v40 = vmul.f32 %v668_v30, %v1161_v12 }
 0x25d   : > { %v680_v34 = vmul.f32 %v663_v32, %v1144_v3  ;;  %v681_v35 = vmul.f32 %v663_v32, %v1148_v5 }
 0x260   : > { %v673_v31 = vpop.permute.xlu1 %672 }
 0x261   : > { %v684_v47 = vmul.f32 %v673_v31, %v1140_v1  ;;  %v685_v11 = vmul.f32 %v673_v31, %v1142_v2 }
 0x264   : > { %v678_v33 = vpop.permute.xlu1 %677 }
 0x265   : > { %v686_v1 = vmul.f32 %v678_v33, %v1150_v6  ;;  %v687_v2 = vmul.f32 %v678_v33, %v1152_v7 }
 0x268   : > { %v691_v36 = vpop.permute.xlu1 %690 }
 0x269   : > { %v708_v37 = vadd.f32 %v691_v36, %v680_v34  ;;  %v709_v38 = vadd.f32 %v691_v36, %v681_v35 }
 0x26b   : > { %vm716_vm4 = vcmp.ge.f32.partialorder %v708_v37, 0.0  ;;  %vm717_vm5 = vcmp.ge.f32.partialorder %v709_v38, 0.0  ;;  %v724_v41 = vmul.f32 0.2, %v708_v37  ;;  %v725_v42 = vmul.f32 0.2, %v709_v38 }
 0x26c   : > { %v696_v43 = vpop.permute.xlu1 %695 }
 0x26d   : > { %v732_v3 = vsel %vm716_vm4, %v708_v37, %v724_v41  ;;  %v733_v5 = vsel %vm717_vm5, %v709_v38, %v725_v42  ;;  %v710_v45 = vadd.f32 %v696_v43, %v682_v39  ;;  %v711_v46 = vadd.f32 %v696_v43, %v683_v40 }
 0x26e   : > { %v874_v12 = vpack.c.bf16 %v733_v5, %v732_v3 }
 0x26f   : > { %vm718_vm7 = vcmp.ge.f32.partialorder %v710_v45, 0.0  ;;  %vm719_vm8 = vcmp.ge.f32.partialorder %v711_v46, 0.0  ;;  %v726_v48 = vmul.f32 0.2, %v710_v45  ;;  %v727_v49 = vmul.f32 0.2, %v711_v46 }
 0x270   : > { %767 = vst.msk [vmem:[%s1258_s4] sm:$0xff] %vm1216_vm6, %v874_v12  ;;  %v701_v50 = vpop.permute.xlu1 %700 }
 0x271   : > { %v734_v51 = vsel %vm718_vm7, %v710_v45, %v726_v48  ;;  %v735_v52 = vsel %vm719_vm8, %v711_v46, %v727_v49  ;;  %v712_v53 = vadd.f32 %v701_v50, %v684_v47  ;;  %v713_v54 = vadd.f32 %v701_v50, %v685_v11 }
 0x272   : > { %v875_v55 = vpack.c.bf16 %v735_v52, %v734_v51 }
 0x273   : > { %vm720_vm9 = vcmp.ge.f32.partialorder %v712_v53, 0.0  ;;  %vm721_vm10 = vcmp.ge.f32.partialorder %v713_v54, 0.0  ;;  %v728_v56 = vmul.f32 0.2, %v712_v53  ;;  %v729_v57 = vmul.f32 0.2, %v713_v54 }
 0x274   : > { %768 = vst.msk [vmem:[%s1258_s4 + $0x8] sm:$0xff] %vm1216_vm6, %v875_v55  ;;  %v706_v58 = vpop.permute.xlu1 %705 }
 0x275   : > { %v736_v59 = vsel %vm720_vm9, %v712_v53, %v728_v56  ;;  %v737_v60 = vsel %vm721_vm10, %v713_v54, %v729_v57  ;;  %v714_v61 = vadd.f32 %v706_v58, %v686_v1  ;;  %v715_v62 = vadd.f32 %v706_v58, %v687_v2 }
 0x276   : > { %v876_v63 = vpack.c.bf16 %v737_v60, %v736_v59 }
 0x277   : > { %vm722_vm11 = vcmp.ge.f32.partialorder %v714_v61, 0.0  ;;  %vm723_vm12 = vcmp.ge.f32.partialorder %v715_v62, 0.0  ;;  %v730_v6 = vmul.f32 0.2, %v714_v61  ;;  %v731_v7 = vmul.f32 0.2, %v715_v62 }
 0x278   : > { %769 = vst.msk [vmem:[%s1258_s4 + $0x10] sm:$0xff] %vm1216_vm6, %v876_v63 }
 0x279   : > { %v738_v0 = vsel %vm722_vm11, %v714_v61, %v730_v6  ;;  %v739_v4 = vsel %vm723_vm12, %v715_v62, %v731_v7 }
 0x27a   : > { %v877_v8 = vpack.c.bf16 %v739_v4, %v738_v0 }
 0x27c   : > { %770 = vst.msk [vmem:[%s1258_s4 + $0x18] sm:$0xff] %vm1216_vm6, %v877_v8 }
 0x27d PF: > { %p11_p11 = scmp.ge.s32.totalorder %s1070_s19, 6   ;;  %s1261_s15 = smov %s1018_s16 }
 0x27e   : > { %s1262_s16 = smov %s1079_s22  ;;  %s1263_s17 = smov %s1070_s19 }
 0x27f   :  { %13 = sbr.rel (!%p11_p11) target bundleno = 2 (0x2), region = 116 }

// kernel: generator_forward.6
= control target key start
LH: loop header
LB: loop body
LE: loop exit
PB: predicated region body
PF: predicated region fallthrough
CT: control target
= control target key end

     0   :  { %s1891_s15 = smov 0   ;;  %s1893_s16 = smov 0   ;;  %s2204_s0 = inlined_call_operand.vmem [shape: bf16[16,512], index: 0, kind: input, shape index: {}]   ;;  %s2205_s1 = inlined_call_operand.vmem [shape: bf16[512,800], index: 1, kind: input, shape index: {}]   ;;  %s2206_s2 = inlined_call_operand.vmem [shape: f32[16,1], index: 2, kind: input, shape index: {}]   ;;  %s2207_s3 = inlined_call_operand.vmem [shape: f32[16,1], index: 3, kind: input, shape index: {}]   ;;  %s2208_s4 = inlined_call_operand.vmem [shape: bf16[16,800], index: 4, kind: output, shape index: {}]  }
   0x1   :  { %s1895_s17 = smov 0  }
   0x2 LB: > { %s1904_s18 = sadd.s32 4294967295, %s1862_s17   ;;  %s1906_s19 = sadd.s32 1, %s1862_s17   ;;  %s1862_s17 = sphi %s1895_s17, %s2211_s17   ;;  %s1858_s16 = sphi %s1893_s16, %s2210_s16   ;;  %s1854_s15 = sphi %s1891_s15, %s2209_s15  }
   0x3   : > { %s18_s20 = ssub.s32 %s1862_s17, %s1906_s19  ;;  %s21_s21 = sadd.s32 1, %s1858_s16 }
   0x4   : > { %p19_p0 = scmp.eq.s32.totalorder %s18_s20, 0  ;;  %p28_p1 = scmp.ne.s32.totalorder %s1858_s16, %s1854_s15 }
   0x5   : > { %p29_p2 = scmp.eq.s32.totalorder %s1862_s17, 0  ;;  %p1479_p4 = scmp.ge.s32.totalorder %s1862_s17, 2 }
   0x6   : > { %s1913_s22 = scalar_select %p19_p0, %s1858_s16, %s21_s21  }
   0x7   : > { %p30_p3 = por %p29_p2, %p28_p1  ;;  %149 = sbr.rel (%p1479_p4) target bundleno = 17 (0x11), region = 24 }
   0xc   : > { %152 = sbr.rel (!%p30_p3) target bundleno = 17 (0x11), region = 28  ;;  %s154_s23 = sand.u32 (%p30_p3), 1, %s1858_s16  }
   0xd   : > { %s1613_s24 = sshll.u32 (%p30_p3), %s1862_s17, 3  ;;  %s1480_s25 = sshll.u32 (%p30_p3), %s154_s23, 4 }
   0xe   : > { %s159_s28 = scalar_lea.vmem (%p30_p3), %s2204_s0, %s1613_s24  ;;  %s156_s29 = scalar_lea.vmem (%p30_p3), [#allocation3], %s1480_s25 }
   0xf   : > { %v190_v0 = vld [vmem:[%s159_s28] sm:$0xff] (%p30_p3)  ;;  %v192_v1 = vld [vmem:[%s159_s28 + $0x10] sm:$0xff] (%p30_p3) }
  0x10   : > { %191 = vst [vmem:[%s156_s29] sm:$0xff] (%p30_p3), %v190_v0  ;;  %193 = vst [vmem:[%s156_s29 + $0x8] sm:$0xff] (%p30_p3), %v192_v1 }
  0x11 PF: > { %p1483_p5 = scmp.ge.s32.totalorder %s1862_s17, 1  ;;  %p208_p6 = scmp.lt.s32.totalorder %s1862_s17, 3 }
  0x13   : > { %p209_p7 = pnand %p1483_p5, %p208_p6 }
  0x14   : > { %s215_s30 = sand.u32 (!%p209_p7), 1, %s1854_s15   ;;  %s1485_s5 = sshll.u32 (!%p209_p7), %s1904_s18, 5 }
  0x15   : > { %212 = sbr.rel (%p209_p7) target bundleno = 697 (0x2b9), region = 70  ;;  %s1921_s6 = sshll.u32 (!%p209_p7), %s215_s30, 4 }
  0x16   : > { %p243_p8 = scmp.lt.s32.totalorder (!%p209_p7), %s1485_s5, 63  ;;  %s217_s11 = scalar_lea.vmem (!%p209_p7), [#allocation3], %s1921_s6 }
  0x17   : > { %p1487_p9 = scmp.ne.s32.totalorder (!%p209_p7), %s1904_s18, 0 }
  0x1a   : > { %s2213_s5 = smov (!%p243_p8, %s1485_s5), 63  ;;  %253 = sbr.rel (%p1487_p9) target bundleno = 39 (0x27), region = 78 }
  0x1b   : > { %s1644_s7 = smul.u32 28, %s2213_s5 }
  0x1d   : > { %s1926_s10 = scalar_lea.vmem %s2205_s1, %s1644_s7 }
  0x1f   : > { %vm260_vm0 = vcmask 261120   ;;  %v1864_v2 = vmov 0.0  }
  0x20   : > { %254 = vst [vmem:[#allocation2] sm:$0xff] %v1864_v2  ;;  %255 = vst [vmem:[#allocation2 + $0x8] sm:$0xff] %v1864_v2 }
  0x21   : > { %256 = vst [vmem:[#allocation2 + $0x10] sm:$0xff] %v1864_v2  ;;  %257 = vst [vmem:[#allocation2 + $0x18] sm:$0xff] %v1864_v2 }
  0x22   : > { %258 = vst [vmem:[#allocation2 + $0x20] sm:$0xff] %v1864_v2  ;;  %259 = vst [vmem:[#allocation2 + $0x28] sm:$0xff] %v1864_v2 }
  0x23   : > { %262 = vst [vmem:[#allocation2 + $0x38] sm:$0xff] %v1864_v2  ;;  %263 = vst [vmem:[#allocation2 + $0x40] sm:$0xff] %v1864_v2 }
  0x24   : > { %264 = vst [vmem:[#allocation2 + $0x48] sm:$0xff] %v1864_v2  ;;  %265 = vst [vmem:[#allocation2 + $0x50] sm:$0xff] %v1864_v2 }
  0x25   : > { %266 = vst [vmem:[#allocation2 + $0x58] sm:$0xff] %v1864_v2  ;;  %267 = vst [vmem:[#allocation2 + $0x60] sm:$0xff] %v1864_v2 }
  0x26   : > { %261 = vst.msk [vmem:[#allocation2 + $0x30] sm:$0xff] %vm260_vm0, %v1864_v2  ;;  %268 = vst.msk [vmem:[#allocation2 + $0x68] sm:$0xff] %vm260_vm0, %v1864_v2 }
  0x27 PF: > { %v1671_v3 = vld [vmem:[%s1926_s10 + $0x18c] ss:$28 sps:$4 sm:$0xff]   ;;  %v1674_v5 = vld [vmem:[%s1926_s10 + $0x154] ss:$28 sps:$4 sm:$0xff]   ;;  %v1677_v7 = vld [vmem:[%s1926_s10 + $0x11c] ss:$28 sps:$4 sm:$0xff]  }
  0x28   : > { %v1673_v4 = vld [vmem:[%s1926_s10 + $0x188] ss:$28 sps:$4 sm:$0xff]   ;;  %999 = vmatprep.subr.bf16.mxu0 %v1671_v3  ;;  %v1676_v6 = vld [vmem:[%s1926_s10 + $0x150] ss:$28 sps:$4 sm:$0xff]   ;;  %v1679_v8 = vld [vmem:[%s1926_s10 + $0x118] ss:$28 sps:$4 sm:$0xff]  }
  0x29   : > { %1000 = vmatpush1.bf16.msra.mxu0 %v1673_v4  ;;  %v1680_v9 = vld [vmem:[%s1926_s10 + $0xe4] ss:$28 sps:$4 sm:$0xff]   ;;  %v1691_v10 = vld [vmem:[%s1926_s10 + $0x194] ss:$28 sps:$4 sm:$0xff]   ;;  %v1683_v13 = vld [vmem:[%s1926_s10 + $0xac] ss:$28 sps:$4 sm:$0xff]  }
  0x2a   : > { %1001 = vmatprep.subr.bf16.mxu0 %v1674_v5  ;;  %v1694_v11 = vld [vmem:[%s1926_s10 + $0x190] ss:$28 sps:$4 sm:$0xff]   ;;  %v1682_v12 = vld [vmem:[%s1926_s10 + $0xe0] ss:$28 sps:$4 sm:$0xff]   ;;  %1042 = vmatprep.subr.bf16.mxu1 %v1691_v10  ;;  %v1700_v15 = vld [vmem:[%s1926_s10 + $0x158] ss:$28 sps:$4 sm:$0xff]  }
  0x2b   : > { %1043 = vmatpush1.bf16.msra.mxu1 %v1694_v11  ;;  %v1697_v14 = vld [vmem:[%s1926_s10 + $0x15c] ss:$28 sps:$4 sm:$0xff]   ;;  %v1685_v16 = vld [vmem:[%s1926_s10 + $0xa8] ss:$28 sps:$4 sm:$0xff]   ;;  %v1686_v17 = vld [vmem:[%s1926_s10 + $0x74] ss:$28 sps:$4 sm:$0xff]  }
  0x2c   : > { %1044 = vmatprep.subr.bf16.mxu1 %v1697_v14  ;;  %v1703_v18 = vld [vmem:[%s1926_s10 + $0x124] ss:$28 sps:$4 sm:$0xff]   ;;  %v1709_v20 = vld [vmem:[%s1926_s10 + $0xec] ss:$28 sps:$4 sm:$0xff]   ;;  %v1689_v22 = vld [vmem:[%s1926_s10 + $0x3c] ss:$28 sps:$4 sm:$0xff]  }
  0x2d   : > { %1002 = vmatpush1.bf16.msra.mxu0 %v1676_v6  ;;  %v1706_v19 = vld [vmem:[%s1926_s10 + $0x120] ss:$28 sps:$4 sm:$0xff]   ;;  %v1688_v21 = vld [vmem:[%s1926_s10 + $0x70] ss:$28 sps:$4 sm:$0xff]   ;;  %v1712_v23 = vld [vmem:[%s1926_s10 + $0xe8] ss:$28 sps:$4 sm:$0xff]  }
  0x2e   : > { %1003 = vmatprep.subr.bf16.mxu0 %v1677_v7  ;;  %v1715_v24 = vld [vmem:[%s1926_s10 + $0xb4] ss:$28 sps:$4 sm:$0xff]   ;;  %v1695_v26 = vld [vmem:[%s1926_s10 + $0x4] ss:$28 sps:$4 sm:$0xff]   ;;  %v1721_v28 = vld [vmem:[%s1926_s10 + $0x7c] ss:$28 sps:$4 sm:$0xff]  }
  0x2f   : > { %1045 = vmatpush1.bf16.msra.mxu1 %v1700_v15  ;;  %v1693_v25 = vld [vmem:[%s1926_s10 + $0x38] ss:$28 sps:$4 sm:$0xff]   ;;  %v1718_v27 = vld [vmem:[%s1926_s10 + $0xb0] ss:$28 sps:$4 sm:$0xff]   ;;  %v1699_v29 = vld [vmem:[%s1926_s10] ss:$28 sps:$4 sm:$0xff]  }
  0x30   : > { %1046 = vmatprep.subr.bf16.mxu1 %v1703_v18  ;;  %v1701_v30 = vld [vmem:[%s1926_s10 + $0x34c] ss:$28 sps:$4 sm:$0xff]   ;;  %v1724_v31 = vld [vmem:[%s1926_s10 + $0x78] ss:$28 sps:$4 sm:$0xff]   ;;  %v1727_v32 = vld [vmem:[%s1926_s10 + $0x44] ss:$28 sps:$4 sm:$0xff]  }
  0x31   : > { %1004 = vmatpush1.bf16.msra.mxu0 %v1679_v8  ;;  %v1705_v33 = vld [vmem:[%s1926_s10 + $0x348] ss:$28 sps:$4 sm:$0xff]   ;;  %v1707_v34 = vld [vmem:[%s1926_s10 + $0x314] ss:$28 sps:$4 sm:$0xff]   ;;  %v1730_v35 = vld [vmem:[%s1926_s10 + $0x40] ss:$28 sps:$4 sm:$0xff]  }
  0x32   : > { %1005 = vmatprep.subr.bf16.mxu0 %v1680_v9  ;;  %v1733_v36 = vld [vmem:[%s1926_s10 + $0xc] ss:$28 sps:$4 sm:$0xff]   ;;  %v1713_v38 = vld [vmem:[%s1926_s10 + $0x2dc] ss:$28 sps:$4 sm:$0xff]   ;;  %v1739_v41 = vld [vmem:[%s1926_s10 + $0x354] ss:$28 sps:$4 sm:$0xff]  }
  0x33   : > { %1047 = vmatpush1.bf16.msra.mxu1 %v1706_v19  ;;  %v1711_v37 = vld [vmem:[%s1926_s10 + $0x310] ss:$28 sps:$4 sm:$0xff]   ;;  %v1736_v40 = vld [vmem:[%s1926_s10 + $0x8] ss:$28 sps:$4 sm:$0xff]   ;;  %v1717_v42 = vld [vmem:[%s1926_s10 + $0x2d8] ss:$28 sps:$4 sm:$0xff]  }
  0x34   : > { %1048 = vmatprep.subr.bf16.mxu1 %v1709_v20  ;;  %v1968_v39 = vld [vmem:[%s217_s11 + $0x4] ss:$8 sps:$4 sm:$0xff]   ;;  %v1998_v0 = vld [vmem:[%s217_s11] ss:$8 sps:$4 sm:$0xff]   ;;  %vm1189_vm1 = vcmask 261120   ;;  %p1602_p10 = scmp.ne.s32.totalorder %s1904_s18, 1 }
  0x35   : > { %1006 = vmatpush1.bf16.msra.mxu0 %v1682_v12  ;;  %1031 = vmatprep.mubr.bf16.mxu0 %v1968_v39  ;;  %v1719_v43 = vld [vmem:[%s1926_s10 + $0x2a4] ss:$28 sps:$4 sm:$0xff]   ;;  %v1742_v44 = vld [vmem:[%s1926_s10 + $0x350] ss:$28 sps:$4 sm:$0xff]   ;;  %v1745_v45 = vld [vmem:[%s1926_s10 + $0x31c] ss:$28 sps:$4 sm:$0xff]  }
  0x36   : > { %1007 = vmatprep.subr.bf16.mxu0 %v1683_v13  ;;  %1074 = vmatprep.mubr.bf16.mxu1 %v1968_v39  ;;  %v1723_v46 = vld [vmem:[%s1926_s10 + $0x2a0] ss:$28 sps:$4 sm:$0xff]   ;;  %v1725_v47 = vld [vmem:[%s1926_s10 + $0x26c] ss:$28 sps:$4 sm:$0xff]   ;;  %v1748_v48 = vld [vmem:[%s1926_s10 + $0x318] ss:$28 sps:$4 sm:$0xff]  }
  0x37   : > { %1049 = vmatpush1.bf16.msra.mxu1 %v1712_v23  ;;  %v1752_v49 = vld [vmem:[%s1926_s10 + $0x2e4] ss:$28 sps:$4 sm:$0xff]   ;;  %v1731_v51 = vld [vmem:[%s1926_s10 + $0x234] ss:$28 sps:$4 sm:$0xff]   ;;  %v1758_v53 = vld [vmem:[%s1926_s10 + $0x2ac] ss:$28 sps:$4 sm:$0xff]  }
  0x38   : > { %1050 = vmatprep.subr.bf16.mxu1 %v1715_v24  ;;  %v1729_v50 = vld [vmem:[%s1926_s10 + $0x268] ss:$28 sps:$4 sm:$0xff]   ;;  %v1757_v52 = vld [vmem:[%s1926_s10 + $0x2e0] ss:$28 sps:$4 sm:$0xff]   ;;  %v1735_v54 = vld [vmem:[%s1926_s10 + $0x230] ss:$28 sps:$4 sm:$0xff]  }
  0x39   : > { %1008 = vmatpush1.bf16.msra.mxu0 %v1685_v16  ;;  %v1737_v55 = vld [vmem:[%s1926_s10 + $0x1fc] ss:$28 sps:$4 sm:$0xff]   ;;  %v1763_v56 = vld [vmem:[%s1926_s10 + $0x2a8] ss:$28 sps:$4 sm:$0xff]   ;;  %v1764_v57 = vld [vmem:[%s1926_s10 + $0x274] ss:$28 sps:$4 sm:$0xff]  }
  0x3a   : > { %1009 = vmatprep.subr.bf16.mxu0 %v1686_v17  ;;  %v1741_v58 = vld [vmem:[%s1926_s10 + $0x1f8] ss:$28 sps:$4 sm:$0xff]   ;;  %v1743_v59 = vld [vmem:[%s1926_s10 + $0x1c4] ss:$28 sps:$4 sm:$0xff]   ;;  %v1769_v60 = vld [vmem:[%s1926_s10 + $0x270] ss:$28 sps:$4 sm:$0xff]  }
  0x3b   : > { %1051 = vmatpush1.bf16.msra.mxu1 %v1718_v27  ;;  %v1770_v61 = vld [vmem:[%s1926_s10 + $0x23c] ss:$28 sps:$4 sm:$0xff]   ;;  %v1776_v2 = vld [vmem:[%s1926_s10 + $0x204] ss:$28 sps:$4 sm:$0xff]   ;;  %v1782_v6 = vld [vmem:[%s1926_s10 + $0x1cc] ss:$28 sps:$4 sm:$0xff]  }
  0x3c   : > { %1052 = vmatprep.subr.bf16.mxu1 %v1721_v28  ;;  %v1747_v62 = vld [vmem:[%s1926_s10 + $0x1c0] ss:$28 sps:$4 sm:$0xff]   ;;  %v1775_v1 = vld [vmem:[%s1926_s10 + $0x238] ss:$28 sps:$4 sm:$0xff]   ;;  %v1768_v8 = vld [vmem:[%s1926_s10 + $0x12c] ss:$28 sps:$4 sm:$0xff]  }
  0x3d   : > { %1010 = vmatpush1.bf16.msra.mxu0 %v1688_v21  ;;  %v1756_v63 = vld [vmem:[%s1926_s10 + $0x19c] ss:$28 sps:$4 sm:$0xff]   ;;  %v1762_v4 = vld [vmem:[%s1926_s10 + $0x164] ss:$28 sps:$4 sm:$0xff]   ;;  %v1774_v12 = vld [vmem:[%s1926_s10 + $0xf4] ss:$28 sps:$4 sm:$0xff]  }
  0x3e   : > { %1011 = vmatprep.subr.bf16.mxu0 %v1689_v22  ;;  %v1754_v3 = vld [vmem:[%s1926_s10 + $0x198] ss:$28 sps:$4 sm:$0xff]   ;;  %v1781_v5 = vld [vmem:[%s1926_s10 + $0x200] ss:$28 sps:$4 sm:$0xff]   ;;  %v1787_v9 = vld [vmem:[%s1926_s10 + $0x1c8] ss:$28 sps:$4 sm:$0xff]  }
  0x3f   : > { %1053 = vmatpush1.bf16.msra.mxu1 %v1724_v31  ;;  %v1760_v7 = vld [vmem:[%s1926_s10 + $0x160] ss:$28 sps:$4 sm:$0xff]   ;;  %v1766_v11 = vld [vmem:[%s1926_s10 + $0x128] ss:$28 sps:$4 sm:$0xff]   ;;  %v1772_v15 = vld [vmem:[%s1926_s10 + $0xf0] ss:$28 sps:$4 sm:$0xff]  }
  0x40   : > { %1054 = vmatprep.subr.bf16.mxu1 %v1727_v32  ;;  %v1791_v10 = vld [vmem:[%s1926_s10 + $0x360] ss:$28 sps:$4 sm:$0xff]   ;;  %v1796_v14 = vld [vmem:[%s1926_s10 + $0x328] ss:$28 sps:$4 sm:$0xff]   ;;  %v1801_v18 = vld [vmem:[%s1926_s10 + $0x2f0] ss:$28 sps:$4 sm:$0xff]  }
  0x41   : > { %1012 = vmatpush1.bf16.msra.mxu0 %v1693_v25  ;;  %v1792_v13 = vld [vmem:[%s1926_s10 + $0x1a0] ss:$28 sps:$4 sm:$0xff]   ;;  %v1797_v17 = vld [vmem:[%s1926_s10 + $0x168] ss:$28 sps:$4 sm:$0xff]   ;;  %v1778_v19 = vld [vmem:[%s1926_s10 + $0xb8] ss:$28 sps:$4 sm:$0xff]  }
  0x42   : > { %1013 = vmatprep.subr.bf16.mxu0 %v1695_v26  ;;  %v1780_v16 = vld [vmem:[%s1926_s10 + $0xbc] ss:$28 sps:$4 sm:$0xff]   ;;  %v1786_v20 = vld [vmem:[%s1926_s10 + $0x84] ss:$28 sps:$4 sm:$0xff]   ;;  %v1802_v21 = vld [vmem:[%s1926_s10 + $0x130] ss:$28 sps:$4 sm:$0xff]  }
  0x43   : > { %1055 = vmatpush1.bf16.msra.mxu1 %v1730_v35  ;;  %v1806_v22 = vld [vmem:[%s1926_s10 + $0x2b8] ss:$28 sps:$4 sm:$0xff]   ;;  %v1784_v23 = vld [vmem:[%s1926_s10 + $0x80] ss:$28 sps:$4 sm:$0xff]   ;;  %v1790_v24 = vld [vmem:[%s1926_s10 + $0x4c] ss:$28 sps:$4 sm:$0xff]  }
  0x44   : > { %1056 = vmatprep.subr.bf16.mxu1 %v1733_v36  ;;  %v1807_v25 = vld [vmem:[%s1926_s10 + $0xf8] ss:$28 sps:$4 sm:$0xff]   ;;  %v1811_v26 = vld [vmem:[%s1926_s10 + $0x280] ss:$28 sps:$4 sm:$0xff]   ;;  %v1788_v27 = vld [vmem:[%s1926_s10 + $0x48] ss:$28 sps:$4 sm:$0xff]  }
  0x45   : > { %1014 = vmatpush1.bf16.msra.mxu0 %v1699_v29  ;;  %v1795_v28 = vld [vmem:[%s1926_s10 + $0x14] ss:$28 sps:$4 sm:$0xff]   ;;  %v1812_v29 = vld [vmem:[%s1926_s10 + $0xc0] ss:$28 sps:$4 sm:$0xff]  }
  0x46   : > { %1015 = vmatprep.subr.bf16.mxu0 %v1701_v30  ;;  %v1816_v30 = vld [vmem:[%s1926_s10 + $0x248] ss:$28 sps:$4 sm:$0xff]   ;;  %v1793_v31 = vld [vmem:[%s1926_s10 + $0x10] ss:$28 sps:$4 sm:$0xff]   ;;  %v1800_v32 = vld [vmem:[%s1926_s10 + $0x35c] ss:$28 sps:$4 sm:$0xff]  }
  0x47   : > { %1057 = vmatpush1.bf16.msra.mxu1 %v1736_v40  ;;  %v1798_v35 = vld [vmem:[%s1926_s10 + $0x358] ss:$28 sps:$4 sm:$0xff]   ;;  %v1805_v36 = vld [vmem:[%s1926_s10 + $0x324] ss:$28 sps:$4 sm:$0xff]   ;;  %v1810_v40 = vld [vmem:[%s1926_s10 + $0x2ec] ss:$28 sps:$4 sm:$0xff]  }
  0x48   : > { %1058 = vmatprep.subr.bf16.mxu1 %v1739_v41  ;;  %v1827_v41 = vld [vmem:[%s1926_s10 + $0x18] ss:$28 sps:$4 sm:$0xff]  }
  0x49   : > { %1016 = vmatpush2.bf16.msra.mxu0 %v1705_v33  ;;  %v1817_v33 = vld [vmem:[%s1926_s10 + $0x88] ss:$28 sps:$4 sm:$0xff]  }
  0x4a   : > { %1017 = vmatprep.subr.bf16.mxu0 %v1707_v34  ;;  %v1821_v34 = vld [vmem:[%s1926_s10 + $0x210] ss:$28 sps:$4 sm:$0xff]  }
  0x4b   : > { %1059 = vmatpush2.bf16.msra.mxu1 %v1742_v44  ;;  %v1813_v44 = vld [vmem:[%s1926_s10 + $0x2b0] ss:$28 sps:$4 sm:$0xff]  }
  0x4c   : > { %1060 = vmatprep.subr.bf16.mxu1 %v1745_v45  ;;  %v1820_v45 = vld [vmem:[%s1926_s10 + $0x27c] ss:$28 sps:$4 sm:$0xff]  }
  0x4d   : > { %1018 = vmatpush2.bf16.msra.mxu0 %v1711_v37  ;;  %v1822_v37 = vld [vmem:[%s1926_s10 + $0x50] ss:$28 sps:$4 sm:$0xff]  }
  0x4e   : > { %1019 = vmatprep.subr.bf16.mxu0 %v1713_v38  ;;  %v1826_v38 = vld [vmem:[%s1926_s10 + $0x1d8] ss:$28 sps:$4 sm:$0xff]  }
  0x4f   : > { %1061 = vmatpush2.bf16.msra.mxu1 %v1748_v48  ;;  %v1823_v48 = vld [vmem:[%s1926_s10 + $0x240] ss:$28 sps:$4 sm:$0xff]  }
  0x50   : > { %1062 = vmatprep.subr.bf16.mxu1 %v1752_v49  ;;  %v1830_v49 = vld [vmem:[%s1926_s10 + $0x20c] ss:$28 sps:$4 sm:$0xff]  }
  0x51   : > { %1020 = vmatpush2.bf16.msra.mxu0 %v1717_v42  ;;  %v1808_v42 = vld [vmem:[%s1926_s10 + $0x2e8] ss:$28 sps:$4 sm:$0xff]  }
  0x52   : > { %1021 = vmatprep.subr.bf16.mxu0 %v1719_v43  ;;  %v1815_v43 = vld [vmem:[%s1926_s10 + $0x2b4] ss:$28 sps:$4 sm:$0xff]  }
  0x53   : > { %1063 = vmatpush2.bf16.msra.mxu1 %v1757_v52  ;;  %v1831_v52 = vld [vmem:[%s1926_s10 + $0x1d0] ss:$28 sps:$4 sm:$0xff]  }
  0x54   : > { %1064 = vmatprep.subr.bf16.mxu1 %v1758_v53  ;;  %v269_v53 = vld [vmem:[#allocation2] sm:$0xff] }
  0x55   : > { %1022 = vmatpush2.bf16.msra.mxu0 %v1723_v46  ;;  %v1818_v46 = vld [vmem:[%s1926_s10 + $0x278] ss:$28 sps:$4 sm:$0xff]  }
  0x56   : > { %1023 = vmatprep.subr.bf16.mxu0 %v1725_v47  ;;  %v1825_v47 = vld [vmem:[%s1926_s10 + $0x244] ss:$28 sps:$4 sm:$0xff]  }
  0x57   : > { %1065 = vmatpush2.bf16.msra.mxu1 %v1763_v56 }
  0x58   : > { %1066 = vmatprep.subr.bf16.mxu1 %v1764_v57 }
  0x59   : > { %1024 = vmatpush2.bf16.msra.mxu0 %v1729_v50  ;;  %v1828_v50 = vld [vmem:[%s1926_s10 + $0x208] ss:$28 sps:$4 sm:$0xff]  }
  0x5a   : > { %1025 = vmatprep.subr.bf16.mxu0 %v1731_v51  ;;  %v1833_v51 = vld [vmem:[%s1926_s10 + $0x1d4] ss:$28 sps:$4 sm:$0xff]  }
  0x5b   : > { %1067 = vmatpush2.bf16.msra.mxu1 %v1769_v60 }
  0x5c   : > { %1068 = vmatprep.subr.bf16.mxu1 %v1770_v61  ;;  %v277_v61 = vld [vmem:[#allocation2 + $0x40] sm:$0xff] }
  0x5d   : > { %1026 = vmatpush2.bf16.msra.mxu0 %v1735_v54 }
  0x5e   : > { %1027 = vmatprep.subr.bf16.mxu0 %v1737_v55  ;;  %v270_v55 = vld [vmem:[#allocation2 + $0x8] sm:$0xff] }
  0x5f   : > { %1069 = vmatpush2.bf16.msra.mxu1 %v1775_v1 }
  0x60   : > { %1070 = vmatprep.subr.bf16.mxu1 %v1776_v2  ;;  %v271_v2 = vld [vmem:[#allocation2 + $0x10] sm:$0xff] }
  0x61   : > { %1028 = vmatpush2.bf16.msra.mxu0 %v1741_v58  ;;  %v276_v58 = vld [vmem:[#allocation2 + $0x38] sm:$0xff] }
  0x62   : > { %1029 = vmatprep.subr.bf16.mxu0 %v1743_v59 }
  0x63   : > { %1071 = vmatpush2.bf16.msra.mxu1 %v1781_v5 }
  0x64   : > { %1072 = vmatprep.subr.bf16.mxu1 %v1782_v6  ;;  %v278_v6 = vld [vmem:[#allocation2 + $0x48] sm:$0xff] }
  0x65   : > { %1030 = vmatpush2.bf16.msra.mxu0 %v1747_v62 }
  0x66   : > { %1085 = vmatprep.subr.bf16.mxu0 %v1756_v63 }
  0x67   : > { %1073 = vmatpush2.bf16.msra.mxu1 %v1787_v9  ;;  %v279_v9 = vld [vmem:[#allocation2 + $0x50] sm:$0xff] }
  0x68   : > { %1032 = vmatmul.mubr.bf16.vlgmr.msra.gmra.mxu0 %v1998_v0  ;;  %1622 = vmatprep.subr.bf16.mxu1 %v1791_v10 }
  0x69   : > { %1086 = vmatpush1.bf16.msra.mxu0 %v1754_v3  ;;  %1117 = vmatprep.mubr.bf16.mxu0 %v1968_v39 }
  0x6a   : > { %1087 = vmatprep.subr.bf16.mxu0 %v1762_v4  ;;  %1075 = vmatmul.mubr.bf16.vlgmr.msra.gmra.mxu1 %v1998_v0  ;;  %v272_v4 = vld [vmem:[#allocation2 + $0x18] sm:$0xff] }
  0x6b   : > { %1623 = vmatpush3.bf16.msra.mxu1 %v1792_v13  ;;  %1160 = vmatprep.mubr.bf16.mxu1 %v1968_v39  ;;  %v1803_v39 = vld [vmem:[%s1926_s10 + $0x320] ss:$28 sps:$4 sm:$0xff]  }
  0x6c   : > { %1624 = vmatprep.subr.bf16.mxu1 %v1796_v14  ;;  %v275_v14 = vld [vmem:[#allocation2 + $0x30] sm:$0xff] }
  0x6d   : > { %1088 = vmatpush1.bf16.msra.mxu0 %v1760_v7 }
  0x6e   : > { %1089 = vmatprep.subr.bf16.mxu0 %v1768_v8 }
  0x6f   : > { %1625 = vmatpush3.bf16.msra.mxu1 %v1797_v17 }
  0x70   : > { %1626 = vmatprep.subr.bf16.mxu1 %v1801_v18 }
  0x71   : > { %1090 = vmatpush1.bf16.msra.mxu0 %v1766_v11 }
  0x72   : > { %1091 = vmatprep.subr.bf16.mxu0 %v1774_v12 }
  0x73   : > { %1627 = vmatpush3.bf16.msra.mxu1 %v1802_v21 }
  0x74   : > { %1628 = vmatprep.subr.bf16.mxu1 %v1806_v22 }
  0x75   : > { %1092 = vmatpush1.bf16.msra.mxu0 %v1772_v15 }
  0x76   : > { %1093 = vmatprep.subr.bf16.mxu0 %v1780_v16 }
  0x77   : > { %1629 = vmatpush3.bf16.msra.mxu1 %v1807_v25  ;;  %v274_v25 = vld [vmem:[#allocation2 + $0x28] sm:$0xff] }
  0x78   : > { %1630 = vmatprep.subr.bf16.mxu1 %v1811_v26 }
  0x79   : > { %1094 = vmatpush1.bf16.msra.mxu0 %v1778_v19  ;;  %v282_v19 = vld [vmem:[#allocation2 + $0x68] sm:$0xff] }
  0x7a   : > { %1095 = vmatprep.subr.bf16.mxu0 %v1786_v20 }
  0x7b   : > { %1631 = vmatpush3.bf16.msra.mxu1 %v1812_v29 }
  0x7c   : > { %1632 = vmatprep.subr.bf16.mxu1 %v1816_v30 }
  0x7d   : > { %1096 = vmatpush1.bf16.msra.mxu0 %v1784_v23  ;;  %v273_v23 = vld [vmem:[#allocation2 + $0x20] sm:$0xff] }
  0x7e   : > { %1097 = vmatprep.subr.bf16.mxu0 %v1790_v24 }
  0x7f   : > { %1633 = vmatpush3.bf16.msra.mxu1 %v1817_v33 }
  0x80   : > { %1634 = vmatprep.subr.bf16.mxu1 %v1821_v34 }
  0x81   : > { %1098 = vmatpush1.bf16.msra.mxu0 %v1788_v27 }
  0x82   : > { %1099 = vmatprep.subr.bf16.mxu0 %v1795_v28  ;;  %v280_v28 = vld [vmem:[#allocation2 + $0x58] sm:$0xff] }
  0x83   : > { %1635 = vmatpush3.bf16.msra.mxu1 %v1822_v37 }
  0x84   : > { %1636 = vmatprep.subr.bf16.mxu1 %v1826_v38 }
  0x85   : > { %1100 = vmatpush1.bf16.msra.mxu0 %v1793_v31  ;;  %v281_v31 = vld [vmem:[#allocation2 + $0x60] sm:$0xff] }
  0x86   : > { %1101 = vmatprep.subr.bf16.mxu0 %v1800_v32 }
  0x87   : > { %1637 = vmatpush3.bf16.msra.mxu1 %v1827_v41 }
  0x89   : > { %1102 = vmatpush2.bf16.msra.mxu0 %v1798_v35 }
  0x8a   : > { %1103 = vmatprep.subr.bf16.mxu0 %v1805_v36  ;;  %1161 = vmatmul.mubr.bf16.vlgmr.msra.gmra.mxu1 %v1998_v0 }
  0x8d   : > { %1104 = vmatpush2.bf16.msra.mxu0 %v1803_v39 }
  0x8e   : > { %1105 = vmatprep.subr.bf16.mxu0 %v1810_v40 }
  0x91   : > { %1106 = vmatpush2.bf16.msra.mxu0 %v1808_v42 }
  0x92   : > { %1107 = vmatprep.subr.bf16.mxu0 %v1815_v43 }
  0x95   : > { %1108 = vmatpush2.bf16.msra.mxu0 %v1813_v44 }
  0x96   : > { %1109 = vmatprep.subr.bf16.mxu0 %v1820_v45 }
  0x99   : > { %1110 = vmatpush2.bf16.msra.mxu0 %v1818_v46 }
  0x9a   : > { %1111 = vmatprep.subr.bf16.mxu0 %v1825_v47 }
  0x9d   : > { %1112 = vmatpush2.bf16.msra.mxu0 %v1823_v48 }
  0x9e   : > { %1113 = vmatprep.subr.bf16.mxu0 %v1830_v49 }
  0xa1   : > { %1114 = vmatpush2.bf16.msra.mxu0 %v1828_v50 }
  0xa2   : > { %1115 = vmatprep.subr.bf16.mxu0 %v1833_v51 }
  0xa5   : > { %1116 = vmatpush2.bf16.msra.mxu0 %v1831_v52 }
  0xa8   : > { %1118 = vmatmul.mubr.bf16.vlgmr.msra.gmra.mxu0 %v1998_v0 }
 0x128   : > { %v1033_v54 = vpop.f32.mrf.mxu0 }
 0x129   : > { %v1169_v56 = vadd.f32 %v1033_v54, %v269_v53 }
 0x12a   : > { %v1035_v57 = vpop.f32.mrf.mxu0  ;;  %v1076_v3 = vpop.f32.mrf.mxu1 }
 0x12b   : > { %1183 = vst [vmem:[#allocation2] sm:$0xff] %v1169_v56  ;;  %v1170_v59 = vadd.f32 %v1035_v57, %v270_v55  ;;  %v1171_v0 = vadd.f32 %v1076_v3, %v271_v2 }
 0x12c   : > { %v1037_v60 = vpop.f32.mrf.mxu0  ;;  %v1078_v5 = vpop.f32.mrf.mxu1 }
 0x12d   : > { %1184 = vst [vmem:[#allocation2 + $0x8] sm:$0xff] %v1170_v59  ;;  %v1176_v62 = vadd.f32 %v1037_v60, %v276_v58  ;;  %1185 = vst [vmem:[#allocation2 + $0x10] sm:$0xff] %v1171_v0  ;;  %v1172_v7 = vadd.f32 %v1078_v5, %v272_v4 }
 0x12e   : > { %v1039_v63 = vpop.f32.mrf.mxu0  ;;  %v1080_v8 = vpop.f32.mrf.mxu1 }
 0x12f   : > { %1191 = vst [vmem:[#allocation2 + $0x38] sm:$0xff] %v1176_v62  ;;  %v1177_v1 = vadd.f32 %v1039_v63, %v277_v61  ;;  %1186 = vst [vmem:[#allocation2 + $0x18] sm:$0xff] %v1172_v7  ;;  %v1178_v10 = vadd.f32 %v1080_v8, %v278_v6 }
 0x130   : > { %v1082_v11 = vpop.f32.mrf.mxu1 }
 0x131   : > { %1192 = vst [vmem:[#allocation2 + $0x40] sm:$0xff] %v1177_v1  ;;  %1193 = vst [vmem:[#allocation2 + $0x48] sm:$0xff] %v1178_v10  ;;  %v1179_v12 = vadd.f32 %v1082_v11, %v279_v9 }
 0x133   : > { %1194 = vst [vmem:[#allocation2 + $0x50] sm:$0xff] %v1179_v12 }
 0x14a   : > { %v1638_v13 = vpop.f32.mrf.mxu1 }
 0x14c   : > { %v1639_v15 = vpop.f32.mrf.mxu1 }
 0x14d   : > { %v1640_v16 = vadd.f32 %v1639_v15, %v1638_v13 }
 0x14e   : > { %v1641_v17 = vpop.f32.mrf.mxu1 }
 0x14f   : > { %v1175_v18 = vadd.f32 %v1640_v16, %v275_v14 }
 0x150   : > { %v1642_v20 = vpop.f32.mrf.mxu1 }
 0x151   : > { %1190 = vst.msk [vmem:[#allocation2 + $0x30] sm:$0xff] %vm1189_vm1, %v1175_v18  ;;  %v1643_v21 = vadd.f32 %v1642_v20, %v1641_v17 }
 0x153   : > { %v1182_v22 = vadd.f32 %v1643_v21, %v282_v19 }
 0x155   : > { %1197 = vst.msk [vmem:[#allocation2 + $0x68] sm:$0xff] %vm1189_vm1, %v1182_v22 }
 0x168   : > { %v1119_v24 = vpop.f32.mrf.mxu0 }
 0x169   : > { %v1173_v26 = vadd.f32 %v1119_v24, %v273_v23 }
 0x16a   : > { %v1121_v27 = vpop.f32.mrf.mxu0 }
 0x16b   : > { %1187 = vst [vmem:[#allocation2 + $0x20] sm:$0xff] %v1173_v26  ;;  %v1174_v29 = vadd.f32 %v1121_v27, %v274_v25 }
 0x16c   : > { %v1123_v30 = vpop.f32.mrf.mxu0 }
 0x16d   : > { %1188 = vst [vmem:[#allocation2 + $0x28] sm:$0xff] %v1174_v29  ;;  %v1180_v32 = vadd.f32 %v1123_v30, %v280_v28  ;;  %1201 = sbr.rel (%p1602_p10) target bundleno = 697 (0x2b9), region = 82 }
 0x16e   : > { %v1125_v33 = vpop.f32.mrf.mxu0 }
 0x16f   : > { %1195 = vst [vmem:[#allocation2 + $0x58] sm:$0xff] %v1180_v32  ;;  %v1181_v34 = vadd.f32 %v1125_v33, %v281_v31 }
 0x171   : > { %1196 = vst [vmem:[#allocation2 + $0x60] sm:$0xff] %v1181_v34 }
 0x172   : > { %v2061_v35 = vld [vmem:[#allocation2] sm:$0xff]  ;;  %v2063_v36 = vld [vmem:[#allocation2 + $0x8] sm:$0xff]  ;;  %v2065_v37 = vld [vmem:[#allocation2 + $0x10] sm:$0xff]  ;;  %v1865_v27 = vmov 0   ;;  %vm1425_vm2 = vcmask 257024  }
 0x173   : > { %v2067_v38 = vld [vmem:[#allocation2 + $0x18] sm:$0xff]  ;;  %v1216_v39 = vadd.f32 %v2063_v36, %v2061_v35  ;;  %v1236_v40 = vmul.f32 %v2061_v35, %v2061_v35  ;;  %v1237_v41 = vmul.f32 %v2063_v36, %v2063_v36  ;;  %v1238_v42 = vmul.f32 %v2065_v37, %v2065_v37  ;;  %v2077_v43 = vld [vmem:[#allocation2 + $0x20] sm:$0xff]  ;;  %v2085_v47 = vld [vmem:[#allocation2 + $0x30] sm:$0xff]  ;;  %1834 = vset.pattern.permute.xlu0 %v1865_v27 }
 0x174   : > { %v2079_v44 = vld [vmem:[#allocation2 + $0x38] sm:$0xff]  ;;  %v2081_v45 = vld [vmem:[#allocation2 + $0x40] sm:$0xff]  ;;  %v2083_v46 = vld [vmem:[#allocation2 + $0x28] sm:$0xff]  ;;  %v1239_v49 = vmul.f32 %v2067_v38, %v2067_v38  ;;  %v1240_v57 = vmul.f32 %v2077_v43, %v2077_v43  ;;  %v1242_v61 = vmul.f32 %v2085_v47, %v2085_v47  ;;  %v1221_v5 = vsel %vm1189_vm1, %v2085_v47, 0.0  ;;  %1835 = vset.pattern.permute.xlu1 %v1865_v27 }
 0x175   : > { %v1217_v48 = vadd.f32 %v1216_v39, %v2065_v37  ;;  %v1250_v50 = vadd.f32 %v1237_v41, %v1236_v40  ;;  %v2090_v51 = vld [vmem:[#allocation2 + $0x48] sm:$0xff]  ;;  %v2092_v52 = vld [vmem:[#allocation2 + $0x50] sm:$0xff]  ;;  %v1225_v53 = vadd.f32 %v2081_v45, %v2079_v44  ;;  %v1243_v54 = vmul.f32 %v2079_v44, %v2079_v44 }
 0x176   : > { %v1244_v55 = vmul.f32 %v2081_v45, %v2081_v45  ;;  %v1245_v59 = vmul.f32 %v2090_v51, %v2090_v51  ;;  %v1241_v60 = vmul.f32 %v2083_v46, %v2083_v46  ;;  %v2109_v62 = vld [vmem:[#allocation2 + $0x58] sm:$0xff]  ;;  %v2113_v3 = vld [vmem:[#allocation2 + $0x68] sm:$0xff]  ;;  %v1246_v4 = vmul.f32 %v2092_v52, %v2092_v52 }
 0x177   : > { %v1218_v56 = vadd.f32 %v1217_v48, %v2067_v38  ;;  %v1251_v58 = vadd.f32 %v1250_v50, %v1238_v42  ;;  %v1226_v63 = vadd.f32 %v1225_v53, %v2090_v51  ;;  %v1247_v10 = vmul.f32 %v2109_v62, %v2109_v62  ;;  %v1274_v53 = vld [vmem:[%s2206_s2] sm:$0xff] }
 0x178   : > { %v1259_v0 = vadd.f32 %v1244_v55, %v1243_v54  ;;  %v2119_v6 = vld [vmem:[#allocation2 + $0x60] sm:$0xff]  ;;  %v1255_v12 = vsel %vm1189_vm1, %v1242_v61, 0.0  ;;  %v1230_v14 = vsel %vm1189_vm1, %v2113_v3, 0.0  ;;  %v1249_v15 = vmul.f32 %v2113_v3, %v2113_v3 }
 0x179   : > { %v1219_v1 = vadd.f32 %v1218_v56, %v2077_v43  ;;  %v1252_v2 = vadd.f32 %v1251_v58, %v1239_v49  ;;  %v1227_v7 = vadd.f32 %v1226_v63, %v2092_v52  ;;  %v1248_v18 = vmul.f32 %v2119_v6, %v2119_v6  ;;  %v1275_v56 = vld [vmem:[%s2206_s2 + $0x8] sm:$0xff] }
 0x17a   : > { %v1260_v11 = vadd.f32 %v1259_v0, %v1245_v59  ;;  %v1264_v24 = vsel %vm1189_vm1, %v1249_v15, 0.0 }
 0x17b   : > { %v1220_v8 = vadd.f32 %v1219_v1, %v2083_v46  ;;  %v1253_v9 = vadd.f32 %v1252_v2, %v1240_v57  ;;  %v1228_v13 = vadd.f32 %v1227_v7, %v2109_v62  ;;  %v1283_v1 = vld [vmem:[%s2207_s3 + $0x8] sm:$0xff] }
 0x17c   : > { %v1261_v19 = vadd.f32 %v1260_v11, %v1246_v4 }
 0x17d   : > { %v1222_v16 = vadd.f32 %v1221_v5, %v1220_v8  ;;  %v1254_v17 = vadd.f32 %v1253_v9, %v1241_v60  ;;  %v1229_v20 = vadd.f32 %v1228_v13, %v2119_v6  ;;  %v1282_v60 = vld [vmem:[%s2207_s3] sm:$0xff] }
 0x17e   : > { %v1262_v22 = vadd.f32 %v1261_v19, %v1247_v10 }
 0x17f   : > { %1223 = vadd.xlane.f32.xlu0 %v1222_v16  ;;  %v1256_v21 = vadd.f32 %v1255_v12, %v1254_v17  ;;  %v1231_v23 = vadd.f32 %v1230_v14, %v1229_v20 }
 0x180   : > { %v1263_v25 = vadd.f32 %v1262_v22, %v1248_v18 }
 0x181   : > { %1257 = vadd.xlane.f32.xlu1 %v1256_v21 }
 0x182   : > { %v1265_v26 = vadd.f32 %v1264_v24, %v1263_v25 }
 0x183   : > { %1232 = vadd.xlane.f32.xlu0 %v1231_v23 }
 0x185   : > { %1266 = vadd.xlane.f32.xlu1 %v1265_v26 }
 0x208   : > { %v1224_v28 = vpop.xlane.xlu0 %1223 }
 0x209   : > { %v1234_v29 = vmul.f32 0.00125, %v1224_v28 }
 0x20a   : > { %v1258_v30 = vpop.xlane.xlu1 %1257 }
 0x20b   : > { %v1270_v31 = vmul.f32 %v1234_v29, %v1234_v29  ;;  %v1268_v32 = vmul.f32 0.00125, %v1258_v30 }
 0x20c   : > { %v1233_v33 = vpop.xlane.xlu0 %1232 }
 0x20d   : > { %v1272_v34 = vsub.f32 %v1268_v32, %v1270_v31  ;;  %v1235_v39 = vmul.f32 0.00125, %v1233_v33 }
 0x20e   : > { %v1267_v40 = vpop.xlane.xlu1 %1266 }
 0x20f   : > { %v1276_v41 = vadd.f32 1e-05, %v1272_v34  ;;  %v1271_v42 = vmul.f32 %v1235_v39, %v1235_v39  ;;  %v1269_v48 = vmul.f32 0.00125, %v1267_v40 }
 0x211   : > { %1836 = vrsqrt.f32 %v1276_v41  ;;  %v1273_v49 = vsub.f32 %v1269_v48, %v1271_v42 }
 0x213   : > { %v1277_v50 = vadd.f32 1e-05, %v1273_v49 }
 0x215   : > { %1838 = vrsqrt.f32 %v1277_v50 }
 0x21e   : > { %v1837_v54 = vpop.eup %1836 }
 0x21f   : > { %v1280_v55 = vmul.f32 %v1837_v54, %v1274_v53 }
 0x221   : > { %1290 = vperm.xlu0 %1834, %v1280_v55   ;;  %v1284_v59 = vmul.f32 %v1280_v55, %v1234_v29 }
 0x222   : > { %v1839_v57 = vpop.eup %1838 }
 0x223   : > { %v1281_v58 = vmul.f32 %v1839_v57, %v1275_v56  ;;  %v1286_v61 = vsub.f32 %v1282_v60, %v1284_v59 }
 0x225   : > { %1295 = vperm.xlu1 %1835, %v1281_v58   ;;  %v1285_v63 = vmul.f32 %v1281_v58, %v1235_v39 }
 0x227   : > { %v1287_v2 = vsub.f32 %v1283_v1, %v1285_v63 }
 0x229   : > { %1314 = vperm.xlu1 %1835, %v1286_v61  }
 0x22d   : > { %1319 = vperm.xlu1 %1835, %v1287_v2  }
 0x29c   : > { %v1291_v4 = vpop.permute.xlu0 %1290 }
 0x29d   : > { %v1298_v5 = vmul.f32 %v1291_v4, %v2061_v35  ;;  %v1299_v7 = vmul.f32 %v1291_v4, %v2063_v36  ;;  %v1300_v8 = vmul.f32 %v1291_v4, %v2065_v37  ;;  %v1301_v9 = vmul.f32 %v1291_v4, %v2067_v38 }
 0x29e   : > { %v1302_v10 = vmul.f32 %v1291_v4, %v2077_v43  ;;  %v1303_v11 = vmul.f32 %v1291_v4, %v2083_v46  ;;  %v1304_v12 = vmul.f32 %v1291_v4, %v2085_v47 }
 0x2a0   : > { %v1296_v0 = vpop.permute.xlu1 %1295 }
 0x2a1   : > { %v1305_v13 = vmul.f32 %v1296_v0, %v2079_v44  ;;  %v1306_v14 = vmul.f32 %v1296_v0, %v2081_v45  ;;  %v1307_v16 = vmul.f32 %v1296_v0, %v2090_v51  ;;  %v1308_v35 = vmul.f32 %v1296_v0, %v2092_v52 }
 0x2a2   : > { %v1309_v36 = vmul.f32 %v1296_v0, %v2109_v62  ;;  %v1310_v37 = vmul.f32 %v1296_v0, %v2119_v6  ;;  %v1311_v44 = vmul.f32 %v1296_v0, %v2113_v3 }
 0x2a4   : > { %v1315_v15 = vpop.permute.xlu1 %1314 }
 0x2a5   : > { %v1322_v38 = vadd.f32 %v1315_v15, %v1298_v5  ;;  %v1323_v43 = vadd.f32 %v1315_v15, %v1299_v7  ;;  %v1324_v17 = vadd.f32 %v1315_v15, %v1300_v8  ;;  %v1325_v46 = vadd.f32 %v1315_v15, %v1301_v9 }
 0x2a6   : > { %v1326_v18 = vadd.f32 %v1315_v15, %v1302_v10  ;;  %v1327_v47 = vadd.f32 %v1315_v15, %v1303_v11  ;;  %v1328_v19 = vadd.f32 %v1315_v15, %v1304_v12 }
 0x2a7   : > { %vm1336_vm3 = vcmp.ge.f32.partialorder %v1322_v38, 0.0  ;;  %vm1337_vm4 = vcmp.ge.f32.partialorder %v1323_v43, 0.0  ;;  %vm1338_vm5 = vcmp.ge.f32.partialorder %v1324_v17, 0.0  ;;  %vm1339_vm6 = vcmp.ge.f32.partialorder %v1325_v46, 0.0 }
 0x2a8   : > { %vm1340_vm7 = vcmp.ge.f32.partialorder %v1326_v18, 0.0  ;;  %vm1341_vm8 = vcmp.ge.f32.partialorder %v1327_v47, 0.0  ;;  %vm1342_vm9 = vcmp.ge.f32.partialorder %v1328_v19, 0.0  ;;  %v1350_v45 = vmul.f32 0.2, %v1322_v38  ;;  %v1320_v51 = vpop.permute.xlu1 %1319 }
 0x2a9   : > { %v1351_v52 = vmul.f32 0.2, %v1323_v43  ;;  %v1352_v62 = vmul.f32 0.2, %v1324_v17  ;;  %v1353_v6 = vmul.f32 0.2, %v1325_v46  ;;  %v1329_v20 = vadd.f32 %v1320_v51, %v1305_v13 }
 0x2aa   : > { %v1354_v21 = vmul.f32 0.2, %v1326_v18  ;;  %v1355_v22 = vmul.f32 0.2, %v1327_v47  ;;  %v1356_v23 = vmul.f32 0.2, %v1328_v19  ;;  %v1364_v24 = vsel %vm1336_vm3, %v1322_v38, %v1350_v45 }
 0x2ab   : > { %v1365_v3 = vsel %vm1337_vm4, %v1323_v43, %v1351_v52  ;;  %v1366_v25 = vsel %vm1338_vm5, %v1324_v17, %v1352_v62  ;;  %v1367_v26 = vsel %vm1339_vm6, %v1325_v46, %v1353_v6  ;;  %v1330_v27 = vadd.f32 %v1320_v51, %v1306_v14 }
 0x2ac   : > { %v1368_v28 = vsel %vm1340_vm7, %v1326_v18, %v1354_v21  ;;  %v1369_v29 = vsel %vm1341_vm8, %v1327_v47, %v1355_v22  ;;  %v1370_v30 = vsel %vm1342_vm9, %v1328_v19, %v1356_v23  ;;  %v1614_v31 = vpack.c.bf16 %v1365_v3, %v1364_v24 }
 0x2ad   : > { %v1615_v32 = vpack.c.bf16 %v1367_v26, %v1366_v25  ;;  %v1616_v33 = vpack.c.bf16 %v1369_v29, %v1368_v28  ;;  %v1617_v34 = vpack.c.bf16 %v1370_v30, %v1370_v30  ;;  %v1331_v39 = vadd.f32 %v1320_v51, %v1307_v16 }
 0x2ae   : > { %1422 = vst [vmem:[%s2208_s4] sm:$0xff] %v1614_v31  ;;  %v1332_v40 = vadd.f32 %v1320_v51, %v1308_v35  ;;  %v1333_v41 = vadd.f32 %v1320_v51, %v1309_v36  ;;  %v1334_v42 = vadd.f32 %v1320_v51, %v1310_v37  ;;  %v1335_v48 = vadd.f32 %v1320_v51, %v1311_v44 }
 0x2af   : > { %1423 = vst [vmem:[%s2208_s4 + $0x8] sm:$0xff] %v1615_v32  ;;  %1424 = vst [vmem:[%s2208_s4 + $0x10] sm:$0xff] %v1616_v33  ;;  %vm1343_vm10 = vcmp.ge.f32.partialorder %v1329_v20, 0.0  ;;  %vm1344_vm11 = vcmp.ge.f32.partialorder %v1330_v27, 0.0  ;;  %vm1345_vm12 = vcmp.ge.f32.partialorder %v1331_v39, 0.0 }
 0x2b0   : > { %v1357_v49 = vmul.f32 0.2, %v1329_v20  ;;  %1426 = vst.msk [vmem:[%s2208_s4 + $0x18] sm:$0xf] %vm1425_vm2, %v1617_v34  ;;  %vm1346_vm13 = vcmp.ge.f32.partialorder %v1332_v40, 0.0  ;;  %vm1347_vm14 = vcmp.ge.f32.partialorder %v1333_v41, 0.0 }
 0x2b1   : > { %vm1348_vm15 = vcmp.ge.f32.partialorder %v1334_v42, 0.0  ;;  %vm1349_vm0 = vcmp.ge.f32.partialorder %v1335_v48, 0.0  ;;  %v1358_v50 = vmul.f32 0.2, %v1330_v27  ;;  %v1359_v53 = vmul.f32 0.2, %v1331_v39 }
 0x2b2   : > { %v1360_v54 = vmul.f32 0.2, %v1332_v40  ;;  %v1371_v55 = vsel %vm1343_vm10, %v1329_v20, %v1357_v49  ;;  %v1361_v56 = vmul.f32 0.2, %v1333_v41  ;;  %v1362_v57 = vmul.f32 0.2, %v1334_v42 }
 0x2b3   : > { %v1363_v58 = vmul.f32 0.2, %v1335_v48  ;;  %v1372_v59 = vsel %vm1344_vm11, %v1330_v27, %v1358_v50  ;;  %v1373_v60 = vsel %vm1345_vm12, %v1331_v39, %v1359_v53 }
 0x2b4   : > { %v1374_v61 = vsel %vm1346_vm13, %v1332_v40, %v1360_v54  ;;  %v1375_v63 = vsel %vm1347_vm14, %v1333_v41, %v1361_v56  ;;  %v1376_v1 = vsel %vm1348_vm15, %v1334_v42, %v1362_v57  ;;  %v1618_v4 = vpack.c.bf16 %v1372_v59, %v1371_v55 }
 0x2b5   : > { %v1377_v2 = vsel %vm1349_vm0, %v1335_v48, %v1363_v58  ;;  %v1619_v0 = vpack.c.bf16 %v1374_v61, %v1373_v60  ;;  %v1620_v5 = vpack.c.bf16 %v1376_v1, %v1375_v63 }
 0x2b6   : > { %v1621_v7 = vpack.c.bf16 %v1377_v2, %v1377_v2  ;;  %1427 = vst [vmem:[%s2208_s4 + $0x1c] sm:$0xff] %v1618_v4 }
 0x2b7   : > { %1428 = vst [vmem:[%s2208_s4 + $0x24] sm:$0xff] %v1619_v0  ;;  %1429 = vst [vmem:[%s2208_s4 + $0x2c] sm:$0xff] %v1620_v5 }
 0x2b8   : > { %1430 = vst.msk [vmem:[%s2208_s4 + $0x34] sm:$0xf] %vm1425_vm2, %v1621_v7 }
 0x2b9 PF: > { %p11_p11 = scmp.ge.s32.totalorder %s1906_s19, 4   ;;  %s2209_s15 = smov %s1858_s16 }
 0x2ba   : > { %s2210_s16 = smov %s1913_s22  ;;  %s2211_s17 = smov %s1906_s19 }
 0x2bb   :  { %13 = sbr.rel (!%p11_p11) target bundleno = 2 (0x2), region = 116 }

// kernel: generator_forward.7
= control target key start
LH: loop header
LB: loop body
LE: loop exit
PB: predicated region body
PF: predicated region fallthrough
CT: control target
= control target key end

     0   :  { %s1085_s9 = smov 0   ;;  %s1087_s10 = smov 0   ;;  %s1344_s0 = inlined_call_operand.vmem [shape: bf16[8,256], index: 0, kind: input, shape index: {}]   ;;  %s1345_s1 = inlined_call_operand.vmem [shape: bf16[256,3584], index: 1, kind: input, shape index: {}]   ;;  %s1346_s2 = inlined_call_operand.vmem [shape: f32[8,3584], index: 2, kind: output, shape index: {}]  }
   0x1   :  { %s1089_s11 = smov 0  }
   0x2 LB: > { %s836_s12 = sadd.s32 4294967295, %s1068_s11   ;;  %s1102_s13 = sadd.s32 1, %s1068_s11   ;;  %s1068_s11 = sphi %s1089_s11, %s1349_s11   ;;  %s1064_s10 = sphi %s1087_s10, %s1348_s10   ;;  %s1060_s9 = sphi %s1085_s9, %s1347_s9  }
   0x3   : > { %s37_s14 = ssub.s32 %s1068_s11, %s1102_s13  ;;  %s40_s15 = sadd.s32 1, %s1064_s10 }
   0x4   : > { %p38_p0 = scmp.eq.s32.totalorder %s37_s14, 0  ;;  %p47_p1 = scmp.ne.s32.totalorder %s1064_s10, %s1060_s9 }
   0x5   : > { %p48_p2 = scmp.eq.s32.totalorder %s1068_s11, 0  ;;  %p839_p4 = scmp.ge.s32.totalorder %s1068_s11, 7 }
   0x6   : > { %s1111_s16 = scalar_select %p38_p0, %s1064_s10, %s40_s15  }
   0x7   : > { %p49_p3 = por %p48_p2, %p47_p1  ;;  %102 = sbr.rel (%p839_p4) target bundleno = 48 (0x30), region = 20 }
   0xc   : > { %105 = sbr.rel (!%p49_p3) target bundleno = 48 (0x30), region = 24  ;;  %s107_s17 = sand.u32 (%p49_p3), 1, %s1064_s10  }
   0xd   : > { %s915_s18 = sshll.u32 (%p49_p3), %s1068_s11, 4  ;;  %s840_s19 = sshll.u32 (%p49_p3), %s107_s17, 9 }
   0xe   : > { %s1119_s22 = scalar_lea.vmem (%p49_p3), %s1345_s1, %s915_s18  ;;  %s1124_s23 = scalar_lea.vmem (%p49_p3), [#allocation2], %s840_s19 }
   0xf   : > { %v125_v0 = vld [vmem:[%s1119_s22] sm:$0xff] (%p49_p3)  ;;  %v127_v1 = vld [vmem:[%s1119_s22 + $0x8] sm:$0xff] (%p49_p3)  ;;  %v129_v2 = vld [vmem:[%s1119_s22 + $0x70] sm:$0xff] (%p49_p3) }
  0x10   : > { %126 = vst [vmem:[%s1124_s23] sm:$0xff] (%p49_p3), %v125_v0  ;;  %128 = vst [vmem:[%s1124_s23 + $0x8] sm:$0xff] (%p49_p3), %v127_v1  ;;  %v131_v3 = vld [vmem:[%s1119_s22 + $0x78] sm:$0xff] (%p49_p3)  ;;  %v133_v4 = vld [vmem:[%s1119_s22 + $0xe0] sm:$0xff] (%p49_p3) }
  0x11   : > { %130 = vst [vmem:[%s1124_s23 + $0x10] sm:$0xff] %v129_v2  ;;  %v135_v5 = vld [vmem:[%s1119_s22 + $0xe8] sm:$0xff]  ;;  %132 = vst [vmem:[%s1124_s23 + $0x18] sm:$0xff] %v131_v3  ;;  %v137_v6 = vld [vmem:[%s1119_s22 + $0x150] sm:$0xff] }
  0x12   : > { %134 = vst [vmem:[%s1124_s23 + $0x20] sm:$0xff] %v133_v4  ;;  %136 = vst [vmem:[%s1124_s23 + $0x28] sm:$0xff] %v135_v5  ;;  %v139_v7 = vld [vmem:[%s1119_s22 + $0x158] sm:$0xff]  ;;  %v141_v8 = vld [vmem:[%s1119_s22 + $0x1c0] sm:$0xff] }
  0x13   : > { %138 = vst [vmem:[%s1124_s23 + $0x30] sm:$0xff] %v137_v6  ;;  %140 = vst [vmem:[%s1124_s23 + $0x38] sm:$0xff] %v139_v7  ;;  %v143_v9 = vld [vmem:[%s1119_s22 + $0x1c8] sm:$0xff]  ;;  %v145_v10 = vld [vmem:[%s1119_s22 + $0x230] sm:$0xff] }
  0x14   : > { %142 = vst [vmem:[%s1124_s23 + $0x40] sm:$0xff] %v141_v8  ;;  %v147_v11 = vld [vmem:[%s1119_s22 + $0x238] sm:$0xff]  ;;  %144 = vst [vmem:[%s1124_s23 + $0x48] sm:$0xff] %v143_v9  ;;  %v149_v12 = vld [vmem:[%s1119_s22 + $0x2a0] sm:$0xff] }
  0x15   : > { %146 = vst [vmem:[%s1124_s23 + $0x50] sm:$0xff] %v145_v10  ;;  %148 = vst [vmem:[%s1124_s23 + $0x58] sm:$0xff] %v147_v11  ;;  %v151_v13 = vld [vmem:[%s1119_s22 + $0x2a8] sm:$0xff]  ;;  %v153_v14 = vld [vmem:[%s1119_s22 + $0x310] sm:$0xff] }
  0x16   : > { %150 = vst [vmem:[%s1124_s23 + $0x60] sm:$0xff] %v149_v12  ;;  %152 = vst [vmem:[%s1124_s23 + $0x68] sm:$0xff] %v151_v13  ;;  %v155_v15 = vld [vmem:[%s1119_s22 + $0x318] sm:$0xff]  ;;  %v157_v16 = vld [vmem:[%s1119_s22 + $0x380] sm:$0xff] }
  0x17   : > { %154 = vst [vmem:[%s1124_s23 + $0x70] sm:$0xff] %v153_v14  ;;  %v159_v17 = vld [vmem:[%s1119_s22 + $0x388] sm:$0xff]  ;;  %156 = vst [vmem:[%s1124_s23 + $0x78] sm:$0xff] %v155_v15  ;;  %v161_v18 = vld [vmem:[%s1119_s22 + $0x3f0] sm:$0xff] }
  0x18   : > { %158 = vst [vmem:[%s1124_s23 + $0x80] sm:$0xff] %v157_v16  ;;  %160 = vst [vmem:[%s1124_s23 + $0x88] sm:$0xff] %v159_v17  ;;  %v163_v19 = vld [vmem:[%s1119_s22 + $0x3f8] sm:$0xff]  ;;  %v165_v20 = vld [vmem:[%s1119_s22 + $0x460] sm:$0xff] }
  0x19   : > { %162 = vst [vmem:[%s1124_s23 + $0x90] sm:$0xff] %v161_v18  ;;  %164 = vst [vmem:[%s1124_s23 + $0x98] sm:$0xff] %v163_v19  ;;  %v167_v21 = vld [vmem:[%s1119_s22 + $0x468] sm:$0xff]  ;;  %v169_v22 = vld [vmem:[%s1119_s22 + $0x4d0] sm:$0xff] }
  0x1a   : > { %166 = vst [vmem:[%s1124_s23 + $0xa0] sm:$0xff] %v165_v20  ;;  %v171_v23 = vld [vmem:[%s1119_s22 + $0x4d8] sm:$0xff]  ;;  %168 = vst [vmem:[%s1124_s23 + $0xa8] sm:$0xff] %v167_v21  ;;  %v173_v24 = vld [vmem:[%s1119_s22 + $0x540] sm:$0xff] }
  0x1b   : > { %170 = vst [vmem:[%s1124_s23 + $0xb0] sm:$0xff] %v169_v22  ;;  %172 = vst [vmem:[%s1124_s23 + $0xb8] sm:$0xff] %v171_v23  ;;  %v175_v25 = vld [vmem:[%s1119_s22 + $0x548] sm:$0xff]  ;;  %v177_v26 = vld [vmem:[%s1119_s22 + $0x5b0] sm:$0xff] }
  0x1c   : > { %174 = vst [vmem:[%s1124_s23 + $0xc0] sm:$0xff] %v173_v24  ;;  %176 = vst [vmem:[%s1124_s23 + $0xc8] sm:$0xff] %v175_v25  ;;  %v179_v27 = vld [vmem:[%s1119_s22 + $0x5b8] sm:$0xff]  ;;  %v181_v28 = vld [vmem:[%s1119_s22 + $0x620] sm:$0xff] }
  0x1d   : > { %178 = vst [vmem:[%s1124_s23 + $0xd0] sm:$0xff] %v177_v26  ;;  %v183_v29 = vld [vmem:[%s1119_s22 + $0x628] sm:$0xff]  ;;  %180 = vst [vmem:[%s1124_s23 + $0xd8] sm:$0xff] %v179_v27  ;;  %v185_v30 = vld [vmem:[%s1119_s22 + $0x690] sm:$0xff] }
  0x1e   : > { %182 = vst [vmem:[%s1124_s23 + $0xe0] sm:$0xff] %v181_v28  ;;  %184 = vst [vmem:[%s1124_s23 + $0xe8] sm:$0xff] %v183_v29  ;;  %v187_v31 = vld [vmem:[%s1119_s22 + $0x698] sm:$0xff]  ;;  %v189_v32 = vld [vmem:[%s1119_s22 + $0x700] sm:$0xff] }
  0x1f   : > { %186 = vst [vmem:[%s1124_s23 + $0xf0] sm:$0xff] %v185_v30  ;;  %188 = vst [vmem:[%s1124_s23 + $0xf8] sm:$0xff] %v187_v31  ;;  %v191_v33 = vld [vmem:[%s1119_s22 + $0x708] sm:$0xff]  ;;  %v193_v34 = vld [vmem:[%s1119_s22 + $0x770] sm:$0xff] }
  0x20   : > { %190 = vst [vmem:[%s1124_s23 + $0x100] sm:$0xff] %v189_v32  ;;  %v195_v35 = vld [vmem:[%s1119_s22 + $0x778] sm:$0xff]  ;;  %192 = vst [vmem:[%s1124_s23 + $0x108] sm:$0xff] %v191_v33  ;;  %v197_v36 = vld [vmem:[%s1119_s22 + $0x7e0] sm:$0xff] }
  0x21   : > { %194 = vst [vmem:[%s1124_s23 + $0x110] sm:$0xff] %v193_v34  ;;  %196 = vst [vmem:[%s1124_s23 + $0x118] sm:$0xff] %v195_v35  ;;  %v199_v37 = vld [vmem:[%s1119_s22 + $0x7e8] sm:$0xff]  ;;  %v201_v38 = vld [vmem:[%s1119_s22 + $0x850] sm:$0xff] }
  0x22   : > { %198 = vst [vmem:[%s1124_s23 + $0x120] sm:$0xff] %v197_v36  ;;  %200 = vst [vmem:[%s1124_s23 + $0x128] sm:$0xff] %v199_v37  ;;  %v203_v39 = vld [vmem:[%s1119_s22 + $0x858] sm:$0xff]  ;;  %v205_v40 = vld [vmem:[%s1119_s22 + $0x8c0] sm:$0xff] }
  0x23   : > { %202 = vst [vmem:[%s1124_s23 + $0x130] sm:$0xff] %v201_v38  ;;  %v207_v41 = vld [vmem:[%s1119_s22 + $0x8c8] sm:$0xff]  ;;  %204 = vst [vmem:[%s1124_s23 + $0x138] sm:$0xff] %v203_v39  ;;  %v209_v42 = vld [vmem:[%s1119_s22 + $0x930] sm:$0xff] }
  0x24   : > { %206 = vst [vmem:[%s1124_s23 + $0x140] sm:$0xff] %v205_v40  ;;  %208 = vst [vmem:[%s1124_s23 + $0x148] sm:$0xff] %v207_v41  ;;  %v211_v43 = vld [vmem:[%s1119_s22 + $0x938] sm:$0xff]  ;;  %v213_v44 = vld [vmem:[%s1119_s22 + $0x9a0] sm:$0xff] }
  0x25   : > { %210 = vst [vmem:[%s1124_s23 + $0x150] sm:$0xff] %v209_v42  ;;  %212 = vst [vmem:[%s1124_s23 + $0x158] sm:$0xff] %v211_v43  ;;  %v215_v45 = vld [vmem:[%s1119_s22 + $0x9a8] sm:$0xff]  ;;  %v217_v46 = vld [vmem:[%s1119_s22 + $0xa10] sm:$0xff] }
  0x26   : > { %214 = vst [vmem:[%s1124_s23 + $0x160] sm:$0xff] %v213_v44  ;;  %v219_v47 = vld [vmem:[%s1119_s22 + $0xa18] sm:$0xff]  ;;  %216 = vst [vmem:[%s1124_s23 + $0x168] sm:$0xff] %v215_v45  ;;  %v221_v48 = vld [vmem:[%s1119_s22 + $0xa80] sm:$0xff] }
  0x27   : > { %218 = vst [vmem:[%s1124_s23 + $0x170] sm:$0xff] %v217_v46  ;;  %220 = vst [vmem:[%s1124_s23 + $0x178] sm:$0xff] %v219_v47  ;;  %v223_v49 = vld [vmem:[%s1119_s22 + $0xa88] sm:$0xff]  ;;  %v225_v50 = vld [vmem:[%s1119_s22 + $0xaf0] sm:$0xff] }
  0x28   : > { %222 = vst [vmem:[%s1124_s23 + $0x180] sm:$0xff] %v221_v48  ;;  %224 = vst [vmem:[%s1124_s23 + $0x188] sm:$0xff] %v223_v49  ;;  %v227_v51 = vld [vmem:[%s1119_s22 + $0xaf8] sm:$0xff]  ;;  %v229_v52 = vld [vmem:[%s1119_s22 + $0xb60] sm:$0xff] }
  0x29   : > { %226 = vst [vmem:[%s1124_s23 + $0x190] sm:$0xff] %v225_v50  ;;  %v231_v53 = vld [vmem:[%s1119_s22 + $0xb68] sm:$0xff]  ;;  %228 = vst [vmem:[%s1124_s23 + $0x198] sm:$0xff] %v227_v51  ;;  %v233_v54 = vld [vmem:[%s1119_s22 + $0xbd0] sm:$0xff] }
  0x2a   : > { %230 = vst [vmem:[%s1124_s23 + $0x1a0] sm:$0xff] %v229_v52  ;;  %232 = vst [vmem:[%s1124_s23 + $0x1a8] sm:$0xff] %v231_v53  ;;  %v235_v55 = vld [vmem:[%s1119_s22 + $0xbd8] sm:$0xff]  ;;  %v237_v56 = vld [vmem:[%s1119_s22 + $0xc40] sm:$0xff] }
  0x2b   : > { %234 = vst [vmem:[%s1124_s23 + $0x1b0] sm:$0xff] %v233_v54  ;;  %236 = vst [vmem:[%s1124_s23 + $0x1b8] sm:$0xff] %v235_v55  ;;  %v239_v57 = vld [vmem:[%s1119_s22 + $0xc48] sm:$0xff]  ;;  %v241_v58 = vld [vmem:[%s1119_s22 + $0xcb0] sm:$0xff] }
  0x2c   : > { %238 = vst [vmem:[%s1124_s23 + $0x1c0] sm:$0xff] %v237_v56  ;;  %v243_v59 = vld [vmem:[%s1119_s22 + $0xcb8] sm:$0xff]  ;;  %240 = vst [vmem:[%s1124_s23 + $0x1c8] sm:$0xff] %v239_v57  ;;  %v245_v60 = vld [vmem:[%s1119_s22 + $0xd20] sm:$0xff] }
  0x2d   : > { %242 = vst [vmem:[%s1124_s23 + $0x1d0] sm:$0xff] %v241_v58  ;;  %244 = vst [vmem:[%s1124_s23 + $0x1d8] sm:$0xff] %v243_v59  ;;  %v247_v61 = vld [vmem:[%s1119_s22 + $0xd28] sm:$0xff]  ;;  %v249_v62 = vld [vmem:[%s1119_s22 + $0xd90] sm:$0xff] }
  0x2e   : > { %246 = vst [vmem:[%s1124_s23 + $0x1e0] sm:$0xff] %v245_v60  ;;  %248 = vst [vmem:[%s1124_s23 + $0x1e8] sm:$0xff] %v247_v61  ;;  %v251_v63 = vld [vmem:[%s1119_s22 + $0xd98] sm:$0xff] }
  0x2f   : > { %250 = vst [vmem:[%s1124_s23 + $0x1f0] sm:$0xff] %v249_v62  ;;  %252 = vst [vmem:[%s1124_s23 + $0x1f8] sm:$0xff] %v251_v63 }
  0x30 PF: > { %p843_p5 = scmp.ge.s32.totalorder %s1068_s11, 1  ;;  %p257_p6 = scmp.lt.s32.totalorder %s1068_s11, 8 }
  0x32   : > { %p258_p7 = pnand %p843_p5, %p257_p6 }
  0x33   : > { %s264_s24 = sand.u32 (!%p258_p7), 1, %s1060_s9   ;;  %s845_s29 = sshll.u32 (!%p258_p7), %s836_s12, 2 }
  0x34   : > { %261 = sbr.rel (%p258_p7) target bundleno = 335 (0x14f), region = 47  ;;  %s844_s27 = sshll.u32 (!%p258_p7), %s264_s24, 9 }
  0x35   : > { %s1261_s28 = scalar_lea.vmem (!%p258_p7), [#allocation2], %s844_s27  ;;  %p287_p8 = scmp.lt.s32.totalorder (!%p258_p7), %s845_s29, 27 }
  0x39   : > { %v1257_v0 = vld [vmem:[%s1344_s0] sm:$0xff]  ;;  %v942_v3 = vld [vmem:[%s1261_s28 + $0xec] ss:$16 sps:$4 sm:$0xff]   ;;  %v945_v5 = vld [vmem:[%s1261_s28 + $0xe8] ss:$16 sps:$4 sm:$0xff]   ;;  %s1351_s29 = smov (!%p287_p8, %s845_s29), 27 }
  0x3a   : > { %v848_v1 = vcombine.high %v1257_v0, %v1257_v0  ;;  %v940_v2 = vld [vmem:[%s1261_s28 + $0xe4] ss:$16 sps:$4 sm:$0xff]   ;;  %v944_v4 = vld [vmem:[%s1261_s28 + $0xe0] ss:$16 sps:$4 sm:$0xff]   ;;  %725 = vmatprep.subr.bf16.mxu1 %v942_v3  ;;  %v948_v7 = vld [vmem:[%s1261_s28 + $0xcc] ss:$16 sps:$4 sm:$0xff]   ;;  %v847_v3 = vcombine.low %v1257_v0, %v1257_v0 }
  0x3b   : > { %684 = vmatprep.subr.bf16.mxu0 %v940_v2  ;;  %v946_v6 = vld [vmem:[%s1261_s28 + $0xc4] ss:$16 sps:$4 sm:$0xff]   ;;  %726 = vmatpush1.bf16.msra.mxu1 %v945_v5  ;;  %v950_v8 = vld [vmem:[%s1261_s28 + $0xc0] ss:$16 sps:$4 sm:$0xff]   ;;  %v951_v9 = vld [vmem:[%s1261_s28 + $0xc8] ss:$16 sps:$4 sm:$0xff]  }
  0x3c   : > { %716 = vmatprep.mubr.bf16.mxu0 %v848_v1  ;;  %757 = vmatprep.mubr.bf16.mxu1 %v848_v1  ;;  %v952_v10 = vld [vmem:[%s1261_s28 + $0xa4] ss:$16 sps:$4 sm:$0xff]   ;;  %v954_v11 = vld [vmem:[%s1261_s28 + $0xac] ss:$16 sps:$4 sm:$0xff]   ;;  %v956_v12 = vld [vmem:[%s1261_s28 + $0xa0] ss:$16 sps:$4 sm:$0xff]  }
  0x3d   : > { %685 = vmatpush1.bf16.msra.mxu0 %v944_v4  ;;  %727 = vmatprep.subr.bf16.mxu1 %v948_v7  ;;  %v957_v13 = vld [vmem:[%s1261_s28 + $0xa8] ss:$16 sps:$4 sm:$0xff]   ;;  %v958_v14 = vld [vmem:[%s1261_s28 + $0x84] ss:$16 sps:$4 sm:$0xff]   ;;  %v960_v15 = vld [vmem:[%s1261_s28 + $0x8c] ss:$16 sps:$4 sm:$0xff]  }
  0x3e   : > { %686 = vmatprep.subr.bf16.mxu0 %v946_v6  ;;  %v962_v16 = vld [vmem:[%s1261_s28 + $0x80] ss:$16 sps:$4 sm:$0xff]   ;;  %v963_v17 = vld [vmem:[%s1261_s28 + $0x88] ss:$16 sps:$4 sm:$0xff]   ;;  %v964_v18 = vld [vmem:[%s1261_s28 + $0x64] ss:$16 sps:$4 sm:$0xff]  }
  0x3f   : > { %728 = vmatpush1.bf16.msra.mxu1 %v951_v9  ;;  %v966_v19 = vld [vmem:[%s1261_s28 + $0x6c] ss:$16 sps:$4 sm:$0xff]   ;;  %v968_v20 = vld [vmem:[%s1261_s28 + $0x60] ss:$16 sps:$4 sm:$0xff]   ;;  %v969_v21 = vld [vmem:[%s1261_s28 + $0x68] ss:$16 sps:$4 sm:$0xff]  }
  0x40   : > { %729 = vmatprep.subr.bf16.mxu1 %v954_v11  ;;  %v970_v22 = vld [vmem:[%s1261_s28 + $0x44] ss:$16 sps:$4 sm:$0xff]   ;;  %v972_v23 = vld [vmem:[%s1261_s28 + $0x4c] ss:$16 sps:$4 sm:$0xff]   ;;  %v974_v24 = vld [vmem:[%s1261_s28 + $0x40] ss:$16 sps:$4 sm:$0xff]  }
  0x41   : > { %687 = vmatpush1.bf16.msra.mxu0 %v950_v8  ;;  %v975_v25 = vld [vmem:[%s1261_s28 + $0x48] ss:$16 sps:$4 sm:$0xff]   ;;  %v976_v26 = vld [vmem:[%s1261_s28 + $0x24] ss:$16 sps:$4 sm:$0xff]   ;;  %v978_v27 = vld [vmem:[%s1261_s28 + $0x2c] ss:$16 sps:$4 sm:$0xff]  }
  0x42   : > { %688 = vmatprep.subr.bf16.mxu0 %v952_v10  ;;  %v980_v28 = vld [vmem:[%s1261_s28 + $0x20] ss:$16 sps:$4 sm:$0xff]   ;;  %v981_v29 = vld [vmem:[%s1261_s28 + $0x28] ss:$16 sps:$4 sm:$0xff]   ;;  %v982_v30 = vld [vmem:[%s1261_s28 + $0x4] ss:$16 sps:$4 sm:$0xff]  }
  0x43   : > { %730 = vmatpush1.bf16.msra.mxu1 %v957_v13  ;;  %v984_v31 = vld [vmem:[%s1261_s28 + $0xc] ss:$16 sps:$4 sm:$0xff]   ;;  %v986_v32 = vld [vmem:[%s1261_s28] ss:$16 sps:$4 sm:$0xff]   ;;  %v987_v33 = vld [vmem:[%s1261_s28 + $0x8] ss:$16 sps:$4 sm:$0xff]  }
  0x44   : > { %731 = vmatprep.subr.bf16.mxu1 %v960_v15  ;;  %v988_v34 = vld [vmem:[%s1261_s28 + $0x1e4] ss:$16 sps:$4 sm:$0xff]   ;;  %v990_v35 = vld [vmem:[%s1261_s28 + $0x1ec] ss:$16 sps:$4 sm:$0xff]   ;;  %v992_v36 = vld [vmem:[%s1261_s28 + $0x1e0] ss:$16 sps:$4 sm:$0xff]  }
  0x45   : > { %689 = vmatpush1.bf16.msra.mxu0 %v956_v12  ;;  %v993_v37 = vld [vmem:[%s1261_s28 + $0x1e8] ss:$16 sps:$4 sm:$0xff]   ;;  %v994_v38 = vld [vmem:[%s1261_s28 + $0x1c4] ss:$16 sps:$4 sm:$0xff]   ;;  %v996_v39 = vld [vmem:[%s1261_s28 + $0x1cc] ss:$16 sps:$4 sm:$0xff]  }
  0x46   : > { %690 = vmatprep.subr.bf16.mxu0 %v958_v14  ;;  %v998_v40 = vld [vmem:[%s1261_s28 + $0x1c0] ss:$16 sps:$4 sm:$0xff]   ;;  %v999_v41 = vld [vmem:[%s1261_s28 + $0x1c8] ss:$16 sps:$4 sm:$0xff]   ;;  %v1000_v42 = vld [vmem:[%s1261_s28 + $0x1a4] ss:$16 sps:$4 sm:$0xff]  }
  0x47   : > { %732 = vmatpush1.bf16.msra.mxu1 %v963_v17  ;;  %v1002_v43 = vld [vmem:[%s1261_s28 + $0x1ac] ss:$16 sps:$4 sm:$0xff]   ;;  %v1004_v44 = vld [vmem:[%s1261_s28 + $0x1a0] ss:$16 sps:$4 sm:$0xff]   ;;  %v1005_v45 = vld [vmem:[%s1261_s28 + $0x1a8] ss:$16 sps:$4 sm:$0xff]  }
  0x48   : > { %733 = vmatprep.subr.bf16.mxu1 %v966_v19  ;;  %v1006_v46 = vld [vmem:[%s1261_s28 + $0x184] ss:$16 sps:$4 sm:$0xff]   ;;  %v1008_v47 = vld [vmem:[%s1261_s28 + $0x18c] ss:$16 sps:$4 sm:$0xff]   ;;  %v1010_v48 = vld [vmem:[%s1261_s28 + $0x180] ss:$16 sps:$4 sm:$0xff]  }
  0x49   : > { %691 = vmatpush1.bf16.msra.mxu0 %v962_v16  ;;  %v1011_v49 = vld [vmem:[%s1261_s28 + $0x188] ss:$16 sps:$4 sm:$0xff]   ;;  %v1012_v50 = vld [vmem:[%s1261_s28 + $0x164] ss:$16 sps:$4 sm:$0xff]   ;;  %v1014_v51 = vld [vmem:[%s1261_s28 + $0x16c] ss:$16 sps:$4 sm:$0xff]  }
  0x4a   : > { %692 = vmatprep.subr.bf16.mxu0 %v964_v18  ;;  %v1016_v52 = vld [vmem:[%s1261_s28 + $0x160] ss:$16 sps:$4 sm:$0xff]   ;;  %v1017_v53 = vld [vmem:[%s1261_s28 + $0x168] ss:$16 sps:$4 sm:$0xff]   ;;  %v1018_v54 = vld [vmem:[%s1261_s28 + $0x144] ss:$16 sps:$4 sm:$0xff]  }
  0x4b   : > { %734 = vmatpush1.bf16.msra.mxu1 %v969_v21  ;;  %v1020_v55 = vld [vmem:[%s1261_s28 + $0x14c] ss:$16 sps:$4 sm:$0xff]   ;;  %v1022_v56 = vld [vmem:[%s1261_s28 + $0x140] ss:$16 sps:$4 sm:$0xff]   ;;  %v1023_v57 = vld [vmem:[%s1261_s28 + $0x148] ss:$16 sps:$4 sm:$0xff]  }
  0x4c   : > { %735 = vmatprep.subr.bf16.mxu1 %v972_v23  ;;  %v1024_v58 = vld [vmem:[%s1261_s28 + $0x124] ss:$16 sps:$4 sm:$0xff]   ;;  %v1026_v59 = vld [vmem:[%s1261_s28 + $0x12c] ss:$16 sps:$4 sm:$0xff]   ;;  %v1028_v60 = vld [vmem:[%s1261_s28 + $0x120] ss:$16 sps:$4 sm:$0xff]  }
  0x4d   : > { %693 = vmatpush1.bf16.msra.mxu0 %v968_v20  ;;  %v1029_v61 = vld [vmem:[%s1261_s28 + $0x128] ss:$16 sps:$4 sm:$0xff]   ;;  %v1030_v62 = vld [vmem:[%s1261_s28 + $0x104] ss:$16 sps:$4 sm:$0xff]   ;;  %v1032_v63 = vld [vmem:[%s1261_s28 + $0x10c] ss:$16 sps:$4 sm:$0xff]  }
  0x4e   : > { %694 = vmatprep.subr.bf16.mxu0 %v970_v22  ;;  %v1034_v1 = vld [vmem:[%s1261_s28 + $0x100] ss:$16 sps:$4 sm:$0xff]   ;;  %v1035_v2 = vld [vmem:[%s1261_s28 + $0x108] ss:$16 sps:$4 sm:$0xff]   ;;  %s846_s30 = sshll.u32 %s1351_s29, 3 }
  0x4f   : > { %736 = vmatpush1.bf16.msra.mxu1 %v975_v25  ;;  %s290_s5 = scalar_lea.vmem %s1346_s2, %s846_s30 }
  0x50   : > { %737 = vmatprep.subr.bf16.mxu1 %v978_v27 }
  0x51   : > { %695 = vmatpush1.bf16.msra.mxu0 %v974_v24 }
  0x52   : > { %696 = vmatprep.subr.bf16.mxu0 %v976_v26 }
  0x53   : > { %738 = vmatpush1.bf16.msra.mxu1 %v981_v29 }
  0x54   : > { %739 = vmatprep.subr.bf16.mxu1 %v984_v31 }
  0x55   : > { %697 = vmatpush1.bf16.msra.mxu0 %v980_v28 }
  0x56   : > { %698 = vmatprep.subr.bf16.mxu0 %v982_v30 }
  0x57   : > { %740 = vmatpush1.bf16.msra.mxu1 %v987_v33 }
  0x58   : > { %741 = vmatprep.subr.bf16.mxu1 %v990_v35 }
  0x59   : > { %699 = vmatpush1.bf16.msra.mxu0 %v986_v32 }
  0x5a   : > { %700 = vmatprep.subr.bf16.mxu0 %v988_v34 }
  0x5b   : > { %742 = vmatpush2.bf16.msra.mxu1 %v993_v37 }
  0x5c   : > { %743 = vmatprep.subr.bf16.mxu1 %v996_v39 }
  0x5d   : > { %701 = vmatpush2.bf16.msra.mxu0 %v992_v36 }
  0x5e   : > { %702 = vmatprep.subr.bf16.mxu0 %v994_v38 }
  0x5f   : > { %744 = vmatpush2.bf16.msra.mxu1 %v999_v41 }
  0x60   : > { %745 = vmatprep.subr.bf16.mxu1 %v1002_v43 }
  0x61   : > { %703 = vmatpush2.bf16.msra.mxu0 %v998_v40 }
  0x62   : > { %704 = vmatprep.subr.bf16.mxu0 %v1000_v42 }
  0x63   : > { %746 = vmatpush2.bf16.msra.mxu1 %v1005_v45 }
  0x64   : > { %747 = vmatprep.subr.bf16.mxu1 %v1008_v47 }
  0x65   : > { %705 = vmatpush2.bf16.msra.mxu0 %v1004_v44 }
  0x66   : > { %706 = vmatprep.subr.bf16.mxu0 %v1006_v46 }
  0x67   : > { %748 = vmatpush2.bf16.msra.mxu1 %v1011_v49 }
  0x68   : > { %749 = vmatprep.subr.bf16.mxu1 %v1014_v51 }
  0x69   : > { %707 = vmatpush2.bf16.msra.mxu0 %v1010_v48 }
  0x6a   : > { %708 = vmatprep.subr.bf16.mxu0 %v1012_v50 }
  0x6b   : > { %750 = vmatpush2.bf16.msra.mxu1 %v1017_v53 }
  0x6c   : > { %751 = vmatprep.subr.bf16.mxu1 %v1020_v55 }
  0x6d   : > { %709 = vmatpush2.bf16.msra.mxu0 %v1016_v52 }
  0x6e   : > { %710 = vmatprep.subr.bf16.mxu0 %v1018_v54 }
  0x6f   : > { %752 = vmatpush2.bf16.msra.mxu1 %v1023_v57 }
  0x70   : > { %753 = vmatprep.subr.bf16.mxu1 %v1026_v59 }
  0x71   : > { %711 = vmatpush2.bf16.msra.mxu0 %v1022_v56 }
  0x72   : > { %712 = vmatprep.subr.bf16.mxu0 %v1024_v58 }
  0x73   : > { %754 = vmatpush2.bf16.msra.mxu1 %v1029_v61 }
  0x74   : > { %755 = vmatprep.subr.bf16.mxu1 %v1032_v63 }
  0x75   : > { %713 = vmatpush2.bf16.msra.mxu0 %v1028_v60 }
  0x76   : > { %714 = vmatprep.subr.bf16.mxu0 %v1030_v62 }
  0x77   : > { %756 = vmatpush2.bf16.msra.mxu1 %v1035_v2 }
  0x79   : > { %715 = vmatpush2.bf16.msra.mxu0 %v1034_v1 }
  0x7a   : > { %758 = vmatmul.mubr.bf16.vlgmr.msra.gmra.mxu1 %v847_v3 }
  0x7c   : > { %717 = vmatmul.mubr.bf16.vlgmr.msra.gmra.mxu0 %v847_v3 }
 0x13a   : > { %v759_v5 = vpop.f32.mrf.mxu1 }
 0x13c   : > { %v718_v4 = vpop.f32.mrf.mxu0  ;;  %v761_v7 = vpop.f32.mrf.mxu1 }
 0x13d   : > { %1038 = vtanh.f32 %v718_v4 }
 0x13e   : > { %1040 = vtanh.f32 %v759_v5  ;;  %v720_v6 = vpop.f32.mrf.mxu0  ;;  %v763_v9 = vpop.f32.mrf.mxu1 }
 0x13f   : > { %1042 = vtanh.f32 %v720_v6 }
 0x140   : > { %1044 = vtanh.f32 %v761_v7  ;;  %v722_v8 = vpop.f32.mrf.mxu0  ;;  %v764_v0 = vpop.f32.mrf.mxu1 }
 0x142   : > { %v723_v10 = vpop.f32.mrf.mxu0 }
 0x14a   : > { %v1039_v11 = vpop.eup %1038 }
 0x14b   : > { %v1041_v12 = vpop.eup %1040  ;;  %770 = vst [vmem:[%s290_s5] sm:$0xff] %v1039_v11 }
 0x14c   : > { %v1043_v13 = vpop.eup %1042  ;;  %772 = vst [vmem:[%s290_s5 + $0x10] sm:$0xff] %v1041_v12 }
 0x14d   : > { %v1045_v14 = vpop.eup %1044  ;;  %771 = vst [vmem:[%s290_s5 + $0x8] sm:$0xff] %v1043_v13 }
 0x14e   : > { %773 = vst [vmem:[%s290_s5 + $0x18] sm:$0xff] %v1045_v14 }
 0x14f PF: > { %p9_p9 = scmp.ge.s32.totalorder %s1102_s13, 9   ;;  %s1347_s9 = smov %s1064_s10 }
 0x150   : > { %s1348_s10 = smov %s1111_s16  ;;  %s1349_s11 = smov %s1102_s13 }
 0x151   :  { %11 = sbr.rel (!%p9_p9) target bundleno = 2 (0x2), region = 86 }

</bundles_post_ra>
